<compile_context>
chip_gen: v5e
topology: v5e:2x2
jax: 0.10.0
libtpu: 0.0.40
codegen_flags: <defaults>
</compile_context>

<pallas_src>
import functools

import jax
import jax.numpy as jnp
from jax.experimental import pallas as pl
from jax.experimental.pallas import tpu as pltpu


# --------------------------------------------------------------------------
# helpers
# --------------------------------------------------------------------------
def _pick_tile(dim, candidates):
    """First candidate (pass them in DECREASING order) that divides `dim`;
    falls back to the full dim (full-extent blocks are always legal)."""
    for c in candidates:
        if c <= dim and dim % c == 0:
            return c
    return dim


_CONV_TILE_CANDIDATES = (2048, 1024, 512, 256, 128)
_ATTN_TILE_CANDIDATES = (512, 256, 128)


# --------------------------------------------------------------------------
# Kernel 1: fused key/value 1x1 conv (+BN fold, +attention-scale fold).
#   one read of x, one (Ck+Cv, Cin) MXU matmul, two bf16 outputs.
# --------------------------------------------------------------------------
def _kv_conv_kernel(x_ref, w_ref, b_ref, okey_ref, oval_ref, *, ck):
    x = x_ref[0].astype(jnp.bfloat16)                     # (Cin, tl)
    y = jnp.dot(w_ref[...], x, preferred_element_type=jnp.float32)
    y = y + b_ref[...]                                    # (Ckv,1) lane-bcast
    okey_ref[0] = y[:ck].astype(okey_ref.dtype)
    oval_ref[0] = y[ck:].astype(oval_ref.dtype)


def kv_conv(x, w_kv, b_kv, ck):
    """x: (N, Cin, L) f32  ->  keyq (N, ck, L) bf16, val (N, Ckv-ck, L) bf16."""
    N, Cin, L = x.shape
    Ckv = w_kv.shape[0]
    cv = Ckv - ck
    tl = _pick_tile(L, _CONV_TILE_CANDIDATES)
    b2d = b_kv.reshape(Ckv, 1).astype(jnp.float32)
    return pl.pallas_call(
        functools.partial(_kv_conv_kernel, ck=ck),
        out_shape=(jax.ShapeDtypeStruct((N, ck, L), jnp.bfloat16),
                   jax.ShapeDtypeStruct((N, cv, L), jnp.bfloat16)),
        grid=(N, L // tl),
        in_specs=[pl.BlockSpec((1, Cin, tl), lambda n, l: (n, 0, l)),
                  pl.BlockSpec((Ckv, Cin), lambda n, l: (0, 0)),   # resident
                  pl.BlockSpec((Ckv, 1), lambda n, l: (0, 0))],    # resident
        out_specs=[pl.BlockSpec((1, ck, tl), lambda n, l: (n, 0, l)),
                   pl.BlockSpec((1, cv, tl), lambda n, l: (n, 0, l))],
        compiler_params=pltpu.CompilerParams(
            dimension_semantics=("parallel", "parallel")),
    )(x, w_kv.astype(jnp.bfloat16), b2d)


# --------------------------------------------------------------------------
# Kernel 2: self attention, NCHW-native (channels on sublanes, spatial on
# lanes).  Attention scale is pre-folded into the key/query projection.
#   s[k,q] = sum_c key[c,k] * query[c,q];  softmax over k;  ctx = v @ p
# --------------------------------------------------------------------------
def _attn_single_kernel(q_ref, k_ref, v_ref, o_ref):
    # whole kv length in one tile: direct softmax, no rescale machinery.
    q = q_ref[0]                                          # (Ck, tq) bf16
    k = k_ref[0]                                          # (Ck, L)  bf16
    v = v_ref[0]                                          # (Cv, L)  bf16
    s = jax.lax.dot_general(k, q, (((0,), (0,)), ((), ())),
                            preferred_element_type=jnp.float32)   # (L, tq)
    m = jnp.max(s, axis=0, keepdims=True)
    p = jnp.exp(s - m)
    l = jnp.sum(p, axis=0, keepdims=True)
    ctx = jnp.dot(v, p.astype(v.dtype), preferred_element_type=jnp.float32)
    o_ref[0] = (ctx * pl.reciprocal(l, approx=True)).astype(o_ref.dtype)


def _attn_flash_kernel(q_ref, k_ref, v_ref, o_ref, m_sc, l_sc, acc_sc):
    kv = pl.program_id(2)

    @pl.when(kv == 0)
    def _():
        m_sc[...] = jnp.full(m_sc.shape, -jnp.inf, jnp.float32)
        l_sc[...] = jnp.zeros(l_sc.shape, jnp.float32)
        acc_sc[...] = jnp.zeros(acc_sc.shape, jnp.float32)

    q = q_ref[0]                                          # (Ck, tq)
    k = k_ref[0]                                          # (Ck, tk)
    v = v_ref[0]                                          # (Cv, tk)
    s = jax.lax.dot_general(k, q, (((0,), (0,)), ((), ())),
                            preferred_element_type=jnp.float32)   # (tk, tq)
    m_prev = m_sc[...]
    m_new = jnp.maximum(m_prev, jnp.max(s, axis=0, keepdims=True))
    alpha = jnp.exp(m_prev - m_new)
    p = jnp.exp(s - m_new)
    l_sc[...] = alpha * l_sc[...] + jnp.sum(p, axis=0, keepdims=True)
    acc_sc[...] = alpha * acc_sc[...] + jnp.dot(
        v, p.astype(v.dtype), preferred_element_type=jnp.float32)
    m_sc[...] = m_new

    @pl.when(kv == pl.num_programs(2) - 1)
    def _():
        o_ref[0] = (acc_sc[...] *
                    pl.reciprocal(l_sc[...], approx=True)).astype(o_ref.dtype)


def attention_nchw(keyq, val):
    """keyq: (N, Ck, L), val: (N, Cv, L) bf16  ->  context (N, Cv, L) bf16."""
    N, Ck, L = keyq.shape
    Cv = val.shape[1]
    tq = _pick_tile(L, _ATTN_TILE_CANDIDATES)
    tk = _pick_tile(L, _ATTN_TILE_CANDIDATES)

    if L == tk:
        # single kv tile -> plain softmax kernel, kv grid axis collapsed away
        return pl.pallas_call(
            _attn_single_kernel,
            out_shape=jax.ShapeDtypeStruct((N, Cv, L), jnp.bfloat16),
            grid=(N, L // tq),
            in_specs=[pl.BlockSpec((1, Ck, tq), lambda b, qi: (b, 0, qi)),
                      pl.BlockSpec((1, Ck, L), lambda b, qi: (b, 0, 0)),
                      pl.BlockSpec((1, Cv, L), lambda b, qi: (b, 0, 0))],
            out_specs=pl.BlockSpec((1, Cv, tq), lambda b, qi: (b, 0, qi)),
            compiler_params=pltpu.CompilerParams(
                dimension_semantics=("parallel", "parallel")),
        )(keyq, keyq, val)

    return pl.pallas_call(
        _attn_flash_kernel,
        out_shape=jax.ShapeDtypeStruct((N, Cv, L), jnp.bfloat16),
        grid=(N, L // tq, L // tk),
        in_specs=[pl.BlockSpec((1, Ck, tq), lambda b, qi, ki: (b, 0, qi)),
                  pl.BlockSpec((1, Ck, tk), lambda b, qi, ki: (b, 0, ki)),
                  pl.BlockSpec((1, Cv, tk), lambda b, qi, ki: (b, 0, ki))],
        out_specs=pl.BlockSpec((1, Cv, tq), lambda b, qi, ki: (b, 0, qi)),
        scratch_shapes=[pltpu.VMEM((1, tq), jnp.float32),
                        pltpu.VMEM((1, tq), jnp.float32),
                        pltpu.VMEM((Cv, tq), jnp.float32)],
        compiler_params=pltpu.CompilerParams(
            dimension_semantics=("parallel", "parallel", "arbitrary")),
    )(keyq, keyq, val)


# --------------------------------------------------------------------------
# Kernel 3: fused output conv.
#   out = w_ctx @ context + w_x @ feats + b
# i.e. conv_bn_dropout(cat([W(context), feats], C)) with the W conv folded
# into w_ctx and the channel concat fused away.
# --------------------------------------------------------------------------
def _fused_out_kernel(c_ref, x_ref, wc_ref, wx_ref, b_ref, o_ref):
    c = c_ref[0]                                          # (Cv, tl) bf16
    x = x_ref[0].astype(jnp.bfloat16)                     # (Cin, tl)
    y = jnp.dot(wc_ref[...], c, preferred_element_type=jnp.float32)
    y = y + jnp.dot(wx_ref[...], x, preferred_element_type=jnp.float32)
    y = y + b_ref[...]
    o_ref[0] = y.astype(o_ref.dtype)


def fused_output_conv(ctx, x, w_ctx, w_x, b, out_dtype=jnp.float32):
    N, Cv, L = ctx.shape
    Cin = x.shape[1]
    Cout = w_ctx.shape[0]
    tl = _pick_tile(L, _CONV_TILE_CANDIDATES)
    b2d = b.reshape(Cout, 1).astype(jnp.float32)
    return pl.pallas_call(
        _fused_out_kernel,
        out_shape=jax.ShapeDtypeStruct((N, Cout, L), out_dtype),
        grid=(N, L // tl),
        in_specs=[pl.BlockSpec((1, Cv, tl), lambda n, l: (n, 0, l)),
                  pl.BlockSpec((1, Cin, tl), lambda n, l: (n, 0, l)),
                  pl.BlockSpec((Cout, Cv), lambda n, l: (0, 0)),   # resident
                  pl.BlockSpec((Cout, Cin), lambda n, l: (0, 0)),  # resident
                  pl.BlockSpec((Cout, 1), lambda n, l: (0, 0))],   # resident
        out_specs=pl.BlockSpec((1, Cout, tl), lambda n, l: (n, 0, l)),
        compiler_params=pltpu.CompilerParams(
            dimension_semantics=("parallel", "parallel")),
    )(ctx, x, w_ctx.astype(jnp.bfloat16), w_x.astype(jnp.bfloat16), b2d)


# --------------------------------------------------------------------------
# Parameter construction (deterministic surrogate weights; BN in eval mode
# with fresh-init statistics gamma=1, beta=0, mean=0, var=1, folded into the
# conv weights).  Weight layout is (Cout, Cin) == PyTorch 1x1 conv squeezed.
# --------------------------------------------------------------------------
def make_base_oc(key, in_ch, out_ch, key_ch, val_ch, eps=1e-5):
    ks = jax.random.split(key, 8)
    bn_scale = 1.0 / jnp.sqrt(1.0 + eps)     # gamma / sqrt(var + eps)

    def kaiming(k, cout, cin):
        return jax.random.normal(k, (cout, cin), jnp.float32) * (cin ** -0.5)

    # attention scale key_ch**-0.5 is split evenly between query and key;
    # since f_query IS f_key, fold key_ch**-0.25 into that single projection.
    attn_fold = float(key_ch) ** -0.25

    # f_key (== f_query): Conv2d(in->key, 1x1) + BatchNorm2d(key)   [BN folded]
    w_key = kaiming(ks[0], key_ch, in_ch) * bn_scale * attn_fold
    b_key = (0.05 * jax.random.normal(ks[1], (key_ch,), jnp.float32)
             * bn_scale * attn_fold)
    # f_value: Conv2d(in->value, 1x1)
    w_val = kaiming(ks[2], val_ch, in_ch)
    b_val = 0.05 * jax.random.normal(ks[3], (val_ch,), jnp.float32)

    w_kv = jnp.concatenate([w_key, w_val], axis=0)          # (key+val, in)
    b_kv = jnp.concatenate([b_key, b_val], axis=0)

    # W: Conv2d(value->out, 1x1).  NOTE: the reference zero-inits W.weight and
    # W.bias (a fresh module's attention branch outputs zeros); nonzero
    # deterministic weights are used so the attention kernels are numerically
    # exercised.  Set w_W to zeros to match the reference init exactly.
    w_W = kaiming(ks[4], out_ch, val_ch)
    b_W = jnp.zeros((out_ch,), jnp.float32)

    # conv_bn_dropout: Conv2d(in+out -> out, 1x1) + BN + Dropout2d  [BN folded;
    # Dropout2d is identity in eval mode].  cat order = [context, feats].
    w_cbd = kaiming(ks[5], out_ch, out_ch + in_ch) * bn_scale
    b_cbd = 0.05 * jax.random.normal(ks[6], (out_ch,), jnp.float32) * bn_scale
    w_cbd_ctx = w_cbd[:, :out_ch]
    w_cbd_x = w_cbd[:, out_ch:]

    # fold the W conv into conv_bn_dropout (no nonlinearity in between)
    w_out_ctx = w_cbd_ctx @ w_W                              # (out, val)
    b_out = b_cbd + w_cbd_ctx @ b_W

    return dict(w_kv=w_kv, b_kv=b_kv,
                w_out_ctx=w_out_ctx, w_out_x=w_cbd_x, b_out=b_out,
                key_ch=key_ch)


# --------------------------------------------------------------------------
# Forward pass (BaseOC_Module.forward, sizes=[1]) — all NCHW, no transposes.
# --------------------------------------------------------------------------
def base_oc_forward(params, feats_nchw):
    p = params
    N, Cin, H, W = feats_nchw.shape
    L = H * W
    x = feats_nchw.reshape(N, Cin, L)                        # free reshape

    keyq, val = kv_conv(x, p["w_kv"], p["b_kv"], p["key_ch"])  # f_key/f_value
    ctx = attention_nchw(keyq, val)                            # (N, Cv, L)
    out = fused_output_conv(ctx, x, p["w_out_ctx"], p["w_out_x"], p["b_out"])
    return out.reshape(N, -1, H, W)


# --------------------------------------------------------------------------
# Pure-JAX reference (same folded params & bf16 operand rounding, exact
# softmax, no Pallas) for correctness checking.
# --------------------------------------------------------------------------
def reference_forward(params, feats_nchw):
    p = params
    N, Cin, H, W = feats_nchw.shape
    L = H * W
    xb = feats_nchw.reshape(N, Cin, L).astype(jnp.bfloat16)

    kv = (jnp.einsum("oc,ncl->nol", p["w_kv"].astype(jnp.bfloat16), xb,
                     preferred_element_type=jnp.float32)
          + p["b_kv"].reshape(1, -1, 1)).astype(jnp.bfloat16)
    ck = p["key_ch"]
    keyq, val = kv[:, :ck, :], kv[:, ck:, :]

    s = jnp.einsum("nci,ncj->nij", keyq, keyq,
                   preferred_element_type=jnp.float32)       # scale pre-folded
    pm = jax.nn.softmax(s, axis=-1).astype(jnp.bfloat16)
    ctx = jnp.einsum("nij,ncj->nci", pm, val,
                     preferred_element_type=jnp.float32).astype(jnp.bfloat16)

    out = (jnp.einsum("oc,ncl->nol", p["w_out_ctx"].astype(jnp.bfloat16), ctx,
                      preferred_element_type=jnp.float32)
           + jnp.einsum("oc,ncl->nol", p["w_out_x"].astype(jnp.bfloat16), xb,
                        preferred_element_type=jnp.float32)
           + p["b_out"].reshape(1, -1, 1))
    return out.reshape(N, -1, H, W)


# --------------------------------------------------------------------------
def _run_case(seed, Nb, Cin, H, W, out_ch, key_ch, val_ch, tol=3e-2):
    feats = jax.random.normal(jax.random.PRNGKey(seed), (Nb, Cin, H, W),
                              jnp.float32)
    params = make_base_oc(jax.random.PRNGKey(42), Cin, out_ch, key_ch, val_ch)

    fwd = jax.jit(lambda t: base_oc_forward(params, t))
    out = jax.block_until_ready(fwd(feats))

    assert out.shape == (Nb, out_ch, H, W), out.shape
    assert bool(jnp.all(jnp.isfinite(out)))

    ref = jax.block_until_ready(reference_forward(params, feats))
    max_err = float(jnp.max(jnp.abs(out - ref)))
    assert max_err < tol, f"max abs err vs reference = {max_err}"
    return max_err


if __name__ == "__main__":
    # BaseOC_Module(in_channels=128, out_channels=128, key_channels=128,
    #               value_channels=128, dropout=0.05, sizes=[1])
    # case 1: 16x16 map (L=256) -> single-tile softmax path
    _run_case(seed=0, Nb=2, Cin=128, H=16, W=16,
              out_ch=128, key_ch=128, val_ch=128)
    # case 2: 32x32 map (L=1024) -> flash (online-softmax) path, 512 tiles
    _run_case(seed=1, Nb=2, Cin=128, H=32, W=32,
              out_ch=128, key_ch=128, val_ch=128)
    print("KERNEL_OK")
</pallas_src>

<mosaic_0001>
module attributes {stable_mosaic.version = 11 : i64} {
  func.func @_attn_single_kernel(%arg0: i32, %arg1: i32, %arg2: memref<1x128x256xbf16, #tpu.memory_space<vmem>>, %arg3: memref<1x128x256xbf16, #tpu.memory_space<vmem>>, %arg4: memref<1x128x256xbf16, #tpu.memory_space<vmem>>, %arg5: memref<1x128x256xbf16, #tpu.memory_space<vmem>>) attributes {dimension_semantics = [#tpu.dimension_semantics<parallel>, #tpu.dimension_semantics<parallel>], iteration_bounds = array<i64: 2, 1>, scalar_prefetch = 0 : i64, scratch_operands = 0 : i64, tpu.core_type = #tpu.core_type<tc>, window_params = [{transform_indices = @transform_0, window_bounds = array<i64: 1, 128, 256>}, {transform_indices = @transform_1, window_bounds = array<i64: 1, 128, 256>}, {transform_indices = @transform_2, window_bounds = array<i64: 1, 128, 256>}, {transform_indices = @transform_3, window_bounds = array<i64: 1, 128, 256>}]} {
    %c0 = arith.constant 0 : index
    %c0_0 = arith.constant 0 : index
    %c0_1 = arith.constant 0 : index
    %0 = vector.load %arg2[%c0, %c0_0, %c0_1] : memref<1x128x256xbf16, #tpu.memory_space<vmem>>, vector<1x128x256xbf16>
    %1 = vector.shape_cast %0 : vector<1x128x256xbf16> to vector<128x256xbf16>
    %c0_2 = arith.constant 0 : index
    %c0_3 = arith.constant 0 : index
    %c0_4 = arith.constant 0 : index
    %2 = vector.load %arg3[%c0_2, %c0_3, %c0_4] : memref<1x128x256xbf16, #tpu.memory_space<vmem>>, vector<1x128x256xbf16>
    %3 = vector.shape_cast %2 : vector<1x128x256xbf16> to vector<128x256xbf16>
    %c0_5 = arith.constant 0 : index
    %c0_6 = arith.constant 0 : index
    %c0_7 = arith.constant 0 : index
    %4 = vector.load %arg4[%c0_5, %c0_6, %c0_7] : memref<1x128x256xbf16, #tpu.memory_space<vmem>>, vector<1x128x256xbf16>
    %5 = vector.shape_cast %4 : vector<1x128x256xbf16> to vector<128x256xbf16>
    %cst = arith.constant dense<0.000000e+00> : vector<256x256xf32>
    %6 = tpu.matmul %3, %1, %cst {dimension_numbers = #tpu.dot_dimension_numbers<[0], [0], [1], [1], [0, 1, 1, 1], [], []>} : vector<128x256xbf16>, vector<128x256xbf16>, vector<256x256xf32> -> vector<256x256xf32>
    %cst_8 = arith.constant dense<0xFF800000> : vector<256xf32>
    %7 = vector.multi_reduction <maximumf>, %6, %cst_8 [0] : vector<256x256xf32> to vector<256xf32>
    %8 = vector.shape_cast %7 : vector<256xf32> to vector<1x256xf32>
    %9 = vector.broadcast %8 : vector<1x256xf32> to vector<256x256xf32>
    %10 = arith.subf %6, %9 : vector<256x256xf32>
    %11 = math.exp %10 : vector<256x256xf32>
    %cst_9 = arith.constant dense<0.000000e+00> : vector<256xf32>
    %12 = vector.multi_reduction <add>, %11, %cst_9 [0] : vector<256x256xf32> to vector<256xf32>
    %13 = vector.shape_cast %12 : vector<256xf32> to vector<1x256xf32>
    %14 = arith.truncf %11 : vector<256x256xf32> to vector<256x256xbf16>
    %cst_10 = arith.constant dense<0.000000e+00> : vector<128x256xf32>
    %15 = tpu.matmul %5, %14, %cst_10 {dimension_numbers = #tpu.dot_dimension_numbers<[1], [0], [0], [1], [0, 0, 1, 1], [], []>} : vector<128x256xbf16>, vector<256x256xbf16>, vector<128x256xf32> -> vector<128x256xf32>
    %16 = tpu.reciprocal %13 {approx = true} : vector<1x256xf32> -> vector<1x256xf32>
    %17 = vector.broadcast %16 : vector<1x256xf32> to vector<128x256xf32>
    %18 = arith.mulf %15, %17 : vector<128x256xf32>
    %19 = arith.truncf %18 : vector<128x256xf32> to vector<128x256xbf16>
    %c0_11 = arith.constant 0 : index
    %c0_12 = arith.constant 0 : index
    %c0_13 = arith.constant 0 : index
    %20 = vector.load %arg5[%c0_11, %c0_12, %c0_13] : memref<1x128x256xbf16, #tpu.memory_space<vmem>>, vector<1x128x256xbf16>
    %21 = vector.shape_cast %20 : vector<1x128x256xbf16> to vector<128x256xbf16>
    %22 = vector.shape_cast %19 : vector<128x256xbf16> to vector<1x128x256xbf16>
    tpu.vector_store %arg5[%c0_11, %c0_12, %c0_13], %22 {strides = array<i32>} : memref<1x128x256xbf16, #tpu.memory_space<vmem>>, vector<1x128x256xbf16>,
    return
  }
  func.func @transform_0(%arg0: i32, %arg1: i32) -> (i32, i32, i32) {
    %c0_i32 = arith.constant 0 : i32
    %c0_i32_0 = arith.constant 0 : i32
    return %arg0, %c0_i32, %arg1 : i32, i32, i32
  }
  func.func @transform_1(%arg0: i32, %arg1: i32) -> (i32, i32, i32) {
    %c0_i32 = arith.constant 0 : i32
    %c0_i32_0 = arith.constant 0 : i32
    %c0_i32_1 = arith.constant 0 : i32
    return %arg0, %c0_i32, %c0_i32_0 : i32, i32, i32
  }
  func.func @transform_2(%arg0: i32, %arg1: i32) -> (i32, i32, i32) {
    %c0_i32 = arith.constant 0 : i32
    %c0_i32_0 = arith.constant 0 : i32
    %c0_i32_1 = arith.constant 0 : i32
    return %arg0, %c0_i32, %c0_i32_0 : i32, i32, i32
  }
  func.func @transform_3(%arg0: i32, %arg1: i32) -> (i32, i32, i32) {
    %c0_i32 = arith.constant 0 : i32
    %c0_i32_0 = arith.constant 0 : i32
    return %arg0, %c0_i32, %arg1 : i32, i32, i32
  }
}

module attributes {stable_mosaic.version = 11 : i64} {
  func.func @_fused_out_kernel(%arg0: i32, %arg1: i32, %arg2: memref<1x128x256xbf16, #tpu.memory_space<vmem>>, %arg3: memref<1x128x256xf32, #tpu.memory_space<vmem>>, %arg4: memref<128x128xbf16, #tpu.memory_space<vmem>>, %arg5: memref<128x128xbf16, #tpu.memory_space<vmem>>, %arg6: memref<128x1xf32, #tpu.memory_space<vmem>>, %arg7: memref<1x128x256xf32, #tpu.memory_space<vmem>>) attributes {dimension_semantics = [#tpu.dimension_semantics<parallel>, #tpu.dimension_semantics<parallel>], iteration_bounds = array<i64: 2, 1>, scalar_prefetch = 0 : i64, scratch_operands = 0 : i64, tpu.core_type = #tpu.core_type<tc>, window_params = [{transform_indices = @transform_0, window_bounds = array<i64: 1, 128, 256>}, {transform_indices = @transform_1, window_bounds = array<i64: 1, 128, 256>}, {pipeline_mode = #tpu.pipeline_mode<synchronous>, transform_indices = @transform_2, window_bounds = array<i64: 128, 128>}, {pipeline_mode = #tpu.pipeline_mode<synchronous>, transform_indices = @transform_3, window_bounds = array<i64: 128, 128>}, {pipeline_mode = #tpu.pipeline_mode<synchronous>, transform_indices = @transform_4, window_bounds = array<i64: 128, 1>}, {transform_indices = @transform_5, window_bounds = array<i64: 1, 128, 256>}]} {
    %c0 = arith.constant 0 : index
    %c0_0 = arith.constant 0 : index
    %c0_1 = arith.constant 0 : index
    %0 = vector.load %arg2[%c0, %c0_0, %c0_1] : memref<1x128x256xbf16, #tpu.memory_space<vmem>>, vector<1x128x256xbf16>
    %1 = vector.shape_cast %0 : vector<1x128x256xbf16> to vector<128x256xbf16>
    %c0_2 = arith.constant 0 : index
    %c0_3 = arith.constant 0 : index
    %c0_4 = arith.constant 0 : index
    %2 = vector.load %arg3[%c0_2, %c0_3, %c0_4] : memref<1x128x256xf32, #tpu.memory_space<vmem>>, vector<1x128x256xf32>
    %3 = vector.shape_cast %2 : vector<1x128x256xf32> to vector<128x256xf32>
    %4 = arith.truncf %3 : vector<128x256xf32> to vector<128x256xbf16>
    %c0_5 = arith.constant 0 : index
    %c0_6 = arith.constant 0 : index
    %5 = vector.load %arg4[%c0_5, %c0_6] : memref<128x128xbf16, #tpu.memory_space<vmem>>, vector<128x128xbf16>
    %cst = arith.constant dense<0.000000e+00> : vector<128x256xf32>
    %6 = tpu.matmul %5, %1, %cst {dimension_numbers = #tpu.dot_dimension_numbers<[1], [0], [0], [1], [0, 0, 1, 1], [], []>} : vector<128x128xbf16>, vector<128x256xbf16>, vector<128x256xf32> -> vector<128x256xf32>
    %c0_7 = arith.constant 0 : index
    %c0_8 = arith.constant 0 : index
    %7 = vector.load %arg5[%c0_7, %c0_8] : memref<128x128xbf16, #tpu.memory_space<vmem>>, vector<128x128xbf16>
    %cst_9 = arith.constant dense<0.000000e+00> : vector<128x256xf32>
    %8 = tpu.matmul %7, %4, %cst_9 {dimension_numbers = #tpu.dot_dimension_numbers<[1], [0], [0], [1], [0, 0, 1, 1], [], []>} : vector<128x128xbf16>, vector<128x256xbf16>, vector<128x256xf32> -> vector<128x256xf32>
    %9 = arith.addf %6, %8 : vector<128x256xf32>
    %c0_10 = arith.constant 0 : index
    %c0_11 = arith.constant 0 : index
    %10 = vector.load %arg6[%c0_10, %c0_11] : memref<128x1xf32, #tpu.memory_space<vmem>>, vector<128x1xf32>
    %11 = vector.broadcast %10 : vector<128x1xf32> to vector<128x256xf32>
    %12 = arith.addf %9, %11 : vector<128x256xf32>
    %c0_12 = arith.constant 0 : index
    %c0_13 = arith.constant 0 : index
    %c0_14 = arith.constant 0 : index
    %13 = vector.load %arg7[%c0_12, %c0_13, %c0_14] : memref<1x128x256xf32, #tpu.memory_space<vmem>>, vector<1x128x256xf32>
    %14 = vector.shape_cast %13 : vector<1x128x256xf32> to vector<128x256xf32>
    %15 = vector.shape_cast %12 : vector<128x256xf32> to vector<1x128x256xf32>
    tpu.vector_store %arg7[%c0_12, %c0_13, %c0_14], %15 {strides = array<i32>} : memref<1x128x256xf32, #tpu.memory_space<vmem>>, vector<1x128x256xf32>,
    return
  }
  func.func @transform_0(%arg0: i32, %arg1: i32) -> (i32, i32, i32) {
    %c0_i32 = arith.constant 0 : i32
    %c0_i32_0 = arith.constant 0 : i32
    return %arg0, %c0_i32, %arg1 : i32, i32, i32
  }
  func.func @transform_1(%arg0: i32, %arg1: i32) -> (i32, i32, i32) {
    %c0_i32 = arith.constant 0 : i32
    %c0_i32_0 = arith.constant 0 : i32
    return %arg0, %c0_i32, %arg1 : i32, i32, i32
  }
  func.func @transform_2(%arg0: i32, %arg1: i32) -> (i32, i32) {
    %c0_i32 = arith.constant 0 : i32
    %c0_i32_0 = arith.constant 0 : i32
    %c0_i32_1 = arith.constant 0 : i32
    return %c0_i32, %c0_i32_0 : i32, i32
  }
  func.func @transform_3(%arg0: i32, %arg1: i32) -> (i32, i32) {
    %c0_i32 = arith.constant 0 : i32
    %c0_i32_0 = arith.constant 0 : i32
    %c0_i32_1 = arith.constant 0 : i32
    return %c0_i32, %c0_i32_0 : i32, i32
  }
  func.func @transform_4(%arg0: i32, %arg1: i32) -> (i32, i32) {
    %c0_i32 = arith.constant 0 : i32
    %c0_i32_0 = arith.constant 0 : i32
    %c0_i32_1 = arith.constant 0 : i32
    return %c0_i32, %c0_i32_0 : i32, i32
  }
  func.func @transform_5(%arg0: i32, %arg1: i32) -> (i32, i32, i32) {
    %c0_i32 = arith.constant 0 : i32
    %c0_i32_0 = arith.constant 0 : i32
    return %arg0, %c0_i32, %arg1 : i32, i32, i32
  }
}

module attributes {stable_mosaic.version = 11 : i64} {
  func.func @_kv_conv_kernel(%arg0: i32, %arg1: i32, %arg2: memref<1x128x256xf32, #tpu.memory_space<vmem>>, %arg3: memref<256x128xbf16, #tpu.memory_space<vmem>>, %arg4: memref<256x1xf32, #tpu.memory_space<vmem>>, %arg5: memref<1x128x256xbf16, #tpu.memory_space<vmem>>, %arg6: memref<1x128x256xbf16, #tpu.memory_space<vmem>>) attributes {dimension_semantics = [#tpu.dimension_semantics<parallel>, #tpu.dimension_semantics<parallel>], iteration_bounds = array<i64: 2, 1>, scalar_prefetch = 0 : i64, scratch_operands = 0 : i64, tpu.core_type = #tpu.core_type<tc>, window_params = [{transform_indices = @transform_0, window_bounds = array<i64: 1, 128, 256>}, {pipeline_mode = #tpu.pipeline_mode<synchronous>, transform_indices = @transform_1, window_bounds = array<i64: 256, 128>}, {pipeline_mode = #tpu.pipeline_mode<synchronous>, transform_indices = @transform_2, window_bounds = array<i64: 256, 1>}, {transform_indices = @transform_3, window_bounds = array<i64: 1, 128, 256>}, {transform_indices = @transform_4, window_bounds = array<i64: 1, 128, 256>}]} {
    %c0 = arith.constant 0 : index
    %c0_0 = arith.constant 0 : index
    %c0_1 = arith.constant 0 : index
    %0 = vector.load %arg2[%c0, %c0_0, %c0_1] : memref<1x128x256xf32, #tpu.memory_space<vmem>>, vector<1x128x256xf32>
    %1 = vector.shape_cast %0 : vector<1x128x256xf32> to vector<128x256xf32>
    %2 = arith.truncf %1 : vector<128x256xf32> to vector<128x256xbf16>
    %c0_2 = arith.constant 0 : index
    %c0_3 = arith.constant 0 : index
    %3 = vector.load %arg3[%c0_2, %c0_3] : memref<256x128xbf16, #tpu.memory_space<vmem>>, vector<256x128xbf16>
    %cst = arith.constant dense<0.000000e+00> : vector<256x256xf32>
    %4 = tpu.matmul %3, %2, %cst {dimension_numbers = #tpu.dot_dimension_numbers<[1], [0], [0], [1], [0, 0, 1, 1], [], []>} : vector<256x128xbf16>, vector<128x256xbf16>, vector<256x256xf32> -> vector<256x256xf32>
    %c0_4 = arith.constant 0 : index
    %c0_5 = arith.constant 0 : index
    %5 = vector.load %arg4[%c0_4, %c0_5] : memref<256x1xf32, #tpu.memory_space<vmem>>, vector<256x1xf32>
    %6 = vector.broadcast %5 : vector<256x1xf32> to vector<256x256xf32>
    %7 = arith.addf %4, %6 : vector<256x256xf32>
    %8 = vector.extract_strided_slice %7 {offsets = [0, 0], sizes = [128, 256], strides = [1, 1]} : vector<256x256xf32> to vector<128x256xf32>
    %9 = arith.truncf %8 : vector<128x256xf32> to vector<128x256xbf16>
    %c0_6 = arith.constant 0 : index
    %c0_7 = arith.constant 0 : index
    %c0_8 = arith.constant 0 : index
    %10 = vector.load %arg5[%c0_6, %c0_7, %c0_8] : memref<1x128x256xbf16, #tpu.memory_space<vmem>>, vector<1x128x256xbf16>
    %11 = vector.shape_cast %10 : vector<1x128x256xbf16> to vector<128x256xbf16>
    %12 = vector.shape_cast %9 : vector<128x256xbf16> to vector<1x128x256xbf16>
    tpu.vector_store %arg5[%c0_6, %c0_7, %c0_8], %12 {strides = array<i32>} : memref<1x128x256xbf16, #tpu.memory_space<vmem>>, vector<1x128x256xbf16>,
    %13 = vector.extract_strided_slice %7 {offsets = [128, 0], sizes = [128, 256], strides = [1, 1]} : vector<256x256xf32> to vector<128x256xf32>
    %14 = arith.truncf %13 : vector<128x256xf32> to vector<128x256xbf16>
    %c0_9 = arith.constant 0 : index
    %c0_10 = arith.constant 0 : index
    %c0_11 = arith.constant 0 : index
    %15 = vector.load %arg6[%c0_9, %c0_10, %c0_11] : memref<1x128x256xbf16, #tpu.memory_space<vmem>>, vector<1x128x256xbf16>
    %16 = vector.shape_cast %15 : vector<1x128x256xbf16> to vector<128x256xbf16>
    %17 = vector.shape_cast %14 : vector<128x256xbf16> to vector<1x128x256xbf16>
    tpu.vector_store %arg6[%c0_9, %c0_10, %c0_11], %17 {strides = array<i32>} : memref<1x128x256xbf16, #tpu.memory_space<vmem>>, vector<1x128x256xbf16>,
    return
  }
  func.func @transform_0(%arg0: i32, %arg1: i32) -> (i32, i32, i32) {
    %c0_i32 = arith.constant 0 : i32
    %c0_i32_0 = arith.constant 0 : i32
    return %arg0, %c0_i32, %arg1 : i32, i32, i32
  }
  func.func @transform_1(%arg0: i32, %arg1: i32) -> (i32, i32) {
    %c0_i32 = arith.constant 0 : i32
    %c0_i32_0 = arith.constant 0 : i32
    %c0_i32_1 = arith.constant 0 : i32
    return %c0_i32, %c0_i32_0 : i32, i32
  }
  func.func @transform_2(%arg0: i32, %arg1: i32) -> (i32, i32) {
    %c0_i32 = arith.constant 0 : i32
    %c0_i32_0 = arith.constant 0 : i32
    %c0_i32_1 = arith.constant 0 : i32
    return %c0_i32, %c0_i32_0 : i32, i32
  }
  func.func @transform_3(%arg0: i32, %arg1: i32) -> (i32, i32, i32) {
    %c0_i32 = arith.constant 0 : i32
    %c0_i32_0 = arith.constant 0 : i32
    return %arg0, %c0_i32, %arg1 : i32, i32, i32
  }
  func.func @transform_4(%arg0: i32, %arg1: i32) -> (i32, i32, i32) {
    %c0_i32 = arith.constant 0 : i32
    %c0_i32_0 = arith.constant 0 : i32
    return %arg0, %c0_i32, %arg1 : i32, i32, i32
  }
}

</mosaic_0001>

<bundles_post_ra>
// kernel: _lambda_.4
= control target key start
LH: loop header
LB: loop body
LE: loop exit
PB: predicated region body
PF: predicated region fallthrough
CT: control target
= control target key end

     0   :  { %s1944_s12 = smov 0   ;;  %s1946_s13 = smov 0   ;;  %s2757_s0 = inlined_call_operand.vmem [shape: bf16[2,128,256], index: 0, kind: input, shape index: {}, may-alias: {0,1}]   ;;  %s2758_s1 = inlined_call_operand.vmem [shape: bf16[2,128,256], index: 1, kind: input, shape index: {}, may-alias: {0,1}]   ;;  %s2759_s2 = inlined_call_operand.vmem [shape: bf16[2,128,256], index: 2, kind: input, shape index: {}]   ;;  %s2760_s3 = inlined_call_operand.vmem [shape: bf16[2,128,256], index: 3, kind: output, shape index: {}]  }
   0x1   :  { %s1948_s14 = smov 0  }
   0x2 LB: > { %s25_s15 = sadd.s32 1, %s1918_s13  ;;  %p1489_p0 = scmp.ge.s32.totalorder %s1922_s14, 1  ;;  %s1922_s14 = sphi %s1948_s14, %s13_s14   ;;  %s1918_s13 = sphi %s1946_s13, %s2826_s13   ;;  %s1914_s12 = sphi %s1944_s12, %s2825_s12  }
   0x3   : > { %p27_p1 = scmp.ge.s32.totalorder %s25_s15, 2  ;;  %p178_p2 = scmp.lt.s32.totalorder %s1922_s14, 3 }
   0x5   : > { %s2828_s15 = smov (%p27_p1, %s25_s15), 0  ;;  %p179_p3 = pnand %p1489_p0, %p178_p2 }
   0x7   : > { %182 = sbr.rel (%p179_p3) target bundleno = 1044 (0x414), region = 32 }
   0xc   : > { %p221_p4 = scmp.lt.s32.totalorder %s1914_s12, 1 }
   0xe   : > { %s2830_s12 = smov (!%p221_p4, %s1914_s12), 1 }
   0xf   : > { %s1962_s16 = sshll.u32 %s2830_s12, 7 }
  0x10   : > { %s1968_s19 = scalar_lea.vmem %s2758_s1, %s1962_s16  ;;  %s1998_s22 = scalar_lea.vmem %s2757_s0, %s1962_s16 }
  0x11   : > { %v1712_v0 = vld [vmem:[%s1968_s19 + $0x4] sm:$0xf]  ;;  %v1500_v1 = vld [vmem:[%s1968_s19] sm:$0xf]  ;;  %v1502_v2 = vld [vmem:[%s1968_s19 + $0x8] sm:$0xf0]  ;;  %s2527_s25 = scalar_lea.vmem %s2759_s2, %s1962_s16  ;;  %s2685_s28 = scalar_lea.vmem %s2760_s3, %s1962_s16 }
  0x12   : > { %v1713_v3 = vld [vmem:[%s1968_s19 + $0x4] sm:$0xf0]  ;;  %v1505_v4 = vor.u32 %v1712_v0, %v1502_v2  ;;  %v1714_v6 = vld [vmem:[%s1968_s19 + $0x14] sm:$0xf]  ;;  %v1508_v7 = vld [vmem:[%s1968_s19 + $0x10] sm:$0xf] }
  0x13   : > { %v1501_v5 = vor.u32 %v1713_v3, %v1500_v1  ;;  %v1510_v8 = vld [vmem:[%s1968_s19 + $0x18] sm:$0xf0]  ;;  %v1715_v9 = vld [vmem:[%s1968_s19 + $0x14] sm:$0xf0]  ;;  %v1716_v12 = vld [vmem:[%s1968_s19 + $0x24] sm:$0xf] }
  0x14   : > { %v1509_v10 = vor.u32 %v1715_v9, %v1508_v7  ;;  %v1513_v11 = vor.u32 %v1714_v6, %v1510_v8  ;;  %v1516_v13 = vld [vmem:[%s1968_s19 + $0x20] sm:$0xf]  ;;  %v1518_v14 = vld [vmem:[%s1968_s19 + $0x28] sm:$0xf0]  ;;  %v1717_v15 = vld [vmem:[%s1968_s19 + $0x24] sm:$0xf0] }
  0x15   : > { %378 = vxpose.binary.xlu0.c.b16.start [1/16] %v1505_v4, %v1501_v5, 128  ;;  %v1517_v16 = vor.u32 %v1717_v15, %v1516_v13  ;;  %v1521_v17 = vor.u32 %v1716_v12, %v1518_v14  ;;  %v1718_v18 = vld [vmem:[%s1968_s19 + $0x34] sm:$0xf]  ;;  %v1524_v19 = vld [vmem:[%s1968_s19 + $0x30] sm:$0xf]  ;;  %v1526_v20 = vld [vmem:[%s1968_s19 + $0x38] sm:$0xf0] }
  0x16   : > { %v1719_v21 = vld [vmem:[%s1968_s19 + $0x34] sm:$0xf0]  ;;  %v1529_v23 = vor.u32 %v1718_v18, %v1526_v20  ;;  %v1720_v24 = vld [vmem:[%s1968_s19 + $0x44] sm:$0xf]  ;;  %v1532_v25 = vld [vmem:[%s1968_s19 + $0x40] sm:$0xf] }
  0x17   : > { %v1525_v22 = vor.u32 %v1719_v21, %v1524_v19  ;;  %v1534_v26 = vld [vmem:[%s1968_s19 + $0x48] sm:$0xf0]  ;;  %v1721_v27 = vld [vmem:[%s1968_s19 + $0x44] sm:$0xf0]  ;;  %v1722_v30 = vld [vmem:[%s1968_s19 + $0x54] sm:$0xf] }
  0x18   : > { %v1533_v28 = vor.u32 %v1721_v27, %v1532_v25  ;;  %v1537_v29 = vor.u32 %v1720_v24, %v1534_v26  ;;  %v1540_v31 = vld [vmem:[%s1968_s19 + $0x50] sm:$0xf]  ;;  %v1542_v32 = vld [vmem:[%s1968_s19 + $0x58] sm:$0xf0]  ;;  %v1723_v33 = vld [vmem:[%s1968_s19 + $0x54] sm:$0xf0] }
  0x19   : > { %v1541_v34 = vor.u32 %v1723_v33, %v1540_v31  ;;  %v1545_v35 = vor.u32 %v1722_v30, %v1542_v32  ;;  %v1620_v36 = vld [vmem:[%s1998_s22 + $0x70] sm:$0xf]  ;;  %v1711_v37 = vld [vmem:[%s1998_s22 + $0x74] sm:$0xf0]  ;;  %v1710_v38 = vld [vmem:[%s1998_s22 + $0x74] sm:$0xf] }
  0x1a   : > { %v1621_v39 = vor.u32 %v1711_v37, %v1620_v36  ;;  %v1622_v40 = vld [vmem:[%s1998_s22 + $0x78] sm:$0xf0]  ;;  %v1612_v41 = vld [vmem:[%s1998_s22 + $0x60] sm:$0xf]  ;;  %v1709_v42 = vld [vmem:[%s1998_s22 + $0x64] sm:$0xf0] }
  0x1b   : > { %v1625_v43 = vor.u32 %v1710_v38, %v1622_v40  ;;  %v1708_v44 = vld [vmem:[%s1998_s22 + $0x64] sm:$0xf]  ;;  %v1614_v45 = vld [vmem:[%s1998_s22 + $0x68] sm:$0xf0]  ;;  %v1613_v46 = vor.u32 %v1709_v42, %v1612_v41  ;;  %v1604_v48 = vld [vmem:[%s1998_s22 + $0x50] sm:$0xf] }
  0x1c   : > { %482 = vmatpush.bf16.msra.mxu0 %v1621_v39  ;;  %v1617_v47 = vor.u32 %v1708_v44, %v1614_v45  ;;  %v1707_v49 = vld [vmem:[%s1998_s22 + $0x54] sm:$0xf0]  ;;  %v1706_v50 = vld [vmem:[%s1998_s22 + $0x54] sm:$0xf]  ;;  %v1606_v51 = vld [vmem:[%s1998_s22 + $0x58] sm:$0xf0] }
  0x1d   : > { %571 = vmatpush.bf16.msra.mxu1 %v1625_v43  ;;  %v1605_v52 = vor.u32 %v1707_v49, %v1604_v48  ;;  %v1724_v53 = vld [vmem:[%s1968_s19 + $0x64] sm:$0xf]  ;;  %v1609_v54 = vor.u32 %v1706_v50, %v1606_v51  ;;  %v1596_v55 = vld [vmem:[%s1998_s22 + $0x40] sm:$0xf]  ;;  %v1705_v56 = vld [vmem:[%s1998_s22 + $0x44] sm:$0xf0] }
  0x1e   : > { %v1548_v57 = vld [vmem:[%s1968_s19 + $0x60] sm:$0xf]  ;;  %v1550_v58 = vld [vmem:[%s1968_s19 + $0x68] sm:$0xf0]  ;;  %v1725_v59 = vld [vmem:[%s1968_s19 + $0x64] sm:$0xf0]  ;;  %v1597_v62 = vor.u32 %v1705_v56, %v1596_v55 }
  0x1f   : > { %v1704_v60 = vld [vmem:[%s1998_s22 + $0x44] sm:$0xf]  ;;  %v1598_v61 = vld [vmem:[%s1998_s22 + $0x48] sm:$0xf0]  ;;  %v1549_v63 = vor.u32 %v1725_v59, %v1548_v57  ;;  %v1553_v0 = vor.u32 %v1724_v53, %v1550_v58  ;;  %v1588_v1 = vld [vmem:[%s1998_s22 + $0x30] sm:$0xf] }
  0x20   : > { %483 = vmatpush.bf16.msra.mxu0 %v1613_v46  ;;  %v1703_v2 = vld [vmem:[%s1998_s22 + $0x34] sm:$0xf0]  ;;  %v1601_v3 = vor.u32 %v1704_v60, %v1598_v61  ;;  %v1702_v4 = vld [vmem:[%s1998_s22 + $0x34] sm:$0xf]  ;;  %v1590_v5 = vld [vmem:[%s1998_s22 + $0x38] sm:$0xf0] }
  0x21   : > { %572 = vmatpush.bf16.msra.mxu1 %v1617_v47  ;;  %v1589_v6 = vor.u32 %v1703_v2, %v1588_v1  ;;  %v1580_v7 = vld [vmem:[%s1998_s22 + $0x20] sm:$0xf]  ;;  %v1701_v8 = vld [vmem:[%s1998_s22 + $0x24] sm:$0xf0]  ;;  %v1593_v9 = vor.u32 %v1702_v4, %v1590_v5  ;;  %v1572_v13 = vld [vmem:[%s1998_s22 + $0x10] sm:$0xf] }
  0x22   : > { %v1581_v12 = vor.u32 %v1701_v8, %v1580_v7  ;;  %v1699_v14 = vld [vmem:[%s1998_s22 + $0x14] sm:$0xf0]  ;;  %v1726_v19 = vld [vmem:[%s1968_s19 + $0x74] sm:$0xf]  ;;  %v1564_v20 = vld [vmem:[%s1998_s22] sm:$0xf] }
  0x23   : > { %v1573_v18 = vor.u32 %v1699_v14, %v1572_v13  ;;  %v1697_v21 = vld [vmem:[%s1998_s22 + $0x4] sm:$0xf0]  ;;  %v1727_v24 = vld [vmem:[%s1968_s19 + $0x74] sm:$0xf0]  ;;  %v1696_v26 = vld [vmem:[%s1998_s22 + $0x4] sm:$0xf] }
  0x24   : > { %484 = vmatpush.bf16.msra.mxu0 %v1605_v52  ;;  %v1566_v27 = vld [vmem:[%s1998_s22 + $0x8] sm:$0xf0] }
  0x25   : > { %379 = vxpose.binary.xlu0.c.b16.cont [2/16] %v1513_v11, %v1509_v10, 128  ;;  %v1700_v10 = vld [vmem:[%s1998_s22 + $0x24] sm:$0xf]  ;;  %v1582_v11 = vld [vmem:[%s1998_s22 + $0x28] sm:$0xf0]  ;;  %v1569_v31 = vor.u32 %v1696_v26, %v1566_v27 }
  0x26   : > { %573 = vmatpush.bf16.msra.mxu1 %v1609_v54  ;;  %v1585_v15 = vor.u32 %v1700_v10, %v1582_v11 }
  0x28   : > { %485 = vmatpush.bf16.msra.mxu0 %v1597_v62 }
  0x2a   : > { %574 = vmatpush.bf16.msra.mxu1 %v1601_v3 }
  0x2c   : > { %486 = vmatpush.bf16.msra.mxu0 %v1589_v6 }
  0x2e   : > { %575 = vmatpush.bf16.msra.mxu1 %v1593_v9 }
  0x30   : > { %487 = vmatpush.bf16.msra.mxu0 %v1581_v12 }
  0x32   : > { %576 = vmatpush.bf16.msra.mxu1 %v1585_v15 }
  0x34   : > { %488 = vmatpush.bf16.msra.mxu0 %v1573_v18 }
  0x35   : > { %380 = vxpose.binary.xlu0.c.b16.cont [3/16] %v1521_v17, %v1517_v16, 128  ;;  %v1698_v16 = vld [vmem:[%s1998_s22 + $0x14] sm:$0xf]  ;;  %v1574_v17 = vld [vmem:[%s1998_s22 + $0x18] sm:$0xf0] }
  0x36   : > { %v1577_v25 = vor.u32 %v1698_v16, %v1574_v17 }
  0x38   : > { %577 = vmatpush.bf16.msra.mxu1 %v1577_v25 }
  0x3c   : > { %578 = vmatpush.bf16.msra.mxu1 %v1569_v31 }
  0x45   : > { %381 = vxpose.binary.xlu0.c.b16.cont [4/16] %v1529_v23, %v1525_v22, 128  ;;  %v1556_v22 = vld [vmem:[%s1968_s19 + $0x70] sm:$0xf]  ;;  %v1558_v23 = vld [vmem:[%s1968_s19 + $0x78] sm:$0xf0] }
  0x46   : > { %v1561_v30 = vor.u32 %v1726_v19, %v1558_v23 }
  0x55   : > { %382 = vxpose.binary.xlu0.c.b16.cont [5/16] %v1537_v29, %v1533_v28, 128  ;;  %v1565_v28 = vor.u32 %v1697_v21, %v1564_v20  ;;  %v1557_v29 = vor.u32 %v1727_v24, %v1556_v22 }
  0x57   : > { %489 = vmatpush.bf16.msra.mxu0 %v1565_v28 }
  0x65   : > { %383 = vxpose.binary.xlu0.c.b16.cont [6/16] %v1545_v35, %v1541_v34, 128 }
  0x75   : > { %384 = vxpose.binary.xlu0.c.b16.cont [7/16] %v1553_v0, %v1549_v63, 128 }
  0x85   : > { %385 = vxpose.binary.xlu0.c.b16.end [8/16] %v1561_v30, %v1557_v29, 128 }
  0xc1   : > { %v386_v32 = vpop.trf.xlu0 }
  0xc2   : > { %490 = vmatmul.bf16.vlgmr.msra.gmra.mxu0 %v386_v32  ;;  %579 = vmatmul.bf16.vlgmr.msra.gmra.mxu1 %v386_v32 }
  0xc9   : > { %v387_v33 = vpop.trf.xlu0 }
  0xd1   : > { %v388_v34 = vpop.trf.xlu0 }
  0xd2   : > { %495 = vmatmul.bf16.gmra.mxu0 %v388_v34  ;;  %584 = vmatmul.bf16.gmra.mxu1 %v388_v34 }
  0xd9   : > { %v389_v35 = vpop.trf.xlu0 }
  0xe1   : > { %v390_v36 = vpop.trf.xlu0 }
  0xe2   : > { %500 = vmatmul.bf16.gmra.mxu0 %v390_v36  ;;  %589 = vmatmul.bf16.gmra.mxu1 %v390_v36 }
  0xe9   : > { %v391_v37 = vpop.trf.xlu0 }
  0xf1   : > { %v392_v38 = vpop.trf.xlu0 }
  0xf2   : > { %505 = vmatmul.bf16.gmra.mxu0 %v392_v38  ;;  %594 = vmatmul.bf16.gmra.mxu1 %v392_v38 }
  0xf9   : > { %v393_v39 = vpop.trf.xlu0 }
 0x101   : > { %v394_v40 = vpop.trf.xlu0 }
 0x102   : > { %510 = vmatmul.bf16.gmra.mxu0 %v394_v40  ;;  %599 = vmatmul.bf16.gmra.mxu1 %v394_v40 }
 0x109   : > { %v395_v41 = vpop.trf.xlu0 }
 0x111   : > { %v396_v42 = vpop.trf.xlu0 }
 0x112   : > { %515 = vmatmul.bf16.gmra.mxu0 %v396_v42  ;;  %604 = vmatmul.bf16.gmra.mxu1 %v396_v42 }
 0x119   : > { %v397_v43 = vpop.trf.xlu0 }
 0x121   : > { %v398_v44 = vpop.trf.xlu0 }
 0x122   : > { %520 = vmatmul.bf16.gmra.mxu0 %v398_v44  ;;  %609 = vmatmul.bf16.gmra.mxu1 %v398_v44 }
 0x129   : > { %v399_v45 = vpop.trf.xlu0 }
 0x131   : > { %v400_v46 = vpop.trf.xlu0 }
 0x132   : > { %525 = vmatmul.bf16.gmra.mxu0 %v400_v46  ;;  %614 = vmatmul.bf16.gmra.mxu1 %v400_v46 }
 0x139   : > { %v401_v11 = vpop.trf.xlu0 }
 0x13f   : > { %v2040_v47 = vpop.f32.mrf.mxu0  ;;  %v2042_v48 = vpop.f32.mrf.mxu1 }
 0x142   : > { %530 = vmatmul.bf16.gmra.mxu0 %v387_v33  ;;  %619 = vmatmul.bf16.gmra.mxu1 %v387_v33 }
 0x147   : > { %v2044_v49 = vpop.f32.mrf.mxu0  ;;  %v2046_v50 = vpop.f32.mrf.mxu1 }
 0x148   : > { %2782 = vst [vmem:[#allocation2_spill] sm:$0xff] %v2046_v50 }
 0x14f   : > { %v2048_v51 = vpop.f32.mrf.mxu0  ;;  %v2050_v52 = vpop.f32.mrf.mxu1 }
 0x150   : > { %2783 = vst [vmem:[#allocation3_spill] sm:$0xff] %v2048_v51 }
 0x151   : > { %2784 = vst [vmem:[#allocation4_spill] sm:$0xff] %v2050_v52 }
 0x152   : > { %535 = vmatmul.bf16.gmra.mxu0 %v389_v35  ;;  %624 = vmatmul.bf16.gmra.mxu1 %v389_v35 }
 0x157   : > { %v2052_v53 = vpop.f32.mrf.mxu0  ;;  %v2054_v54 = vpop.f32.mrf.mxu1 }
 0x158   : > { %2785 = vst [vmem:[#allocation5_spill] sm:$0xff] %v2052_v53  ;;  %v661_v40 = vmax.f32 %v2044_v49, %v2052_v53 }
 0x159   : > { %2786 = vst [vmem:[#allocation6_spill] sm:$0xff] %v2054_v54 }
 0x15f   : > { %v2056_v55 = vpop.f32.mrf.mxu0  ;;  %v2058_v56 = vpop.f32.mrf.mxu1 }
 0x160   : > { %2787 = vst [vmem:[#allocation7_spill] sm:$0xff] %v2056_v55 }
 0x162   : > { %540 = vmatmul.bf16.gmra.mxu0 %v391_v37  ;;  %629 = vmatmul.bf16.gmra.mxu1 %v391_v37 }
 0x167   : > { %v2060_v57 = vpop.f32.mrf.mxu0  ;;  %v2062_v58 = vpop.f32.mrf.mxu1 }
 0x168   : > { %2788 = vst [vmem:[#allocation8_spill] sm:$0xff] %v2060_v57  ;;  %v663_v42 = vmax.f32 %v661_v40, %v2060_v57 }
 0x16f   : > { %v2064_v59 = vpop.f32.mrf.mxu0  ;;  %v2066_v60 = vpop.f32.mrf.mxu1 }
 0x170   : > { %2789 = vst [vmem:[#allocation9_spill] sm:$0xff] %v2064_v59 }
 0x172   : > { %545 = vmatmul.bf16.gmra.mxu0 %v393_v39  ;;  %634 = vmatmul.bf16.gmra.mxu1 %v393_v39  ;;  %v660_v39 = vmax.f32 %v2040_v47, %v2048_v51 }
 0x177   : > { %v2068_v61 = vpop.f32.mrf.mxu0  ;;  %v2070_v62 = vpop.f32.mrf.mxu1 }
 0x178   : > { %2790 = vst [vmem:[#allocation10_spill] sm:$0xff] %v2070_v62  ;;  %v665_v46 = vmax.f32 %v663_v42, %v2068_v61 }
 0x17f   : > { %v2072_v63 = vpop.f32.mrf.mxu0  ;;  %v2074_v0 = vpop.f32.mrf.mxu1 }
 0x182   : > { %550 = vmatmul.bf16.gmra.mxu0 %v395_v41  ;;  %639 = vmatmul.bf16.gmra.mxu1 %v395_v41  ;;  %v662_v41 = vmax.f32 %v660_v39, %v2056_v55 }
 0x187   : > { %v2076_v1 = vpop.f32.mrf.mxu0  ;;  %v2078_v2 = vpop.f32.mrf.mxu1 }
 0x188   : > { %2791 = vst [vmem:[#allocation11_spill] sm:$0xff] %v2078_v2 }
 0x18f   : > { %v2080_v3 = vpop.f32.mrf.mxu0  ;;  %v2082_v4 = vpop.f32.mrf.mxu1 }
 0x192   : > { %555 = vmatmul.bf16.gmra.mxu0 %v397_v43  ;;  %644 = vmatmul.bf16.gmra.mxu1 %v397_v43 }
 0x197   : > { %v2084_v5 = vpop.f32.mrf.mxu0  ;;  %v2086_v6 = vpop.f32.mrf.mxu1 }
 0x198   : > { %2792 = vst [vmem:[#allocation12_spill] sm:$0xff] %v2086_v6 }
 0x19f   : > { %v2088_v7 = vpop.f32.mrf.mxu0  ;;  %v2090_v8 = vpop.f32.mrf.mxu1 }
 0x1a2   : > { %560 = vmatmul.bf16.gmra.mxu0 %v399_v45  ;;  %649 = vmatmul.bf16.gmra.mxu1 %v399_v45  ;;  %v664_v45 = vmax.f32 %v662_v41, %v2064_v59 }
 0x1a7   : > { %v2092_v9 = vpop.f32.mrf.mxu0  ;;  %v2094_v10 = vpop.f32.mrf.mxu1 }
 0x1a8   : > { %2793 = vst [vmem:[#allocation13_spill] sm:$0xff] %v2094_v10 }
 0x1af   : > { %v2096_v12 = vpop.f32.mrf.mxu0  ;;  %v2098_v13 = vpop.f32.mrf.mxu1 }
 0x1b2   : > { %565 = vmatmul.bf16.gmra.mxu0 %v401_v11  ;;  %654 = vmatmul.bf16.gmra.mxu1 %v401_v11  ;;  %v666_v11 = vmax.f32 %v664_v45, %v2072_v63 }
 0x1b4   : > { %v668_v51 = vmax.f32 %v666_v11, %v2080_v3 }
 0x1b6   : > { %v670_v39 = vmax.f32 %v668_v51, %v2088_v7  ;;  %v698_v51 = vmax.f32 %v2046_v50, %v2054_v54 }
 0x1b7   : > { %v2100_v14 = vpop.f32.mrf.mxu0  ;;  %v2102_v15 = vpop.f32.mrf.mxu1 }
 0x1b8   : > { %v672_v55 = vmax.f32 %v670_v39, %v2096_v12 }
 0x1bf   : > { %v2104_v16 = vpop.f32.mrf.mxu0  ;;  %v2106_v17 = vpop.f32.mrf.mxu1 }
 0x1c0   : > { %v674_v42 = vmax.f32 %v672_v55, %v2104_v16  ;;  %v700_v55 = vmax.f32 %v698_v51, %v2062_v58 }
 0x1c7   : > { %v2108_v18 = vpop.f32.mrf.mxu0  ;;  %v2110_v19 = vpop.f32.mrf.mxu1 }
 0x1c8   : > { %2794 = vst [vmem:[#allocation14_spill] sm:$0xff] %v2110_v19 }
 0x1cf   : > { %v2112_v20 = vpop.f32.mrf.mxu0  ;;  %v2114_v21 = vpop.f32.mrf.mxu1 }
 0x1d7   : > { %v2116_v22 = vpop.f32.mrf.mxu0  ;;  %v2118_v23 = vpop.f32.mrf.mxu1 }
 0x1d8   : > { %2795 = vst [vmem:[#allocation15_spill] sm:$0xff] %v2116_v22 }
 0x1df   : > { %v2120_v24 = vpop.f32.mrf.mxu0  ;;  %v2122_v25 = vpop.f32.mrf.mxu1 }
 0x1e7   : > { %v2124_v26 = vpop.f32.mrf.mxu0  ;;  %v2126_v27 = vpop.f32.mrf.mxu1 }
 0x1e8   : > { %2796 = vst [vmem:[#allocation16_spill] sm:$0xff] %v2126_v27 }
 0x1ef   : > { %v2128_v28 = vpop.f32.mrf.mxu0  ;;  %v2130_v29 = vpop.f32.mrf.mxu1 }
 0x1f7   : > { %v2132_v30 = vpop.f32.mrf.mxu0  ;;  %v2134_v31 = vpop.f32.mrf.mxu1 }
 0x1f8   : > { %2797 = vst [vmem:[#allocation17_spill] sm:$0xff] %v2134_v31 }
 0x1ff   : > { %v2136_v32 = vpop.f32.mrf.mxu0  ;;  %v2138_v33 = vpop.f32.mrf.mxu1 }
 0x207   : > { %v2140_v34 = vpop.f32.mrf.mxu0  ;;  %v2142_v35 = vpop.f32.mrf.mxu1 }
 0x208   : > { %2798 = vst [vmem:[#allocation18_spill] sm:$0xff] %v2142_v35 }
 0x20f   : > { %v2144_v36 = vpop.f32.mrf.mxu0  ;;  %v2146_v37 = vpop.f32.mrf.mxu1 }
 0x210   : > { %2799 = vst [vmem:[#allocation19_spill] sm:$0xff] %v2146_v37  ;;  %v667_v37 = vmax.f32 %v665_v46, %v2076_v1  ;;  %v676_v46 = vmax.f32 %v674_v42, %v2112_v20 }
 0x212   : > { %v669_v53 = vmax.f32 %v667_v37, %v2084_v5 }
 0x214   : > { %v671_v40 = vmax.f32 %v669_v53, %v2092_v9  ;;  %v678_v53 = vmax.f32 %v676_v46, %v2120_v24 }
 0x216   : > { %v673_v41 = vmax.f32 %v671_v40, %v2100_v14  ;;  %v697_v40 = vmax.f32 %v2042_v48, %v2050_v52 }
 0x217   : > { %v2148_v38 = vpop.f32.mrf.mxu0  ;;  %v2156_v43 = vpop.f32.mrf.mxu1 }
 0x218   : > { %2800 = vst [vmem:[#allocation20_spill] sm:$0xff] %v2156_v43  ;;  %v675_v45 = vmax.f32 %v673_v41, %v2108_v18  ;;  %v680_v41 = vmax.f32 %v678_v53, %v2128_v28 }
 0x21a   : > { %v677_v37 = vmax.f32 %v675_v45, %v2116_v22  ;;  %v699_v45 = vmax.f32 %v697_v40, %v2058_v56  ;;  %v702_v22 = vmax.f32 %v700_v55, %v2070_v62  ;;  %v682_v54 = vmax.f32 %v680_v41, %v2136_v32 }
 0x21c   : > { %v679_v11 = vmax.f32 %v677_v37, %v2124_v26  ;;  %v701_v50 = vmax.f32 %v699_v45, %v2066_v60  ;;  %v704_v52 = vmax.f32 %v702_v22, %v2078_v2  ;;  %v684_v51 = vmax.f32 %v682_v54, %v2144_v36 }
 0x21e   : > { %v681_v42 = vmax.f32 %v679_v11, %v2132_v30  ;;  %v703_v11 = vmax.f32 %v701_v50, %v2074_v0  ;;  %v706_v40 = vmax.f32 %v704_v52, %v2086_v6 }
 0x21f   : > { %v2158_v44 = vpop.f32.mrf.mxu0  ;;  %v2172_v59 = vpop.f32.mrf.mxu1 }
 0x220   : > { %v683_v46 = vmax.f32 %v681_v42, %v2140_v34  ;;  %v686_v55 = vmax.f32 %v684_v51, %v2158_v44  ;;  %v705_v42 = vmax.f32 %v703_v11, %v2082_v4  ;;  %v708_v45 = vmax.f32 %v706_v40, %v2094_v10 }
 0x222   : > { %v685_v53 = vmax.f32 %v683_v46, %v2148_v38  ;;  %v707_v46 = vmax.f32 %v705_v42, %v2090_v8  ;;  %v710_v50 = vmax.f32 %v708_v45, %v2102_v15 }
 0x224   : > { %v709_v52 = vmax.f32 %v707_v46, %v2098_v13  ;;  %v712_v51 = vmax.f32 %v710_v50, %v2110_v19 }
 0x226   : > { %v711_v11 = vmax.f32 %v709_v52, %v2106_v17  ;;  %v714_v40 = vmax.f32 %v712_v51, %v2118_v23 }
 0x227   : > { %v2168_v57 = vpop.f32.mrf.mxu0  ;;  %v2193_v37 = vpop.f32.mrf.mxu1 }
 0x228   : > { %v687_v41 = vmax.f32 %v685_v53, %v2168_v57 }
 0x22f   : > { %v2182_v39 = vpop.f32.mrf.mxu0  ;;  %v2213_v6 = vpop.f32.mrf.mxu1 }
 0x230   : > { %v688_v22 = vmax.f32 %v686_v55, %v2182_v39  ;;  %v713_v55 = vmax.f32 %v711_v11, %v2114_v21 }
 0x232   : > { %v715_v45 = vmax.f32 %v713_v55, %v2122_v25 }
 0x234   : > { %v717_v46 = vmax.f32 %v715_v45, %v2130_v29 }
 0x236   : > { %v719_v52 = vmax.f32 %v717_v46, %v2138_v33 }
 0x237   : > { %v2203_v62 = vpop.f32.mrf.mxu0 }
 0x238   : > { %v689_v54 = vmax.f32 %v687_v41, %v2203_v62  ;;  %v716_v41 = vmax.f32 %v714_v40, %v2126_v27 }
 0x23a   : > { %v690_v2 = vmax.f32 %v688_v22, %v689_v54  ;;  %v718_v22 = vmax.f32 %v716_v41, %v2134_v31 }
 0x23c   : > { %v691_v53 = vrot.slane %v690_v2, 4  ;;  %v720_v50 = vmax.f32 %v718_v22, %v2142_v35  ;;  %v2802_v22 = vld [vmem:[#allocation3_spill] sm:$0xff] }
 0x23e   : > { %v692_v10 = vmax.f32 %v690_v2, %v691_v53  ;;  %v722_v51 = vmax.f32 %v720_v50, %v2156_v43  ;;  %v2225_v2 = vpop.f32.mrf.mxu1  ;;  %v2801_v53 = vld [vmem:[#allocation19_spill] sm:$0xff]  ;;  %v2806_v43 = vld [vmem:[#allocation9_spill] sm:$0xff] }
 0x23f   : > { %v721_v11 = vmax.f32 %v719_v52, %v2801_v53  ;;  %v2803_v52 = vld [vmem:[#allocation5_spill] sm:$0xff] }
 0x240   : > { %v693_v42 = vrot.slane %v692_v10, 2  ;;  %v724_v40 = vmax.f32 %v722_v51, %v2193_v37 }
 0x241   : > { %v723_v55 = vmax.f32 %v721_v11, %v2172_v59  ;;  %v2804_v11 = vld [vmem:[#allocation7_spill] sm:$0xff] }
 0x242   : > { %v694_v54 = vmax.f32 %v692_v10, %v693_v42  ;;  %v726_v10 = vmax.f32 %v724_v40, %v2225_v2 }
 0x243   : > { %v725_v41 = vmax.f32 %v723_v55, %v2213_v6 }
 0x244   : > { %v695_v19 = vrot.slane %v694_v54, 1 }
 0x245   : > { %v727_v50 = vmax.f32 %v725_v41, %v726_v10 }
 0x246   : > { %v2229_v27 = vmax.f32 %v694_v54, %v695_v19 }
 0x247   : > { %v728_v55 = vrot.slane %v727_v50, 4 }
 0x248   : > { %v734_v42 = vsub.f32 %v2040_v47, %v2229_v27  ;;  %v736_v45 = vsub.f32 %v2044_v49, %v2229_v27  ;;  %v738_v46 = vsub.f32 %v2802_v22, %v2229_v27  ;;  %v740_v19 = vsub.f32 %v2803_v52, %v2229_v27  ;;  %v2805_v47 = vld [vmem:[#allocation8_spill] sm:$0xff] }
 0x249   : > { %v742_v40 = vsub.f32 %v2804_v11, %v2229_v27  ;;  %v744_v35 = vsub.f32 %v2805_v47, %v2229_v27  ;;  %v746_v22 = vsub.f32 %v2806_v43, %v2229_v27  ;;  %v729_v41 = vmax.f32 %v727_v50, %v728_v55 }
 0x24a   : > { %v798_v54 = vmul.f32 1.442695, %v734_v42  ;;  %v802_v51 = vmul.f32 1.442695, %v736_v45  ;;  %v806_v31 = vmul.f32 1.442695, %v738_v46  ;;  %v748_v42 = vsub.f32 %v2068_v61, %v2229_v27 }
 0x24b   : > { %v810_v49 = vmul.f32 1.442695, %v740_v19  ;;  %v814_v10 = vmul.f32 1.442695, %v742_v40  ;;  %v818_v45 = vmul.f32 1.442695, %v744_v35  ;;  %v750_v46 = vsub.f32 %v2072_v63, %v2229_v27 }
 0x24c   : > { %1768 = vpow2.f32 %v798_v54  ;;  %v752_v19 = vsub.f32 %v2076_v1, %v2229_v27  ;;  %v822_v43 = vmul.f32 1.442695, %v746_v22  ;;  %v730_v50 = vrot.slane %v729_v41, 2 }
 0x24d   : > { %1770 = vpow2.f32 %v802_v51  ;;  %v756_v51 = vsub.f32 %v2084_v5, %v2229_v27  ;;  %v826_v63 = vmul.f32 1.442695, %v748_v42  ;;  %v758_v11 = vsub.f32 %v2088_v7, %v2229_v27 }
 0x24e   : > { %1772 = vpow2.f32 %v806_v31  ;;  %v754_v31 = vsub.f32 %v2080_v3, %v2229_v27  ;;  %v830_v1 = vmul.f32 1.442695, %v750_v46  ;;  %v760_v3 = vsub.f32 %v2092_v9, %v2229_v27 }
 0x24f   : > { %1774 = vpow2.f32 %v810_v49  ;;  %v834_v47 = vmul.f32 1.442695, %v752_v19  ;;  %v762_v49 = vsub.f32 %v2096_v12, %v2229_v27  ;;  %v764_v7 = vsub.f32 %v2100_v14, %v2229_v27 }
 0x250   : > { %1776 = vpow2.f32 %v814_v10  ;;  %v838_v22 = vmul.f32 1.442695, %v754_v31  ;;  %v731_v10 = vmax.f32 %v729_v41, %v730_v50  ;;  %v766_v46 = vsub.f32 %v2104_v16, %v2229_v27 }
 0x251   : > { %1778 = vpow2.f32 %v818_v45  ;;  %v842_v45 = vmul.f32 1.442695, %v756_v51  ;;  %v846_v9 = vmul.f32 1.442695, %v758_v11  ;;  %v768_v12 = vsub.f32 %v2108_v18, %v2229_v27  ;;  %v2807_v51 = vld [vmem:[#allocation15_spill] sm:$0xff] }
 0x252   : > { %v2250_v52 = vpop.eup %1768  ;;  %1780 = vpow2.f32 %v822_v43  ;;  %v770_v41 = vsub.f32 %v2112_v20, %v2229_v27  ;;  %v850_v31 = vmul.f32 1.442695, %v760_v3  ;;  %v854_v14 = vmul.f32 1.442695, %v762_v49 }
 0x253   : > { %v2254_v54 = vpop.eup %1770  ;;  %1782 = vpow2.f32 %v826_v63  ;;  %v732_v50 = vrot.slane %v731_v10, 1  ;;  %v772_v63 = vsub.f32 %v2807_v51, %v2229_v27  ;;  %v858_v11 = vmul.f32 1.442695, %v764_v7 }
 0x254   : > { %v926_v61 = vadd.f32 %v2254_v54, %v2250_v52  ;;  %v2262_v35 = vpop.eup %1772  ;;  %1784 = vpow2.f32 %v830_v1  ;;  %v774_v18 = vsub.f32 %v2120_v24, %v2229_v27  ;;  %v862_v1 = vmul.f32 1.442695, %v766_v46 }
 0x255   : > { %v2269_v55 = vpop.eup %1774  ;;  %1786 = vpow2.f32 %v834_v47  ;;  %v776_v3 = vsub.f32 %v2124_v26, %v2229_v27  ;;  %v778_v47 = vsub.f32 %v2128_v28, %v2229_v27  ;;  %v866_v49 = vmul.f32 1.442695, %v768_v12 }
 0x256   : > { %v927_v40 = vadd.f32 %v2262_v35, %v926_v61  ;;  %v2276_v42 = vpop.eup %1776  ;;  %1788 = vpow2.f32 %v838_v22  ;;  %v2306_v7 = vmax.f32 %v731_v10, %v732_v50  ;;  %v790_v46 = vsub.f32 %v2158_v44, %v2229_v27 }
 0x257   : > { %v2283_v43 = vpop.eup %1778  ;;  %1790 = vpow2.f32 %v842_v45  ;;  %v874_v26 = vmul.f32 1.442695, %v772_v63  ;;  %v794_v28 = vsub.f32 %v2182_v39, %v2229_v27  ;;  %v796_v10 = vsub.f32 %v2203_v62, %v2229_v27  ;;  %v2808_v63 = vld [vmem:[#allocation2_spill] sm:$0xff] }
 0x258   : > { %v928_v5 = vadd.f32 %v2269_v55, %v927_v40  ;;  %v2290_v16 = vpop.eup %1780  ;;  %1792 = vpow2.f32 %v846_v9  ;;  %v886_v44 = vmul.f32 1.442695, %v778_v47  ;;  %v735_v39 = vsub.f32 %v2042_v48, %v2306_v7  ;;  %v2809_v47 = vld [vmem:[#allocation4_spill] sm:$0xff] }
 0x259   : > { %v2297_v40 = vpop.eup %1782  ;;  %1794 = vpow2.f32 %v850_v31  ;;  %v882_v31 = vmul.f32 1.442695, %v776_v3  ;;  %v910_v51 = vmul.f32 1.442695, %v790_v46  ;;  %v792_v62 = vsub.f32 %v2168_v57, %v2229_v27 }
 0x25a   : > { %v929_v19 = vadd.f32 %v2276_v42, %v928_v5  ;;  %v2303_v22 = vpop.eup %1784  ;;  %1796 = vpow2.f32 %v854_v14  ;;  %v870_v5 = vmul.f32 1.442695, %v770_v41  ;;  %v922_v48 = vmul.f32 1.442695, %v796_v10 }
 0x25b   : > { %v2308_v45 = vpop.eup %1786  ;;  %1798 = vpow2.f32 %v858_v11  ;;  %v737_v11 = vsub.f32 %v2808_v63, %v2306_v7  ;;  %v800_v57 = vmul.f32 1.442695, %v735_v39  ;;  %v743_v39 = vsub.f32 %v2058_v56, %v2306_v7 }
 0x25c   : > { %v930_v61 = vadd.f32 %v2283_v43, %v929_v19  ;;  %v2312_v9 = vpop.eup %1788  ;;  %1800 = vpow2.f32 %v862_v1  ;;  %v878_v19 = vmul.f32 1.442695, %v774_v18  ;;  %v918_v1 = vmul.f32 1.442695, %v794_v28  ;;  %v2810_v28 = vld [vmem:[#allocation6_spill] sm:$0xff] }
 0x25d   : > { %v2317_v41 = vpop.eup %1790  ;;  %1802 = vpow2.f32 %v866_v49  ;;  %v739_v49 = vsub.f32 %v2809_v47, %v2306_v7  ;;  %v784_v56 = vsub.f32 %v2140_v34, %v2229_v27 }
 0x25e   : > { %v931_v20 = vadd.f32 %v2290_v16, %v930_v61  ;;  %v2321_v14 = vpop.eup %1792  ;;  %1804 = vpow2.f32 %v870_v5 }
 0x25f   : > { %v2326_v50 = vpop.eup %1794  ;;  %1806 = vpow2.f32 %v874_v26 }
 0x260   : > { %v932_v24 = vadd.f32 %v2297_v40, %v931_v20  ;;  %v2330_v18 = vpop.eup %1796  ;;  %1808 = vpow2.f32 %v878_v19  ;;  %v741_v19 = vsub.f32 %v2810_v28, %v2306_v7 }
 0x261   : > { %v2335_v3 = vpop.eup %1798  ;;  %1810 = vpow2.f32 %v882_v31  ;;  %v788_v31 = vsub.f32 %v2148_v38, %v2229_v27 }
 0x262   : > { %v933_v12 = vadd.f32 %v2303_v22, %v932_v24  ;;  %v2339_v5 = vpop.eup %1800  ;;  %v786_v24 = vsub.f32 %v2144_v36, %v2229_v27  ;;  %1812 = vpow2.f32 %v886_v44 }
 0x263   : > { %v2344_v26 = vpop.eup %1802  ;;  %1814 = vpow2.f32 %v910_v51  ;;  %v808_v51 = vmul.f32 1.442695, %v739_v49  ;;  %v906_v49 = vmul.f32 1.442695, %v788_v31  ;;  %v2811_v31 = vld [vmem:[#allocation10_spill] sm:$0xff] }
 0x264   : > { %v934_v61 = vadd.f32 %v2308_v45, %v933_v12  ;;  %v804_v12 = vmul.f32 1.442695, %v737_v11  ;;  %v2348_v10 = vpop.eup %1804  ;;  %1816 = vpow2.f32 %v918_v1  ;;  %v782_v11 = vsub.f32 %v2136_v32, %v2229_v27 }
 0x265   : > { %v2353_v44 = vpop.eup %1806  ;;  %1818 = vpow2.f32 %v922_v48  ;;  %v812_v1 = vmul.f32 1.442695, %v741_v19 }
 0x266   : > { %v935_v20 = vadd.f32 %v2312_v9, %v934_v61  ;;  %v914_v61 = vmul.f32 1.442695, %v792_v62  ;;  %v2357_v63 = vpop.eup %1808  ;;  %1820 = vpow2.f32 %v800_v57  ;;  %v745_v62 = vsub.f32 %v2062_v58, %v2306_v7 }
 0x267   : > { %v2362_v38 = vpop.eup %1810  ;;  %1822 = vpow2.f32 %v804_v12  ;;  %v816_v57 = vmul.f32 1.442695, %v743_v39  ;;  %v780_v58 = vsub.f32 %v2132_v30, %v2229_v27  ;;  %v894_v19 = vmul.f32 1.442695, %v782_v11 }
 0x268   : > { %v936_v46 = vadd.f32 %v2317_v41, %v935_v20  ;;  %v902_v20 = vmul.f32 1.442695, %v786_v24  ;;  %v2366_v48 = vpop.eup %1812  ;;  %1824 = vpow2.f32 %v914_v61  ;;  %v749_v61 = vsub.f32 %v2811_v31, %v2306_v7 }
 0x269   : > { %v2371_v24 = vpop.eup %1814  ;;  %1826 = vpow2.f32 %v808_v51  ;;  %v1014_v27 = vpack.c.bf16 %v2335_v3, %v2330_v18  ;;  %v751_v51 = vsub.f32 %v2074_v0, %v2306_v7  ;;  %v755_v31 = vsub.f32 %v2082_v4, %v2306_v7 }
 0x26a   : > { %v937_v36 = vadd.f32 %v2321_v14, %v936_v46  ;;  %v747_v46 = vsub.f32 %v2066_v60, %v2306_v7  ;;  %v2375_v28 = vpop.eup %1816  ;;  %1828 = vpow2.f32 %v902_v20  ;;  %v898_v60 = vmul.f32 1.442695, %v784_v56 }
 0x26b   : > { %v2380_v12 = vpop.eup %1818  ;;  %1830 = vpow2.f32 %v812_v1  ;;  %v890_v1 = vmul.f32 1.442695, %v780_v58  ;;  %1112 = vmatpush.bf16.msra.mxu2 %v1014_v27  ;;  %v759_v4 = vsub.f32 %v2090_v8, %v2306_v7  ;;  %v840_v8 = vmul.f32 1.442695, %v755_v31 }
 0x26c   : > { %v938_v47 = vadd.f32 %v2326_v50, %v937_v36  ;;  %v820_v36 = vmul.f32 1.442695, %v745_v62  ;;  %1832 = vpow2.f32 %v906_v49  ;;  %v824_v11 = vmul.f32 1.442695, %v747_v46 }
 0x26d   : > { %1834 = vpow2.f32 %v816_v57  ;;  %v1030_v20 = vpack.c.bf16 %v2380_v12, %v2375_v28 }
 0x26e   : > { %v939_v32 = vadd.f32 %v2330_v18, %v938_v47  ;;  %v2384_v47 = vpop.eup %1820  ;;  %1836 = vpow2.f32 %v894_v19  ;;  %v1012_v19 = vpack.c.bf16 %v2326_v50, %v2321_v14  ;;  %v2814_v14 = vld [vmem:[#allocation12_spill] sm:$0xff] }
 0x26f   : > { %v2389_v30 = vpop.eup %1822  ;;  %1838 = vpow2.f32 %v820_v36  ;;  %1161 = vmatpush.bf16.msra.mxu3 %v1030_v20  ;;  %v757_v50 = vsub.f32 %v2814_v14, %v2306_v7 }
 0x270   : > { %v940_v34 = vadd.f32 %v2335_v3, %v939_v32  ;;  %2812 = vst [vmem:[#allocation19_spill] sm:$0xff] %v2389_v30  ;;  %v2395_v62 = vpop.eup %1824  ;;  %v963_v49 = vadd.f32 %v2389_v30, %v2384_v47  ;;  %v2813_v3 = vld [vmem:[#allocation11_spill] sm:$0xff]  ;;  %v828_v32 = vmul.f32 1.442695, %v749_v61  ;;  %1840 = vpow2.f32 %v898_v60  ;;  %1113 = vmatpush.bf16.msra.mxu2 %v1012_v19 }
 0x271   : > { %v2400_v18 = vpop.eup %1826  ;;  %v753_v0 = vsub.f32 %v2813_v3, %v2306_v7  ;;  %1842 = vpow2.f32 %v824_v11  ;;  %v1028_v61 = vpack.c.bf16 %v2395_v62, %v2371_v24  ;;  %v763_v19 = vsub.f32 %v2098_v13, %v2306_v7  ;;  %v2816_v13 = vld [vmem:[#allocation14_spill] sm:$0xff] }
 0x272   : > { %v941_v39 = vadd.f32 %v2339_v5, %v940_v34  ;;  %v2404_v46 = vpop.eup %1828  ;;  %v964_v58 = vadd.f32 %v2400_v18, %v963_v49  ;;  %1844 = vpow2.f32 %v890_v1  ;;  %v2815_v1 = vld [vmem:[#allocation13_spill] sm:$0xff]  ;;  %v769_v31 = vsub.f32 %v2816_v13, %v2306_v7 }
 0x273   : > { %v2410_v34 = vpop.eup %1830  ;;  %1846 = vpow2.f32 %v828_v32  ;;  %1162 = vmatpush.bf16.msra.mxu3 %v1028_v61  ;;  %v761_v49 = vsub.f32 %v2815_v1, %v2306_v7  ;;  %v844_v14 = vmul.f32 1.442695, %v757_v50 }
 0x274   : > { %v942_v56 = vadd.f32 %v2344_v26, %v941_v39  ;;  %v832_v39 = vmul.f32 1.442695, %v751_v51  ;;  %v2416_v36 = vpop.eup %1832  ;;  %v965_v27 = vadd.f32 %v2410_v34, %v964_v58  ;;  %v836_v51 = vmul.f32 1.442695, %v753_v0 }
 0x275   : > { %v2420_v20 = vpop.eup %1834  ;;  %v1026_v0 = vpack.c.bf16 %v2416_v36, %v2404_v46  ;;  %v852_v30 = vmul.f32 1.442695, %v761_v49  ;;  %v1006_v49 = vpack.c.bf16 %v2297_v40, %v2290_v16  ;;  %v793_v16 = vsub.f32 %v2193_v37, %v2306_v7 }
 0x276   : > { %v943_v57 = vadd.f32 %v2348_v10, %v942_v56  ;;  %v1837_v11 = vpop.eup %1836  ;;  %v966_v3 = vadd.f32 %v2420_v20, %v965_v27  ;;  %1848 = vpow2.f32 %v832_v39  ;;  %v767_v27 = vsub.f32 %v2106_v17, %v2306_v7 }
 0x277   : > { %v2432_v58 = vpop.eup %1838  ;;  %v771_v39 = vsub.f32 %v2114_v21, %v2306_v7  ;;  %1850 = vpow2.f32 %v836_v51  ;;  %1163 = vmatpush.bf16.msra.mxu3 %v1026_v0  ;;  %v848_v21 = vmul.f32 1.442695, %v759_v4  ;;  %v2817_v0 = vld [vmem:[#allocation16_spill] sm:$0xff]  ;;  %v868_v40 = vmul.f32 1.442695, %v769_v31 }
 0x278   : > { %v944_v60 = vadd.f32 %v2353_v44, %v943_v57  ;;  %v1010_v57 = vpack.c.bf16 %v2317_v41, %v2312_v9  ;;  %v1841_v32 = vpop.eup %1840  ;;  %v967_v9 = vadd.f32 %v2432_v58, %v966_v3  ;;  %v1008_v3 = vpack.c.bf16 %v2308_v45, %v2303_v22 }
 0x279   : > { %v2444_v41 = vpop.eup %1842  ;;  %1852 = vpow2.f32 %v840_v8  ;;  %v1024_v50 = vpack.c.bf16 %v1841_v32, %v1837_v11  ;;  %v795_v45 = vsub.f32 %v2213_v6, %v2306_v7  ;;  %v856_v8 = vmul.f32 1.442695, %v763_v19 }
 0x27a   : > { %v945_v56 = vadd.f32 %v2357_v63, %v944_v60  ;;  %v765_v60 = vsub.f32 %v2102_v15, %v2306_v7  ;;  %1114 = vmatpush.bf16.msra.mxu2 %v1010_v57  ;;  %v968_v1 = vadd.f32 %v2444_v41, %v967_v9  ;;  %1854 = vpow2.f32 %v844_v14 }
 0x27b   : > { %1164 = vmatpush.bf16.msra.mxu3 %v1024_v50  ;;  %v797_v22 = vsub.f32 %v2225_v2, %v2306_v7  ;;  %1856 = vpow2.f32 %v848_v21  ;;  %v787_v37 = vsub.f32 %v2801_v53, %v2306_v7  ;;  %v1020_v31 = vpack.c.bf16 %v2362_v38, %v2357_v63 }
 0x27c   : > { %v946_v61 = vadd.f32 %v2362_v38, %v945_v56  ;;  %v1845_v56 = vpop.eup %1844  ;;  %1858 = vpow2.f32 %v852_v30  ;;  %v1004_v30 = vpack.c.bf16 %v2283_v43, %v2276_v42  ;;  %v2818_v43 = vld [vmem:[#allocation20_spill] sm:$0xff]  ;;  %v916_v50 = vmul.f32 1.442695, %v793_v16 }
 0x27d   : > { %v2456_v57 = vpop.eup %1846  ;;  %v1022_v6 = vpack.c.bf16 %v1845_v56, %v2366_v48  ;;  %1860 = vpow2.f32 %v856_v8  ;;  %v789_v21 = vsub.f32 %v2818_v43, %v2306_v7 }
 0x27e   : > { %v947_v15 = vadd.f32 %v2366_v48, %v946_v61  ;;  %v777_v61 = vsub.f32 %v2817_v0, %v2306_v7  ;;  %v969_v17 = vadd.f32 %v2456_v57, %v968_v1  ;;  %1115 = vmatpush.bf16.msra.mxu2 %v1008_v3  ;;  %v2463_v9 = vpop.eup %1848  ;;  %v791_v3 = vsub.f32 %v2172_v59, %v2306_v7 }
 0x27f   : > { %v2472_v1 = vpop.eup %1850  ;;  %v920_v59 = vmul.f32 1.442695, %v795_v45  ;;  %1165 = vmatpush.bf16.msra.mxu3 %v1022_v6  ;;  %v908_v6 = vmul.f32 1.442695, %v789_v21 }
 0x280   : > { %v948_v51 = vadd.f32 %v1845_v56, %v947_v15  ;;  %v860_v15 = vmul.f32 1.442695, %v765_v60  ;;  %v970_v13 = vadd.f32 %v2463_v9, %v969_v17  ;;  %v2480_v14 = vpop.eup %1852  ;;  %v924_v56 = vmul.f32 1.442695, %v797_v22  ;;  %v2819_v22 = vld [vmem:[#allocation18_spill] sm:$0xff] }
 0x281   : > { %v912_v17 = vmul.f32 1.442695, %v791_v3  ;;  %v785_v45 = vsub.f32 %v2819_v22, %v2306_v7 }
 0x282   : > { %v949_v4 = vadd.f32 %v1837_v11, %v948_v51  ;;  %v864_v11 = vmul.f32 1.442695, %v767_v27  ;;  %v971_v60 = vadd.f32 %v2472_v1, %v970_v13  ;;  %1116 = vmatpush.bf16.msra.mxu2 %v1006_v49  ;;  %1862 = vpow2.f32 %v860_v15 }
 0x283   : > { %v783_v27 = vsub.f32 %v2138_v33, %v2306_v7  ;;  %v872_v33 = vmul.f32 1.442695, %v771_v39  ;;  %1166 = vmatpush.bf16.msra.mxu3 %v1020_v31  ;;  %v2820_v39 = vsub.f32 %v2118_v23, %v2306_v7  ;;  %v904_v49 = vmul.f32 1.442695, %v787_v37 }
 0x284   : > { %v950_v19 = vadd.f32 %v1841_v32, %v949_v4  ;;  %v972_v48 = vadd.f32 %v2480_v14, %v971_v60  ;;  %v2488_v32 = vpop.eup %1854  ;;  %1864 = vpow2.f32 %v864_v11  ;;  %v1018_v4 = vpack.c.bf16 %v2353_v44, %v2348_v10 }
 0x285   : > { %v2498_v42 = vpop.eup %1856  ;;  %1866 = vpow2.f32 %v868_v40  ;;  %v876_v8 = vmul.f32 1.442695, %v2820_v39  ;;  %v884_v23 = vmul.f32 1.442695, %v777_v61  ;;  %v896_v61 = vmul.f32 1.442695, %v783_v27 }
 0x286   : > { %v951_v2 = vadd.f32 %v2404_v46, %v950_v19  ;;  %v973_v13 = vadd.f32 %v2488_v32, %v972_v48  ;;  %1117 = vmatpush.bf16.msra.mxu2 %v1004_v30  ;;  %v2502_v53 = vpop.eup %1858  ;;  %1868 = vpow2.f32 %v920_v59  ;;  %v1016_v19 = vpack.c.bf16 %v2344_v26, %v2339_v5  ;;  %v1628_v40 = vld [vmem:[%s2527_s25] sm:$0xf]  ;;  %v1729_v59 = vld [vmem:[%s2527_s25 + $0x4] sm:$0xf0]  ;;  %v1630_v26 = vld [vmem:[%s2527_s25 + $0x8] sm:$0xf0] }
 0x287   : > { %v1861_v51 = vpop.eup %1860  ;;  %1870 = vpow2.f32 %v924_v56  ;;  %1167 = vmatpush.bf16.msra.mxu3 %v1018_v4  ;;  %v900_v30 = vmul.f32 1.442695, %v785_v45  ;;  %v2550_v5 = vor.u32 %v1729_v59, %v1628_v40  ;;  %v1009_v4 = vpack.c.bf16 %v2472_v1, %v2463_v9 }
 0x288   : > { %v952_v46 = vadd.f32 %v2416_v36, %v951_v2  ;;  %v974_v38 = vadd.f32 %v2498_v42, %v973_v13  ;;  %v1002_v36 = vpack.c.bf16 %v2269_v55, %v2262_v35  ;;  %1872 = vpow2.f32 %v912_v17  ;;  %v2822_v2 = vld [vmem:[#allocation17_spill] sm:$0xff] }
 0x289   : > { %v2821_v55 = vsub.f32 %v2122_v25, %v2306_v7  ;;  %1874 = vpow2.f32 %v916_v50  ;;  %v781_v48 = vsub.f32 %v2822_v2, %v2306_v7  ;;  %v1013_v13 = vpack.c.bf16 %v2502_v53, %v2498_v42  ;;  %v1644_v2 = vld [vmem:[%s2527_s25 + $0x20] sm:$0xf] }
 0x28a   : > { %v953_v63 = vadd.f32 %v2371_v24, %v952_v46  ;;  %v1863_v24 = vpop.eup %1862  ;;  %v975_v35 = vadd.f32 %v2502_v53, %v974_v38  ;;  %1118 = vmatpush.bf16.msra.mxu2 %v1002_v36  ;;  %1876 = vpow2.f32 %v872_v33  ;;  %v2823_v46 = vsub.f32 %v2130_v29, %v2306_v7 }
 0x28b   : > { %v880_v3 = vmul.f32 1.442695, %v2821_v55  ;;  %v2529_v10 = vpop.eup %1864  ;;  %1878 = vpow2.f32 %v876_v8  ;;  %v1015_v11 = vpack.c.bf16 %v1863_v24, %v1861_v51  ;;  %1168 = vmatpush.bf16.msra.mxu3 %v1016_v19  ;;  %v892_v50 = vmul.f32 1.442695, %v781_v48  ;;  %v1730_v55 = vld [vmem:[%s2527_s25 + $0x14] sm:$0xf] }
 0x28c   : > { %v954_v15 = vadd.f32 %v2395_v62, %v953_v63  ;;  %v976_v25 = vadd.f32 %v1861_v51, %v975_v35  ;;  %v1000_v62 = vpack.c.bf16 %v2254_v54, %v2250_v52  ;;  %v2534_v0 = vpop.eup %1866  ;;  %1880 = vpow2.f32 %v904_v49  ;;  %v1728_v52 = vld [vmem:[%s2527_s25 + $0x4] sm:$0xf]  ;;  %v1636_v49 = vld [vmem:[%s2527_s25 + $0x10] sm:$0xf]  ;;  %v1731_v35 = vld [vmem:[%s2527_s25 + $0x14] sm:$0xf0] }
 0x28d   : > { %v2538_v60 = vpop.eup %1868  ;;  %1882 = vpow2.f32 %v908_v6  ;;  %v2558_v56 = vor.u32 %v1728_v52, %v1630_v26  ;;  %v888_v17 = vmul.f32 1.442695, %v2823_v46  ;;  %v1011_v42 = vpack.c.bf16 %v2488_v32, %v2480_v14  ;;  %v1733_v48 = vld [vmem:[%s2527_s25 + $0x24] sm:$0xf0]  ;;  %v1646_v26 = vld [vmem:[%s2527_s25 + $0x28] sm:$0xf0] }
 0x28e   : > { %v955_v44 = vadd.f32 %v2375_v28, %v954_v15  ;;  %v977_v28 = vadd.f32 %v1863_v24, %v976_v25  ;;  %1119 = vmatpush.bf16.msra.mxu2 %v1000_v62  ;;  %v2546_v54 = vpop.eup %1870  ;;  %1884 = vpow2.f32 %v880_v3  ;;  %v2581_v6 = vor.u32 %v1731_v35, %v1636_v49 }
 0x28f   : > { %v1031_v37 = vpack.c.bf16 %v2546_v54, %v2538_v60  ;;  %1886 = vpow2.f32 %v884_v23  ;;  %1169 = vmatmul.bf16.vlgmr.msra.gmra.mxu3 %v2558_v56  ;;  %v1007_v23 = vpack.c.bf16 %v2456_v57, %v2444_v41 }
 0x290   : > { %v2541_v16 = vadd.f32 %v2380_v12, %v955_v44  ;;  %v2553_v12 = vpop.eup %1872  ;;  %v978_v27 = vadd.f32 %v2529_v10, %v977_v28  ;;  %1888 = vpow2.f32 %v896_v61  ;;  %v1638_v44 = vld [vmem:[%s2527_s25 + $0x18] sm:$0xf0]  ;;  %v1005_v61 = vpack.c.bf16 %v2432_v58, %v2420_v20  ;;  %v2824_v58 = vld [vmem:[#allocation19_spill] sm:$0xff] }
 0x291   : > { %v2560_v31 = vpop.eup %1874  ;;  %1120 = vmatmul.bf16.vlgmr.msra.gmra.mxu2 %v2550_v5  ;;  %1259 = vmatpush.bf16.msrb.mxu3 %v1031_v37  ;;  %1890 = vpow2.f32 %v900_v30  ;;  %v2584_v9 = vor.u32 %v1730_v55, %v1638_v44  ;;  %v1001_v59 = vpack.c.bf16 %v2824_v58, %v2384_v47  ;;  %v1732_v30 = vld [vmem:[%s2527_s25 + $0x24] sm:$0xf]  ;;  %v1645_v47 = vor.u32 %v1733_v48, %v1644_v2  ;;  %v1652_v37 = vld [vmem:[%s2527_s25 + $0x30] sm:$0xf] }
 0x292   : > { %1210 = vmatpush.bf16.msrb.mxu2 %v1015_v11  ;;  %v1877_v43 = vpop.eup %1876  ;;  %v979_v21 = vadd.f32 %v2534_v0, %v978_v27  ;;  %v1029_v29 = vpack.c.bf16 %v2560_v31, %v2553_v12  ;;  %1892 = vpow2.f32 %v888_v17  ;;  %v1003_v11 = vpack.c.bf16 %v2410_v34, %v2400_v18  ;;  %v1660_v17 = vld [vmem:[%s2527_s25 + $0x40] sm:$0xf] }
 0x293   : > { %v1879_v33 = vpop.eup %1878  ;;  %1894 = vpow2.f32 %v892_v50  ;;  %v1017_v34 = vpack.c.bf16 %v2534_v0, %v2529_v10  ;;  %v1649_v27 = vor.u32 %v1732_v30, %v1646_v26  ;;  %v1654_v10 = vld [vmem:[%s2527_s25 + $0x38] sm:$0xf0]  ;;  %v1668_v50 = vld [vmem:[%s2527_s25 + $0x50] sm:$0xf] }
 0x294   : > { %v1881_v63 = vpop.eup %1880  ;;  %v980_v38 = vadd.f32 %v1877_v43, %v979_v21  ;;  %v1019_v20 = vpack.c.bf16 %v1879_v33, %v1877_v43  ;;  %v1662_v43 = vld [vmem:[%s2527_s25 + $0x48] sm:$0xf0] }
 0x295   : > { %v1883_v7 = vpop.eup %1882  ;;  %1260 = vmatpush.bf16.msrb.mxu3 %v1029_v29  ;;  %v1670_v29 = vld [vmem:[%s2527_s25 + $0x58] sm:$0xf0] }
 0x296   : > { %1211 = vmatpush.bf16.msrb.mxu2 %v1013_v13  ;;  %v1885_v53 = vpop.eup %1884  ;;  %v981_v36 = vadd.f32 %v1879_v33, %v980_v38  ;;  %v1027_v39 = vpack.c.bf16 %v1883_v7, %v1881_v63  ;;  %v1736_v13 = vld [vmem:[%s2527_s25 + $0x44] sm:$0xf]  ;;  %v1738_v38 = vld [vmem:[%s2527_s25 + $0x54] sm:$0xf] }
 0x297   : > { %v1887_v51 = vpop.eup %1886  ;;  %v1665_v33 = vor.u32 %v1736_v13, %v1662_v43 }
 0x298   : > { %v1889_v22 = vpop.eup %1888  ;;  %v982_v45 = vadd.f32 %v1885_v53, %v981_v36  ;;  %v1021_v57 = vpack.c.bf16 %v1887_v51, %v1885_v53  ;;  %v1676_v53 = vld [vmem:[%s2527_s25 + $0x60] sm:$0xf]  ;;  %v1741_v36 = vld [vmem:[%s2527_s25 + $0x64] sm:$0xf0] }
 0x299   : > { %v1891_v8 = vpop.eup %1890  ;;  %1261 = vmatpush.bf16.msrb.mxu3 %v1027_v39 }
 0x29a   : > { %1212 = vmatpush.bf16.msrb.mxu2 %v1011_v42  ;;  %v983_v24 = vadd.f32 %v1887_v51, %v982_v45  ;;  %v1893_v14 = vpop.eup %1892  ;;  %v1025_v15 = vpack.c.bf16 %v1891_v8, %v1889_v22  ;;  %v1673_v42 = vor.u32 %v1738_v38, %v1670_v29  ;;  %v1740_v51 = vld [vmem:[%s2527_s25 + $0x64] sm:$0xf]  ;;  %v1677_v45 = vor.u32 %v1741_v36, %v1676_v53 }
 0x29b   : > { %v1895_v3 = vpop.eup %1894 }
 0x29c   : > { %v984_v32 = vadd.f32 %v1893_v14, %v983_v24  ;;  %v1023_v62 = vpack.c.bf16 %v1895_v3, %v1893_v14  ;;  %v1742_v24 = vld [vmem:[%s2527_s25 + $0x74] sm:$0xf]  ;;  %v1686_v14 = vld [vmem:[%s2527_s25 + $0x78] sm:$0xf0] }
 0x29d   : > { %1262 = vmatpush.bf16.msrb.mxu3 %v1025_v15  ;;  %v2628_v15 = vor.u32 %v1742_v24, %v1686_v14 }
 0x29e   : > { %1213 = vmatpush.bf16.msrb.mxu2 %v1009_v4  ;;  %v985_v25 = vadd.f32 %v1895_v3, %v984_v32  ;;  %v1743_v4 = vld [vmem:[%s2527_s25 + $0x74] sm:$0xf0] }
 0x29f   : > { %1174 = vmatmul.bf16.gmra.mxu3 %v2584_v9 }
 0x2a0   : > { %v986_v1 = vadd.f32 %v1889_v22, %v985_v25  ;;  %v1678_v22 = vld [vmem:[%s2527_s25 + $0x68] sm:$0xf0] }
 0x2a1   : > { %1125 = vmatmul.bf16.gmra.mxu2 %v2581_v6  ;;  %1263 = vmatpush.bf16.msrb.mxu3 %v1023_v62  ;;  %v1681_v39 = vor.u32 %v1740_v51, %v1678_v22 }
 0x2a2   : > { %1214 = vmatpush.bf16.msrb.mxu2 %v1007_v23  ;;  %v987_v19 = vadd.f32 %v1891_v8, %v986_v1  ;;  %v1684_v8 = vld [vmem:[%s2527_s25 + $0x70] sm:$0xf] }
 0x2a3   : > { %v2626_v32 = vor.u32 %v1743_v4, %v1684_v8 }
 0x2a4   : > { %v988_v41 = vadd.f32 %v1881_v63, %v987_v19  ;;  %v1739_v63 = vld [vmem:[%s2527_s25 + $0x54] sm:$0xf0] }
 0x2a5   : > { %1264 = vmatpush.bf16.msrb.mxu3 %v1021_v57 }
 0x2a6   : > { %1215 = vmatpush.bf16.msrb.mxu2 %v1005_v61  ;;  %v989_v28 = vadd.f32 %v1883_v7, %v988_v41  ;;  %v1669_v7 = vor.u32 %v1739_v63, %v1668_v50 }
 0x2a8   : > { %v990_v40 = vadd.f32 %v2553_v12, %v989_v28 }
 0x2a9   : > { %1265 = vmatpush.bf16.msrb.mxu3 %v1019_v20 }
 0x2aa   : > { %1216 = vmatpush.bf16.msrb.mxu2 %v1003_v11  ;;  %v991_v52 = vadd.f32 %v2560_v31, %v990_v40  ;;  %v1734_v31 = vld [vmem:[%s2527_s25 + $0x34] sm:$0xf] }
 0x2ab   : > { %v1657_v46 = vor.u32 %v1734_v31, %v1654_v10 }
 0x2ac   : > { %v992_v18 = vadd.f32 %v2538_v60, %v991_v52  ;;  %v1735_v60 = vld [vmem:[%s2527_s25 + $0x34] sm:$0xf0] }
 0x2ad   : > { %1266 = vmatpush.bf16.msrb.mxu3 %v1017_v34  ;;  %v1653_v0 = vor.u32 %v1735_v60, %v1652_v37 }
 0x2ae   : > { %1217 = vmatpush.bf16.msrb.mxu2 %v1001_v59  ;;  %v2604_v12 = vadd.f32 %v2546_v54, %v992_v18  ;;  %v1737_v54 = vld [vmem:[%s2527_s25 + $0x44] sm:$0xf0] }
 0x2af   : > { %1179 = vmatmul.bf16.gmra.mxu3 %v1649_v27  ;;  %v1661_v21 = vor.u32 %v1737_v54, %v1660_v17  ;;  %v957_v54 = vrot.slane %v2541_v16, 4 }
 0x2b0   : > { %v994_v13 = vrot.slane %v2604_v12, 4 }
 0x2b1   : > { %1130 = vmatmul.bf16.gmra.mxu2 %v1645_v47 }
 0x2bf   : > { %1184 = vmatmul.bf16.gmra.mxu3 %v1657_v46 }
 0x2c1   : > { %1135 = vmatmul.bf16.gmra.mxu2 %v1653_v0 }
 0x2cf   : > { %1189 = vmatmul.bf16.gmra.mxu3 %v1665_v33 }
 0x2d1   : > { %1140 = vmatmul.bf16.gmra.mxu2 %v1661_v21 }
 0x2df   : > { %1194 = vmatmul.bf16.gmra.mxu3 %v1673_v42 }
 0x2e1   : > { %1145 = vmatmul.bf16.gmra.mxu2 %v1669_v7 }
 0x2ef   : > { %1199 = vmatmul.bf16.gmra.mxu3 %v1681_v39 }
 0x2f1   : > { %1150 = vmatmul.bf16.gmra.mxu2 %v1677_v45 }
 0x2ff   : > { %1204 = vmatmul.bf16.gmra.mxu3 %v2628_v15 }
 0x301   : > { %1155 = vmatmul.bf16.gmra.mxu2 %v2626_v32 }
 0x30f   : > { %1267 = vmatmul.bf16.vlgmr.msrb.gmra.mxu3 %v2558_v56 }
 0x311   : > { %1218 = vmatmul.bf16.vlgmr.msrb.gmra.mxu2 %v2550_v5 }
 0x312   : > { %v1170_v35 = vpop.f32.mrf.mxu3 }
 0x314   : > { %v1121_v49 = vpop.f32.mrf.mxu2 }
 0x315   : > { %v2634_v55 = vadd.f32 %v1170_v35, %v1121_v49 }
 0x31a   : > { %v1172_v23 = vpop.f32.mrf.mxu3 }
 0x31c   : > { %v1123_v3 = vpop.f32.mrf.mxu2 }
 0x31d   : > { %v2636_v44 = vadd.f32 %v1172_v23, %v1123_v3 }
 0x31f   : > { %1272 = vmatmul.bf16.gmra.mxu3 %v2584_v9 }
 0x321   : > { %1223 = vmatmul.bf16.gmra.mxu2 %v2581_v6 }
 0x322   : > { %v1175_v1 = vpop.f32.mrf.mxu3 }
 0x324   : > { %v1126_v25 = vpop.f32.mrf.mxu2 }
 0x325   : > { %v2640_v62 = vadd.f32 %v1175_v1, %v1126_v25 }
 0x32a   : > { %v1177_v5 = vpop.f32.mrf.mxu3 }
 0x32c   : > { %v1128_v61 = vpop.f32.mrf.mxu2 }
 0x32d   : > { %v2642_v19 = vadd.f32 %v1177_v5, %v1128_v61 }
 0x32f   : > { %1277 = vmatmul.bf16.gmra.mxu3 %v1649_v27 }
 0x331   : > { %1228 = vmatmul.bf16.gmra.mxu2 %v1645_v47 }
 0x332   : > { %v1180_v41 = vpop.f32.mrf.mxu3 }
 0x334   : > { %v1131_v56 = vpop.f32.mrf.mxu2 }
 0x335   : > { %v2644_v57 = vadd.f32 %v1180_v41, %v1131_v56 }
 0x33a   : > { %v1182_v28 = vpop.f32.mrf.mxu3 }
 0x33c   : > { %v1133_v11 = vpop.f32.mrf.mxu2 }
 0x33d   : > { %v2646_v40 = vadd.f32 %v1182_v28, %v1133_v11 }
 0x33f   : > { %1282 = vmatmul.bf16.gmra.mxu3 %v1657_v46 }
 0x341   : > { %1233 = vmatmul.bf16.gmra.mxu2 %v1653_v0 }
 0x342   : > { %v1185_v9 = vpop.f32.mrf.mxu3 }
 0x344   : > { %v1136_v6 = vpop.f32.mrf.mxu2 }
 0x345   : > { %v2648_v20 = vadd.f32 %v1185_v9, %v1136_v6 }
 0x34a   : > { %v1187_v59 = vpop.f32.mrf.mxu3 }
 0x34c   : > { %v1138_v58 = vpop.f32.mrf.mxu2 }
 0x34d   : > { %v2650_v52 = vadd.f32 %v1187_v59, %v1138_v58 }
 0x34f   : > { %1287 = vmatmul.bf16.gmra.mxu3 %v1665_v33  ;;  %v995_v33 = vadd.f32 %v994_v13, %v2604_v12 }
 0x351   : > { %1238 = vmatmul.bf16.gmra.mxu2 %v1661_v21  ;;  %v958_v21 = vadd.f32 %v957_v54, %v2541_v16  ;;  %v996_v29 = vrot.slane %v995_v33, 2 }
 0x352   : > { %v1190_v48 = vpop.f32.mrf.mxu3 }
 0x353   : > { %v959_v38 = vrot.slane %v958_v21, 2  ;;  %v997_v53 = vadd.f32 %v996_v29, %v995_v33 }
 0x354   : > { %v1141_v2 = vpop.f32.mrf.mxu2 }
 0x355   : > { %v2652_v18 = vadd.f32 %v1190_v48, %v1141_v2  ;;  %v998_v16 = vrot.slane %v997_v53, 1 }
 0x35a   : > { %v1192_v30 = vpop.f32.mrf.mxu3 }
 0x35c   : > { %v1143_v34 = vpop.f32.mrf.mxu2 }
 0x35d   : > { %v2654_v26 = vadd.f32 %v1192_v30, %v1143_v34 }
 0x35f   : > { %1292 = vmatmul.bf16.gmra.mxu3 %v1673_v42  ;;  %v960_v42 = vadd.f32 %v959_v38, %v958_v21 }
 0x361   : > { %1243 = vmatmul.bf16.gmra.mxu2 %v1669_v7  ;;  %v961_v22 = vrot.slane %v960_v42, 1 }
 0x362   : > { %v1195_v27 = vpop.f32.mrf.mxu3 }
 0x363   : > { %v962_v12 = vadd.f32 %v961_v22, %v960_v42 }
 0x364   : > { %v1146_v47 = vpop.f32.mrf.mxu2 }
 0x365   : > { %v2656_v37 = vadd.f32 %v1195_v27, %v1146_v47  ;;  %1896 = vrcp.f32 %v962_v12 }
 0x36a   : > { %v1197_v31 = vpop.f32.mrf.mxu3 }
 0x36c   : > { %v1148_v60 = vpop.f32.mrf.mxu2 }
 0x36d   : > { %v2658_v10 = vadd.f32 %v1197_v31, %v1148_v60 }
 0x36f   : > { %1297 = vmatmul.bf16.gmra.mxu3 %v1681_v39  ;;  %v999_v39 = vadd.f32 %v998_v16, %v997_v53 }
 0x371   : > { %1248 = vmatmul.bf16.gmra.mxu2 %v1677_v45  ;;  %1898 = vrcp.f32 %v999_v39 }
 0x372   : > { %v1200_v46 = vpop.f32.mrf.mxu3 }
 0x374   : > { %v1151_v0 = vpop.f32.mrf.mxu2 }
 0x375   : > { %v2660_v17 = vadd.f32 %v1200_v46, %v1151_v0 }
 0x37a   : > { %v1202_v50 = vpop.f32.mrf.mxu3 }
 0x37c   : > { %v1153_v43 = vpop.f32.mrf.mxu2 }
 0x37d   : > { %v2666_v63 = vadd.f32 %v1202_v50, %v1153_v43 }
 0x37f   : > { %1302 = vmatmul.bf16.gmra.mxu3 %v2628_v15 }
 0x381   : > { %1253 = vmatmul.bf16.gmra.mxu2 %v2626_v32  ;;  %v2674_v32 = vpop.eup %1896 }
 0x382   : > { %v1205_v36 = vpop.f32.mrf.mxu3  ;;  %v2676_v49 = vpop.eup %1898  ;;  %v1310_v35 = vmul.f32 %v2674_v32, %v2634_v55  ;;  %v1312_v5 = vmul.f32 %v2674_v32, %v2636_v44  ;;  %v1314_v6 = vmul.f32 %v2674_v32, %v2640_v62  ;;  %v1316_v44 = vmul.f32 %v2674_v32, %v2642_v19 }
 0x383   : > { %v1318_v62 = vmul.f32 %v2674_v32, %v2644_v57  ;;  %v1320_v19 = vmul.f32 %v2674_v32, %v2646_v40  ;;  %v1322_v57 = vmul.f32 %v2674_v32, %v2648_v20  ;;  %v1324_v40 = vmul.f32 %v2674_v32, %v2650_v52 }
 0x384   : > { %v1156_v7 = vpop.f32.mrf.mxu2  ;;  %v1326_v20 = vmul.f32 %v2674_v32, %v2652_v18  ;;  %v1328_v52 = vmul.f32 %v2674_v32, %v2654_v26  ;;  %v1330_v18 = vmul.f32 %v2674_v32, %v2656_v37  ;;  %v1332_v26 = vmul.f32 %v2674_v32, %v2658_v10 }
 0x385   : > { %v2670_v51 = vadd.f32 %v1205_v36, %v1156_v7  ;;  %v1334_v37 = vmul.f32 %v2674_v32, %v2660_v17  ;;  %v1336_v10 = vmul.f32 %v2674_v32, %v2666_v63 }
 0x387   : > { %v1338_v17 = vmul.f32 %v2674_v32, %v2670_v51 }
 0x38a   : > { %v1207_v8 = vpop.f32.mrf.mxu3 }
 0x38c   : > { %v1158_v45 = vpop.f32.mrf.mxu2 }
 0x38d   : > { %v2672_v4 = vadd.f32 %v1207_v8, %v1158_v45 }
 0x38f   : > { %v1340_v63 = vmul.f32 %v2674_v32, %v2672_v4 }
 0x392   : > { %v1268_v14 = vpop.f32.mrf.mxu3 }
 0x394   : > { %v1219_v24 = vpop.f32.mrf.mxu2 }
 0x395   : > { %v1269_v15 = vadd.f32 %v1268_v14, %v1219_v24 }
 0x397   : > { %v1311_v3 = vmul.f32 %v2676_v49, %v1269_v15 }
 0x399   : > { %v1342_v23 = vpack.c.bf16 %v1311_v3, %v1310_v35 }
 0x39a   : > { %v1270_v1 = vpop.f32.mrf.mxu3 }
 0x39b   : > { %1358 = vst [vmem:[%s2685_s28] sm:$0xff] %v1342_v23 }
 0x39c   : > { %v1221_v25 = vpop.f32.mrf.mxu2 }
 0x39d   : > { %v1271_v61 = vadd.f32 %v1270_v1, %v1221_v25 }
 0x39f   : > { %v1313_v55 = vmul.f32 %v2676_v49, %v1271_v61 }
 0x3a1   : > { %v1343_v56 = vpack.c.bf16 %v1313_v55, %v1312_v5 }
 0x3a2   : > { %v1273_v11 = vpop.f32.mrf.mxu3 }
 0x3a3   : > { %1359 = vst [vmem:[%s2685_s28 + $0x8] sm:$0xff] %v1343_v56 }
 0x3a4   : > { %v1224_v41 = vpop.f32.mrf.mxu2 }
 0x3a5   : > { %v1274_v28 = vadd.f32 %v1273_v11, %v1224_v41 }
 0x3a7   : > { %v1315_v9 = vmul.f32 %v2676_v49, %v1274_v28 }
 0x3a9   : > { %v1344_v58 = vpack.c.bf16 %v1315_v9, %v1314_v6 }
 0x3aa   : > { %v1275_v2 = vpop.f32.mrf.mxu3 }
 0x3ab   : > { %1360 = vst [vmem:[%s2685_s28 + $0x10] sm:$0xff] %v1344_v58 }
 0x3ac   : > { %v1226_v59 = vpop.f32.mrf.mxu2 }
 0x3ad   : > { %v1276_v48 = vadd.f32 %v1275_v2, %v1226_v59 }
 0x3af   : > { %v1317_v34 = vmul.f32 %v2676_v49, %v1276_v48 }
 0x3b1   : > { %v1345_v30 = vpack.c.bf16 %v1317_v34, %v1316_v44 }
 0x3b2   : > { %v1278_v27 = vpop.f32.mrf.mxu3 }
 0x3b3   : > { %1361 = vst [vmem:[%s2685_s28 + $0x18] sm:$0xff] %v1345_v30 }
 0x3b4   : > { %v1229_v47 = vpop.f32.mrf.mxu2 }
 0x3b5   : > { %v1279_v60 = vadd.f32 %v1278_v27, %v1229_v47 }
 0x3b7   : > { %v1319_v31 = vmul.f32 %v2676_v49, %v1279_v60 }
 0x3b9   : > { %v1346_v0 = vpack.c.bf16 %v1319_v31, %v1318_v62 }
 0x3ba   : > { %v1280_v54 = vpop.f32.mrf.mxu3 }
 0x3bb   : > { %1362 = vst [vmem:[%s2685_s28 + $0x20] sm:$0xff] %v1346_v0 }
 0x3bc   : > { %v1231_v46 = vpop.f32.mrf.mxu2 }
 0x3bd   : > { %v1281_v13 = vadd.f32 %v1280_v54, %v1231_v46 }
 0x3bf   : > { %v1321_v43 = vmul.f32 %v2676_v49, %v1281_v13 }
 0x3c1   : > { %v1347_v21 = vpack.c.bf16 %v1321_v43, %v1320_v19 }
 0x3c2   : > { %v1283_v50 = vpop.f32.mrf.mxu3 }
 0x3c3   : > { %1363 = vst [vmem:[%s2685_s28 + $0x28] sm:$0xff] %v1347_v21 }
 0x3c4   : > { %v1234_v33 = vpop.f32.mrf.mxu2 }
 0x3c5   : > { %v1284_v38 = vadd.f32 %v1283_v50, %v1234_v33 }
 0x3c7   : > { %v1323_v29 = vmul.f32 %v2676_v49, %v1284_v38 }
 0x3c9   : > { %v1348_v7 = vpack.c.bf16 %v1323_v29, %v1322_v57 }
 0x3ca   : > { %v1285_v53 = vpop.f32.mrf.mxu3 }
 0x3cb   : > { %1364 = vst [vmem:[%s2685_s28 + $0x30] sm:$0xff] %v1348_v7 }
 0x3cc   : > { %v1236_v42 = vpop.f32.mrf.mxu2 }
 0x3cd   : > { %v1286_v36 = vadd.f32 %v1285_v53, %v1236_v42 }
 0x3cf   : > { %v1325_v22 = vmul.f32 %v2676_v49, %v1286_v36 }
 0x3d1   : > { %v1349_v16 = vpack.c.bf16 %v1325_v22, %v1324_v40 }
 0x3d2   : > { %v1288_v12 = vpop.f32.mrf.mxu3 }
 0x3d3   : > { %1365 = vst [vmem:[%s2685_s28 + $0x38] sm:$0xff] %v1349_v16 }
 0x3d4   : > { %v1239_v45 = vpop.f32.mrf.mxu2 }
 0x3d5   : > { %v1289_v39 = vadd.f32 %v1288_v12, %v1239_v45 }
 0x3d7   : > { %v1327_v8 = vmul.f32 %v2676_v49, %v1289_v39 }
 0x3d9   : > { %v1350_v24 = vpack.c.bf16 %v1327_v8, %v1326_v20 }
 0x3da   : > { %v1290_v15 = vpop.f32.mrf.mxu3 }
 0x3db   : > { %1366 = vst [vmem:[%s2685_s28 + $0x40] sm:$0xff] %v1350_v24 }
 0x3dc   : > { %v1241_v14 = vpop.f32.mrf.mxu2 }
 0x3dd   : > { %v1291_v35 = vadd.f32 %v1290_v15, %v1241_v14 }
 0x3df   : > { %v1329_v3 = vmul.f32 %v2676_v49, %v1291_v35 }
 0x3e1   : > { %v1351_v23 = vpack.c.bf16 %v1329_v3, %v1328_v52 }
 0x3e2   : > { %v1293_v1 = vpop.f32.mrf.mxu3 }
 0x3e3   : > { %1367 = vst [vmem:[%s2685_s28 + $0x48] sm:$0xff] %v1351_v23 }
 0x3e4   : > { %v1244_v25 = vpop.f32.mrf.mxu2 }
 0x3e5   : > { %v1294_v61 = vadd.f32 %v1293_v1, %v1244_v25 }
 0x3e7   : > { %v1331_v5 = vmul.f32 %v2676_v49, %v1294_v61 }
 0x3e9   : > { %v1352_v55 = vpack.c.bf16 %v1331_v5, %v1330_v18 }
 0x3ea   : > { %v1295_v41 = vpop.f32.mrf.mxu3 }
 0x3eb   : > { %1368 = vst [vmem:[%s2685_s28 + $0x50] sm:$0xff] %v1352_v55 }
 0x3ec   : > { %v1246_v56 = vpop.f32.mrf.mxu2 }
 0x3ed   : > { %v1296_v11 = vadd.f32 %v1295_v41, %v1246_v56 }
 0x3ef   : > { %v1333_v28 = vmul.f32 %v2676_v49, %v1296_v11 }
 0x3f1   : > { %v1353_v6 = vpack.c.bf16 %v1333_v28, %v1332_v26 }
 0x3f2   : > { %v1298_v58 = vpop.f32.mrf.mxu3 }
 0x3f3   : > { %1369 = vst [vmem:[%s2685_s28 + $0x58] sm:$0xff] %v1353_v6 }
 0x3f4   : > { %v1249_v9 = vpop.f32.mrf.mxu2 }
 0x3f5   : > { %v1299_v59 = vadd.f32 %v1298_v58, %v1249_v9 }
 0x3f7   : > { %v1335_v2 = vmul.f32 %v2676_v49, %v1299_v59 }
 0x3f9   : > { %v1354_v48 = vpack.c.bf16 %v1335_v2, %v1334_v37 }
 0x3fa   : > { %v1300_v34 = vpop.f32.mrf.mxu3 }
 0x3fb   : > { %1370 = vst [vmem:[%s2685_s28 + $0x60] sm:$0xff] %v1354_v48 }
 0x3fc   : > { %v1251_v44 = vpop.f32.mrf.mxu2 }
 0x3fd   : > { %v1301_v30 = vadd.f32 %v1300_v34, %v1251_v44 }
 0x3ff   : > { %v1337_v47 = vmul.f32 %v2676_v49, %v1301_v30 }
 0x401   : > { %v1355_v27 = vpack.c.bf16 %v1337_v47, %v1336_v10 }
 0x402   : > { %v1303_v62 = vpop.f32.mrf.mxu3 }
 0x403   : > { %1371 = vst [vmem:[%s2685_s28 + $0x68] sm:$0xff] %v1355_v27 }
 0x404   : > { %v1254_v60 = vpop.f32.mrf.mxu2 }
 0x405   : > { %v1304_v31 = vadd.f32 %v1303_v62, %v1254_v60 }
 0x407   : > { %v1339_v0 = vmul.f32 %v2676_v49, %v1304_v31 }
 0x409   : > { %v1356_v46 = vpack.c.bf16 %v1339_v0, %v1338_v17 }
 0x40a   : > { %v1305_v13 = vpop.f32.mrf.mxu3 }
 0x40b   : > { %1372 = vst [vmem:[%s2685_s28 + $0x70] sm:$0xff] %v1356_v46 }
 0x40c   : > { %v1256_v54 = vpop.f32.mrf.mxu2 }
 0x40d   : > { %v1306_v19 = vadd.f32 %v1305_v13, %v1256_v54 }
 0x40f   : > { %v1341_v43 = vmul.f32 %v2676_v49, %v1306_v19 }
 0x411   : > { %v1357_v21 = vpack.c.bf16 %v1341_v43, %v1340_v63 }
 0x413   : > { %1373 = vst [vmem:[%s2685_s28 + $0x78] sm:$0xff] %v1357_v21 }
 0x414 PF: > { %s13_s14 = sadd.s32 1, %s1922_s14   ;;  %s2825_s12 = smov %s1918_s13 }
 0x415   : > { %p10_p5 = scmp.ge.s32.totalorder %s13_s14, 4   ;;  %s2826_s13 = smov %s2828_s15 }
 0x417   :  { %12 = sbr.rel (!%p10_p5) target bundleno = 2 (0x2), region = 68 }

// kernel: _lambda_.3
= control target key start
LH: loop header
LB: loop body
LE: loop exit
PB: predicated region body
PF: predicated region fallthrough
CT: control target
= control target key end

     0   :  { %s1198_s15 = smov 0   ;;  %s1200_s16 = smov 0   ;;  %s1508_s0 = inlined_call_operand.vmem [shape: f32[2,128,256], index: 0, kind: input, shape index: {}]   ;;  %s1509_s1 = inlined_call_operand.vmem [shape: bf16[256,128], index: 1, kind: input, shape index: {}]   ;;  %s1510_s2 = inlined_call_operand.vmem [shape: f32[256,1], index: 2, kind: input, shape index: {}]   ;;  %s1511_s3 = inlined_call_operand.vmem [shape: bf16[2,128,256], index: 3, kind: output, shape index: {0}]   ;;  %s1512_s4 = inlined_call_operand.vmem [shape: bf16[2,128,256], index: 4, kind: output, shape index: {1}]  }
   0x1   :  { %s1202_s17 = smov 0  }
   0x2 LB: > { %s27_s18 = sadd.s32 1, %s1166_s16  ;;  %p1012_p0 = scmp.ge.s32.totalorder %s1170_s17, 1  ;;  %s1170_s17 = sphi %s1202_s17, %s15_s17   ;;  %s1166_s16 = sphi %s1200_s16, %s1514_s16   ;;  %s1162_s15 = sphi %s1198_s15, %s1513_s15  }
   0x3   : > { %p29_p1 = scmp.ge.s32.totalorder %s27_s18, 2  ;;  %p188_p2 = scmp.lt.s32.totalorder %s1170_s17, 3 }
   0x5   : > { %s1516_s18 = smov (%p29_p1, %s27_s18), 0  ;;  %p189_p3 = pnand %p1012_p0, %p188_p2 }
   0x6   : > { %p232_p4 = scmp.lt.s32.totalorder (!%p189_p3), %s1162_s15, 1 }
   0x7   : > { %192 = sbr.rel (%p189_p3) target bundleno = 308 (0x134), region = 32 }
   0xc   : > { %v343_v0 = vld [vmem:[%s1510_s2 + $0x10] sm:$0xff]  ;;  %v341_v1 = vld [vmem:[%s1510_s2] sm:$0xff]  ;;  %v1172_v2 = vmov 0   ;;  %s1518_s15 = smov (!%p232_p4, %s1162_s15), 1  ;;  %v344_v6 = vld [vmem:[%s1510_s2 + $0x18] sm:$0xff] }
   0xd   : > { %1146 = vset.pattern.permute.xlu1 %v1172_v2  ;;  %1145 = vset.pattern.permute.xlu0 %v1172_v2  ;;  %s1085_s23 = sshll.u32 %s1518_s15, 8  ;;  %v342_v14 = vld [vmem:[%s1510_s2 + $0x8] sm:$0xff]  ;;  %v348_v27 = vld [vmem:[%s1510_s2 + $0x38] sm:$0xff]  ;;  %v347_v28 = vld [vmem:[%s1510_s2 + $0x30] sm:$0xff]  ;;  %s1086_s5 = sshll.u32 %s1518_s15, 7 }
   0xe   : > { %385 = vperm.xlu1 %1146, %v343_v0   ;;  %375 = vperm.xlu0 %1145, %v341_v1   ;;  %s1228_s26 = scalar_lea.vmem %s1508_s0, %s1085_s23  ;;  %v345_v33 = vld [vmem:[%s1510_s2 + $0x20] sm:$0xff]  ;;  %v351_v42 = vld [vmem:[%s1510_s2 + $0x50] sm:$0xff]  ;;  %v350_v43 = vld [vmem:[%s1510_s2 + $0x48] sm:$0xff]  ;;  %s1430_s8 = scalar_lea.vmem %s1511_s3, %s1086_s5 }
   0xf   : > { %1147 = vset.pattern.permute.xlu2 %v1172_v2  ;;  %v289_v3 = vld [vmem:[%s1228_s26 + $0xe0] sm:$0xff]  ;;  %v291_v4 = vld [vmem:[%s1228_s26 + $0xf0] sm:$0xff]  ;;  %v290_v5 = vld [vmem:[%s1228_s26 + $0xe8] sm:$0xff]  ;;  %s1436_s10 = scalar_lea.vmem %s1512_s4, %s1086_s5 }
  0x10   : > { %v307_v7 = vpack.c.bf16 %v291_v4, %v289_v3  ;;  %v292_v8 = vld [vmem:[%s1228_s26 + $0xf8] sm:$0xff]  ;;  %v285_v9 = vld [vmem:[%s1228_s26 + $0xc0] sm:$0xff]  ;;  %v287_v10 = vld [vmem:[%s1228_s26 + $0xd0] sm:$0xff]  ;;  %395 = vperm.xlu2 %1147, %v345_v33  }
  0x11   : > { %v308_v11 = vpack.c.bf16 %v292_v8, %v290_v5  ;;  %v286_v12 = vld [vmem:[%s1228_s26 + $0xc8] sm:$0xff]  ;;  %v288_v13 = vld [vmem:[%s1228_s26 + $0xd8] sm:$0xff]  ;;  %v305_v15 = vpack.c.bf16 %v287_v10, %v285_v9  ;;  %v281_v17 = vld [vmem:[%s1228_s26 + $0xa0] sm:$0xff] }
  0x12   : > { %629 = vmatpush.bf16.msra.mxu0 %v307_v7  ;;  %1104 = vmatpush.bf16.msra.mxu2 %v307_v7  ;;  %v306_v16 = vpack.c.bf16 %v288_v13, %v286_v12  ;;  %v283_v18 = vld [vmem:[%s1228_s26 + $0xb0] sm:$0xff]  ;;  %v282_v19 = vld [vmem:[%s1228_s26 + $0xa8] sm:$0xff]  ;;  %v284_v20 = vld [vmem:[%s1228_s26 + $0xb8] sm:$0xff] }
  0x13   : > { %718 = vmatpush.bf16.msra.mxu1 %v308_v11  ;;  %1112 = vmatpush.bf16.msra.mxu3 %v308_v11  ;;  %v303_v21 = vpack.c.bf16 %v283_v18, %v281_v17  ;;  %v304_v22 = vpack.c.bf16 %v284_v20, %v282_v19  ;;  %v277_v23 = vld [vmem:[%s1228_s26 + $0x80] sm:$0xff]  ;;  %v279_v24 = vld [vmem:[%s1228_s26 + $0x90] sm:$0xff]  ;;  %v278_v25 = vld [vmem:[%s1228_s26 + $0x88] sm:$0xff] }
  0x14   : > { %v280_v26 = vld [vmem:[%s1228_s26 + $0x98] sm:$0xff]  ;;  %v301_v29 = vpack.c.bf16 %v279_v24, %v277_v23  ;;  %v273_v31 = vld [vmem:[%s1228_s26 + $0x60] sm:$0xff]  ;;  %v275_v32 = vld [vmem:[%s1228_s26 + $0x70] sm:$0xff] }
  0x15   : > { %v302_v30 = vpack.c.bf16 %v280_v26, %v278_v25  ;;  %v274_v34 = vld [vmem:[%s1228_s26 + $0x68] sm:$0xff]  ;;  %v276_v35 = vld [vmem:[%s1228_s26 + $0x78] sm:$0xff]  ;;  %v299_v36 = vpack.c.bf16 %v275_v32, %v273_v31  ;;  %v269_v38 = vld [vmem:[%s1228_s26 + $0x40] sm:$0xff] }
  0x16   : > { %390 = vperm.xlu1 %1146, %v344_v6   ;;  %380 = vperm.xlu0 %1145, %v342_v14   ;;  %v300_v37 = vpack.c.bf16 %v276_v35, %v274_v34  ;;  %v271_v39 = vld [vmem:[%s1228_s26 + $0x50] sm:$0xff]  ;;  %v270_v40 = vld [vmem:[%s1228_s26 + $0x48] sm:$0xff]  ;;  %v272_v41 = vld [vmem:[%s1228_s26 + $0x58] sm:$0xff] }
  0x17   : > { %630 = vmatpush.bf16.msra.mxu0 %v305_v15  ;;  %1105 = vmatpush.bf16.msra.mxu2 %v305_v15  ;;  %v297_v44 = vpack.c.bf16 %v271_v39, %v269_v38  ;;  %v346_v45 = vld [vmem:[%s1510_s2 + $0x28] sm:$0xff]  ;;  %v298_v46 = vpack.c.bf16 %v272_v41, %v270_v40  ;;  %v265_v47 = vld [vmem:[%s1228_s26 + $0x20] sm:$0xff]  ;;  %v267_v48 = vld [vmem:[%s1228_s26 + $0x30] sm:$0xff] }
  0x18   : > { %719 = vmatpush.bf16.msra.mxu1 %v306_v16  ;;  %1113 = vmatpush.bf16.msra.mxu3 %v306_v16  ;;  %v266_v49 = vld [vmem:[%s1228_s26 + $0x28] sm:$0xff]  ;;  %v268_v50 = vld [vmem:[%s1228_s26 + $0x38] sm:$0xff]  ;;  %v295_v51 = vpack.c.bf16 %v267_v48, %v265_v47  ;;  %v261_v53 = vld [vmem:[%s1228_s26] sm:$0xff] }
  0x19   : > { %400 = vperm.xlu2 %1147, %v346_v45   ;;  %v296_v52 = vpack.c.bf16 %v268_v50, %v266_v49  ;;  %v263_v54 = vld [vmem:[%s1228_s26 + $0x10] sm:$0xff]  ;;  %v262_v55 = vld [vmem:[%s1228_s26 + $0x8] sm:$0xff]  ;;  %v264_v56 = vld [vmem:[%s1228_s26 + $0x18] sm:$0xff] }
  0x1a   : > { %v354_v57 = vld [vmem:[%s1510_s2 + $0x68] sm:$0xff]  ;;  %v353_v58 = vld [vmem:[%s1510_s2 + $0x60] sm:$0xff]  ;;  %v293_v59 = vpack.c.bf16 %v263_v54, %v261_v53  ;;  %v294_v61 = vpack.c.bf16 %v264_v56, %v262_v55  ;;  %v356_v1 = vld [vmem:[%s1510_s2 + $0x78] sm:$0xff] }
  0x1b   : > { %631 = vmatpush.bf16.msra.mxu0 %v303_v21  ;;  %1106 = vmatpush.bf16.msra.mxu2 %v303_v21  ;;  %v349_v60 = vld [vmem:[%s1510_s2 + $0x40] sm:$0xff]  ;;  %v352_v2 = vld [vmem:[%s1510_s2 + $0x58] sm:$0xff]  ;;  %v359_v4 = vld [vmem:[%s1510_s2 + $0x90] sm:$0xff] }
  0x1c   : > { %720 = vmatpush.bf16.msra.mxu1 %v304_v22  ;;  %1114 = vmatpush.bf16.msra.mxu3 %v304_v22  ;;  %v1088_v62 = vld [vmem:[%s1509_s1] sm:$0xff]  ;;  %v360_v3 = vld [vmem:[%s1510_s2 + $0x98] sm:$0xff]  ;;  %v355_v5 = vld [vmem:[%s1510_s2 + $0x70] sm:$0xff] }
  0x1d   : > { %v1096_v63 = vld [vmem:[%s1509_s1 + $0x40] sm:$0xff]  ;;  %v1089_v6 = vld [vmem:[%s1509_s1 + $0x8] sm:$0xff]  ;;  %v363_v8 = vld [vmem:[%s1510_s2 + $0xb0] sm:$0xff] }
  0x1e   : > { %410 = vperm.xlu1 %1146, %v348_v27   ;;  %405 = vperm.xlu0 %1145, %v347_v28   ;;  %v357_v0 = vld [vmem:[%s1510_s2 + $0x80] sm:$0xff]  ;;  %v1097_v7 = vld [vmem:[%s1509_s1 + $0x48] sm:$0xff]  ;;  %v1090_v13 = vld [vmem:[%s1509_s1 + $0x10] sm:$0xff] }
  0x1f   : > { %632 = vmatpush.bf16.msra.mxu0 %v301_v29  ;;  %1107 = vmatpush.bf16.msra.mxu2 %v301_v29  ;;  %v362_v9 = vld [vmem:[%s1510_s2 + $0xa8] sm:$0xff]  ;;  %v365_v12 = vld [vmem:[%s1510_s2 + $0xc0] sm:$0xff]  ;;  %v1098_v14 = vld [vmem:[%s1509_s1 + $0x50] sm:$0xff] }
  0x20   : > { %721 = vmatpush.bf16.msra.mxu1 %v302_v30  ;;  %1115 = vmatpush.bf16.msra.mxu3 %v302_v30  ;;  %v358_v10 = vld [vmem:[%s1510_s2 + $0x88] sm:$0xff]  ;;  %v369_v15 = vld [vmem:[%s1510_s2 + $0xe0] sm:$0xff]  ;;  %v368_v16 = vld [vmem:[%s1510_s2 + $0xd8] sm:$0xff] }
  0x21   : > { %415 = vperm.xlu2 %1147, %v349_v60   ;;  %v366_v11 = vld [vmem:[%s1510_s2 + $0xc8] sm:$0xff]  ;;  %v361_v17 = vld [vmem:[%s1510_s2 + $0xa0] sm:$0xff]  ;;  %v364_v18 = vld [vmem:[%s1510_s2 + $0xb8] sm:$0xff] }
  0x22   : > { %v372_v19 = vld [vmem:[%s1510_s2 + $0xf8] sm:$0xff]  ;;  %v371_v20 = vld [vmem:[%s1510_s2 + $0xf0] sm:$0xff]  ;;  %v370_v24 = vld [vmem:[%s1510_s2 + $0xe8] sm:$0xff] }
  0x23   : > { %633 = vmatpush.bf16.msra.mxu0 %v299_v36  ;;  %1108 = vmatpush.bf16.msra.mxu2 %v299_v36  ;;  %v1091_v21 = vld [vmem:[%s1509_s1 + $0x18] sm:$0xff]  ;;  %v367_v23 = vld [vmem:[%s1510_s2 + $0xd0] sm:$0xff]  ;;  %v1092_v25 = vld [vmem:[%s1509_s1 + $0x20] sm:$0xff] }
  0x24   : > { %722 = vmatpush.bf16.msra.mxu1 %v300_v37  ;;  %1116 = vmatpush.bf16.msra.mxu3 %v300_v37  ;;  %v1099_v22 = vld [vmem:[%s1509_s1 + $0x58] sm:$0xff]  ;;  %v1100_v26 = vld [vmem:[%s1509_s1 + $0x60] sm:$0xff]  ;;  %v1093_v27 = vld [vmem:[%s1509_s1 + $0x28] sm:$0xff] }
  0x25   : > { %v1101_v28 = vld [vmem:[%s1509_s1 + $0x68] sm:$0xff]  ;;  %v1094_v33 = vld [vmem:[%s1509_s1 + $0x30] sm:$0xff]  ;;  %v1095_v40 = vld [vmem:[%s1509_s1 + $0x38] sm:$0xff] }
  0x26   : > { %425 = vperm.xlu1 %1146, %v351_v42   ;;  %420 = vperm.xlu0 %1145, %v350_v43   ;;  %v1102_v34 = vld [vmem:[%s1509_s1 + $0x70] sm:$0xff]  ;;  %v1103_v41 = vld [vmem:[%s1509_s1 + $0x78] sm:$0xff] }
  0x27   : > { %634 = vmatpush.bf16.msra.mxu0 %v297_v44  ;;  %1109 = vmatpush.bf16.msra.mxu2 %v297_v44 }
  0x28   : > { %723 = vmatpush.bf16.msra.mxu1 %v298_v46  ;;  %1117 = vmatpush.bf16.msra.mxu3 %v298_v46 }
  0x29   : > { %430 = vperm.xlu2 %1147, %v352_v2  }
  0x2b   : > { %635 = vmatpush.bf16.msra.mxu0 %v295_v51  ;;  %1110 = vmatpush.bf16.msra.mxu2 %v295_v51 }
  0x2c   : > { %724 = vmatpush.bf16.msra.mxu1 %v296_v52  ;;  %1118 = vmatpush.bf16.msra.mxu3 %v296_v52 }
  0x2e   : > { %440 = vperm.xlu1 %1146, %v354_v57   ;;  %435 = vperm.xlu0 %1145, %v353_v58  }
  0x2f   : > { %636 = vmatpush.bf16.msra.mxu0 %v293_v59  ;;  %1111 = vmatpush.bf16.msra.mxu2 %v293_v59 }
  0x30   : > { %725 = vmatpush.bf16.msra.mxu1 %v294_v61  ;;  %1119 = vmatpush.bf16.msra.mxu3 %v294_v61 }
  0x31   : > { %445 = vperm.xlu2 %1147, %v355_v5  }
  0x32   : > { %637 = vmatmul.bf16.vlgmr.msra.gmra.mxu0 %v1088_v62  ;;  %677 = vmatmul.bf16.vlgmr.msra.gmra.mxu2 %v1096_v63 }
  0x33   : > { %726 = vmatmul.bf16.vlgmr.msra.gmra.mxu1 %v1088_v62  ;;  %766 = vmatmul.bf16.vlgmr.msra.gmra.mxu3 %v1096_v63 }
  0x36   : > { %455 = vperm.xlu1 %1146, %v357_v0   ;;  %450 = vperm.xlu0 %1145, %v356_v1  }
  0x39   : > { %460 = vperm.xlu2 %1147, %v358_v10  }
  0x3e   : > { %470 = vperm.xlu1 %1146, %v360_v3   ;;  %465 = vperm.xlu0 %1145, %v359_v4  }
  0x41   : > { %475 = vperm.xlu2 %1147, %v361_v17  }
  0x42   : > { %642 = vmatmul.bf16.gmra.mxu0 %v1089_v6  ;;  %682 = vmatmul.bf16.gmra.mxu2 %v1097_v7 }
  0x43   : > { %731 = vmatmul.bf16.gmra.mxu1 %v1089_v6  ;;  %771 = vmatmul.bf16.gmra.mxu3 %v1097_v7 }
  0x46   : > { %485 = vperm.xlu1 %1146, %v363_v8   ;;  %480 = vperm.xlu0 %1145, %v362_v9  }
  0x49   : > { %490 = vperm.xlu2 %1147, %v364_v18  }
  0x4e   : > { %500 = vperm.xlu1 %1146, %v366_v11   ;;  %495 = vperm.xlu0 %1145, %v365_v12  }
  0x51   : > { %505 = vperm.xlu2 %1147, %v367_v23  }
  0x52   : > { %647 = vmatmul.bf16.gmra.mxu0 %v1090_v13  ;;  %687 = vmatmul.bf16.gmra.mxu2 %v1098_v14 }
  0x53   : > { %736 = vmatmul.bf16.gmra.mxu1 %v1090_v13  ;;  %776 = vmatmul.bf16.gmra.mxu3 %v1098_v14 }
  0x56   : > { %515 = vperm.xlu1 %1146, %v369_v15   ;;  %510 = vperm.xlu0 %1145, %v368_v16  }
  0x59   : > { %520 = vperm.xlu2 %1147, %v370_v24  }
  0x5e   : > { %530 = vperm.xlu1 %1146, %v372_v19   ;;  %525 = vperm.xlu0 %1145, %v371_v20  }
  0x62   : > { %652 = vmatmul.bf16.gmra.mxu0 %v1091_v21  ;;  %692 = vmatmul.bf16.gmra.mxu2 %v1099_v22 }
  0x63   : > { %741 = vmatmul.bf16.gmra.mxu1 %v1091_v21  ;;  %781 = vmatmul.bf16.gmra.mxu3 %v1099_v22 }
  0x6a   : > { %v1390_v31 = vpop.permute.xlu2 %395 }
  0x72   : > { %657 = vmatmul.bf16.gmra.mxu0 %v1092_v25  ;;  %697 = vmatmul.bf16.gmra.mxu2 %v1100_v26 }
  0x73   : > { %746 = vmatmul.bf16.gmra.mxu1 %v1092_v25  ;;  %786 = vmatmul.bf16.gmra.mxu3 %v1100_v26  ;;  %v1400_v36 = vpop.permute.xlu2 %400 }
  0x7b   : > { %v1406_v39 = vpop.permute.xlu2 %415 }
  0x80   : > { %v1388_v29 = vpop.permute.xlu1 %385  ;;  %v376_v30 = vpop.permute.xlu0 %375 }
  0x82   : > { %662 = vmatmul.bf16.gmra.mxu0 %v1093_v27  ;;  %702 = vmatmul.bf16.gmra.mxu2 %v1101_v28 }
  0x83   : > { %751 = vmatmul.bf16.gmra.mxu1 %v1093_v27  ;;  %791 = vmatmul.bf16.gmra.mxu3 %v1101_v28  ;;  %v1418_v44 = vpop.permute.xlu2 %430 }
  0x88   : > { %v1392_v32 = vpop.permute.xlu1 %390  ;;  %v381_v35 = vpop.permute.xlu0 %380 }
  0x8b   : > { %v1425_v51 = vpop.permute.xlu2 %445 }
  0x90   : > { %v1402_v37 = vpop.permute.xlu1 %410  ;;  %v1404_v38 = vpop.permute.xlu0 %405 }
  0x92   : > { %667 = vmatmul.bf16.gmra.mxu0 %v1094_v33  ;;  %707 = vmatmul.bf16.gmra.mxu2 %v1102_v34 }
  0x93   : > { %756 = vmatmul.bf16.gmra.mxu1 %v1094_v33  ;;  %796 = vmatmul.bf16.gmra.mxu3 %v1102_v34  ;;  %v461_v1 = vpop.permute.xlu2 %460 }
  0x98   : > { %v1414_v42 = vpop.permute.xlu1 %425  ;;  %v1416_v43 = vpop.permute.xlu0 %420 }
  0xa0   : > { %v1420_v45 = vpop.permute.xlu1 %440  ;;  %v1423_v49 = vpop.permute.xlu0 %435 }
  0xa2   : > { %672 = vmatmul.bf16.gmra.mxu0 %v1095_v40  ;;  %712 = vmatmul.bf16.gmra.mxu2 %v1103_v41 }
  0xa3   : > { %761 = vmatmul.bf16.gmra.mxu1 %v1095_v40  ;;  %801 = vmatmul.bf16.gmra.mxu3 %v1103_v41 }
  0xa8   : > { %v456_v53 = vpop.permute.xlu1 %455  ;;  %v1438_v63 = vpop.permute.xlu0 %450 }
  0xaf   : > { %v638_v46 = vpop.f32.mrf.mxu0 }
  0xb0   : > { %v639_v47 = vadd.f32 %v638_v46, %v376_v30  ;;  %v727_v48 = vpop.f32.mrf.mxu1  ;;  %v466_v12 = vpop.permute.xlu0 %465 }
  0xb1   : > { %v728_v50 = vadd.f32 %v727_v48, %v376_v30  ;;  %v471_v23 = vpop.permute.xlu1 %470 }
  0xb3   : > { %v807_v52 = vpack.c.bf16 %v728_v50, %v639_v47 }
  0xb5   : > { %823 = vst [vmem:[%s1430_s8] sm:$0xff] %v807_v52  ;;  %v678_v54 = vpop.f32.mrf.mxu2 }
  0xb6   : > { %v679_v55 = vadd.f32 %v678_v54, %v456_v53  ;;  %v767_v56 = vpop.f32.mrf.mxu3 }
  0xb7   : > { %v768_v57 = vadd.f32 %v767_v56, %v456_v53  ;;  %v640_v58 = vpop.f32.mrf.mxu0 }
  0xb8   : > { %v641_v59 = vadd.f32 %v640_v58, %v381_v35  ;;  %v729_v60 = vpop.f32.mrf.mxu1 }
  0xb9   : > { %v839_v61 = vpack.c.bf16 %v768_v57, %v679_v55  ;;  %v730_v62 = vadd.f32 %v729_v60, %v381_v35  ;;  %v476_v35 = vpop.permute.xlu2 %475  ;;  %v481_v55 = vpop.permute.xlu0 %480 }
  0xbb   : > { %855 = vst [vmem:[%s1436_s10] sm:$0xff] %v839_v61  ;;  %v808_v0 = vpack.c.bf16 %v730_v62, %v641_v59 }
  0xbd   : > { %824 = vst [vmem:[%s1430_s8 + $0x8] sm:$0xff] %v808_v0  ;;  %v680_v2 = vpop.f32.mrf.mxu2 }
  0xbe   : > { %v681_v3 = vadd.f32 %v680_v2, %v461_v1  ;;  %v769_v4 = vpop.f32.mrf.mxu3  ;;  %v486_v2 = vpop.permute.xlu1 %485 }
  0xbf   : > { %v770_v5 = vadd.f32 %v769_v4, %v461_v1  ;;  %v643_v6 = vpop.f32.mrf.mxu0 }
  0xc0   : > { %v644_v7 = vadd.f32 %v643_v6, %v1388_v29  ;;  %v732_v8 = vpop.f32.mrf.mxu1 }
  0xc1   : > { %v840_v9 = vpack.c.bf16 %v770_v5, %v681_v3  ;;  %v733_v10 = vadd.f32 %v732_v8, %v1388_v29 }
  0xc3   : > { %856 = vst [vmem:[%s1436_s10 + $0x8] sm:$0xff] %v840_v9  ;;  %v809_v11 = vpack.c.bf16 %v733_v10, %v644_v7 }
  0xc5   : > { %825 = vst [vmem:[%s1430_s8 + $0x10] sm:$0xff] %v809_v11  ;;  %v683_v13 = vpop.f32.mrf.mxu2 }
  0xc6   : > { %v684_v14 = vadd.f32 %v683_v13, %v466_v12  ;;  %v772_v15 = vpop.f32.mrf.mxu3 }
  0xc7   : > { %v773_v16 = vadd.f32 %v772_v15, %v466_v12  ;;  %v645_v17 = vpop.f32.mrf.mxu0  ;;  %v491_v12 = vpop.permute.xlu2 %490 }
  0xc8   : > { %v646_v18 = vadd.f32 %v645_v17, %v1392_v32  ;;  %v734_v19 = vpop.f32.mrf.mxu1 }
  0xc9   : > { %v841_v20 = vpack.c.bf16 %v773_v16, %v684_v14  ;;  %v735_v21 = vadd.f32 %v734_v19, %v1392_v32 }
  0xcb   : > { %857 = vst [vmem:[%s1436_s10 + $0x10] sm:$0xff] %v841_v20  ;;  %v810_v22 = vpack.c.bf16 %v735_v21, %v646_v18 }
  0xcd   : > { %826 = vst [vmem:[%s1430_s8 + $0x18] sm:$0xff] %v810_v22  ;;  %v685_v24 = vpop.f32.mrf.mxu2  ;;  %v496_v22 = vpop.permute.xlu0 %495 }
  0xce   : > { %v686_v25 = vadd.f32 %v685_v24, %v471_v23  ;;  %v774_v26 = vpop.f32.mrf.mxu3 }
  0xcf   : > { %v775_v27 = vadd.f32 %v774_v26, %v471_v23  ;;  %v648_v28 = vpop.f32.mrf.mxu0 }
  0xd0   : > { %v649_v29 = vadd.f32 %v648_v28, %v1390_v31  ;;  %v737_v30 = vpop.f32.mrf.mxu1 }
  0xd1   : > { %v842_v33 = vpack.c.bf16 %v775_v27, %v686_v25  ;;  %v738_v34 = vadd.f32 %v737_v30, %v1390_v31 }
  0xd3   : > { %858 = vst [vmem:[%s1436_s10 + $0x18] sm:$0xff] %v842_v33  ;;  %v811_v32 = vpack.c.bf16 %v738_v34, %v649_v29  ;;  %v501_v34 = vpop.permute.xlu1 %500 }
  0xd5   : > { %827 = vst [vmem:[%s1430_s8 + $0x20] sm:$0xff] %v811_v32  ;;  %v688_v40 = vpop.f32.mrf.mxu2 }
  0xd6   : > { %v689_v41 = vadd.f32 %v688_v40, %v476_v35  ;;  %v777_v46 = vpop.f32.mrf.mxu3 }
  0xd7   : > { %v778_v47 = vadd.f32 %v777_v46, %v476_v35  ;;  %v650_v48 = vpop.f32.mrf.mxu0 }
  0xd8   : > { %v651_v50 = vadd.f32 %v650_v48, %v1400_v36  ;;  %v739_v52 = vpop.f32.mrf.mxu1 }
  0xd9   : > { %v843_v53 = vpack.c.bf16 %v778_v47, %v689_v41  ;;  %v740_v54 = vadd.f32 %v739_v52, %v1400_v36 }
  0xdb   : > { %859 = vst [vmem:[%s1436_s10 + $0x20] sm:$0xff] %v843_v53  ;;  %v812_v31 = vpack.c.bf16 %v740_v54, %v651_v50  ;;  %v506_v53 = vpop.permute.xlu2 %505 }
  0xdd   : > { %828 = vst [vmem:[%s1430_s8 + $0x28] sm:$0xff] %v812_v31  ;;  %v690_v56 = vpop.f32.mrf.mxu2 }
  0xde   : > { %v691_v57 = vadd.f32 %v690_v56, %v481_v55  ;;  %v779_v58 = vpop.f32.mrf.mxu3 }
  0xdf   : > { %v780_v59 = vadd.f32 %v779_v58, %v481_v55  ;;  %v653_v60 = vpop.f32.mrf.mxu0 }
  0xe0   : > { %v654_v61 = vadd.f32 %v653_v60, %v1404_v38  ;;  %v742_v62 = vpop.f32.mrf.mxu1 }
  0xe1   : > { %v844_v0 = vpack.c.bf16 %v780_v59, %v691_v57  ;;  %v743_v1 = vadd.f32 %v742_v62, %v1404_v38  ;;  %v511_v62 = vpop.permute.xlu0 %510 }
  0xe3   : > { %860 = vst [vmem:[%s1436_s10 + $0x28] sm:$0xff] %v844_v0  ;;  %v813_v36 = vpack.c.bf16 %v743_v1, %v654_v61 }
  0xe5   : > { %829 = vst [vmem:[%s1430_s8 + $0x30] sm:$0xff] %v813_v36  ;;  %v693_v3 = vpop.f32.mrf.mxu2 }
  0xe6   : > { %v694_v4 = vadd.f32 %v693_v3, %v486_v2  ;;  %v782_v5 = vpop.f32.mrf.mxu3 }
  0xe7   : > { %v783_v6 = vadd.f32 %v782_v5, %v486_v2  ;;  %v655_v7 = vpop.f32.mrf.mxu0 }
  0xe8   : > { %v656_v8 = vadd.f32 %v655_v7, %v1402_v37  ;;  %v744_v9 = vpop.f32.mrf.mxu1 }
  0xe9   : > { %v845_v10 = vpack.c.bf16 %v783_v6, %v694_v4  ;;  %v745_v11 = vadd.f32 %v744_v9, %v1402_v37 }
  0xeb   : > { %861 = vst [vmem:[%s1436_s10 + $0x30] sm:$0xff] %v845_v10  ;;  %v814_v38 = vpack.c.bf16 %v745_v11, %v656_v8  ;;  %v516_v8 = vpop.permute.xlu1 %515 }
  0xed   : > { %830 = vst [vmem:[%s1430_s8 + $0x38] sm:$0xff] %v814_v38  ;;  %v695_v13 = vpop.f32.mrf.mxu2 }
  0xee   : > { %v696_v14 = vadd.f32 %v695_v13, %v491_v12  ;;  %v784_v15 = vpop.f32.mrf.mxu3 }
  0xef   : > { %v785_v16 = vadd.f32 %v784_v15, %v491_v12  ;;  %v658_v17 = vpop.f32.mrf.mxu0 }
  0xf0   : > { %v659_v18 = vadd.f32 %v658_v17, %v1406_v39  ;;  %v747_v19 = vpop.f32.mrf.mxu1  ;;  %v521_v17 = vpop.permute.xlu2 %520 }
  0xf1   : > { %v846_v20 = vpack.c.bf16 %v785_v16, %v696_v14  ;;  %v748_v21 = vadd.f32 %v747_v19, %v1406_v39 }
  0xf3   : > { %862 = vst [vmem:[%s1436_s10 + $0x38] sm:$0xff] %v846_v20  ;;  %v815_v37 = vpack.c.bf16 %v748_v21, %v659_v18 }
  0xf5   : > { %831 = vst [vmem:[%s1430_s8 + $0x40] sm:$0xff] %v815_v37  ;;  %v698_v23 = vpop.f32.mrf.mxu2 }
  0xf6   : > { %v699_v24 = vadd.f32 %v698_v23, %v496_v22  ;;  %v787_v25 = vpop.f32.mrf.mxu3 }
  0xf7   : > { %v788_v26 = vadd.f32 %v787_v25, %v496_v22  ;;  %v660_v27 = vpop.f32.mrf.mxu0 }
  0xf8   : > { %v661_v28 = vadd.f32 %v660_v27, %v1416_v43  ;;  %v749_v29 = vpop.f32.mrf.mxu1 }
  0xf9   : > { %v847_v30 = vpack.c.bf16 %v788_v26, %v699_v24  ;;  %v750_v33 = vadd.f32 %v749_v29, %v1416_v43  ;;  %v526_v26 = vpop.permute.xlu0 %525 }
  0xfb   : > { %863 = vst [vmem:[%s1436_s10 + $0x40] sm:$0xff] %v847_v30  ;;  %v816_v39 = vpack.c.bf16 %v750_v33, %v661_v28 }
  0xfd   : > { %832 = vst [vmem:[%s1430_s8 + $0x48] sm:$0xff] %v816_v39  ;;  %v700_v32 = vpop.f32.mrf.mxu2 }
  0xfe   : > { %v701_v35 = vadd.f32 %v700_v32, %v501_v34  ;;  %v789_v40 = vpop.f32.mrf.mxu3 }
  0xff   : > { %v790_v41 = vadd.f32 %v789_v40, %v501_v34  ;;  %v663_v46 = vpop.f32.mrf.mxu0 }
 0x100   : > { %v664_v47 = vadd.f32 %v663_v46, %v1414_v42  ;;  %v752_v48 = vpop.f32.mrf.mxu1 }
 0x101   : > { %v848_v50 = vpack.c.bf16 %v790_v41, %v701_v35  ;;  %v753_v52 = vadd.f32 %v752_v48, %v1414_v42 }
 0x103   : > { %864 = vst [vmem:[%s1436_s10 + $0x48] sm:$0xff] %v848_v50  ;;  %v817_v43 = vpack.c.bf16 %v753_v52, %v664_v47 }
 0x105   : > { %833 = vst [vmem:[%s1430_s8 + $0x50] sm:$0xff] %v817_v43  ;;  %v703_v54 = vpop.f32.mrf.mxu2 }
 0x106   : > { %v704_v31 = vadd.f32 %v703_v54, %v506_v53  ;;  %v792_v55 = vpop.f32.mrf.mxu3 }
 0x107   : > { %v793_v56 = vadd.f32 %v792_v55, %v506_v53  ;;  %v665_v57 = vpop.f32.mrf.mxu0 }
 0x108   : > { %v666_v58 = vadd.f32 %v665_v57, %v1418_v44  ;;  %v754_v59 = vpop.f32.mrf.mxu1 }
 0x109   : > { %v849_v60 = vpack.c.bf16 %v793_v56, %v704_v31  ;;  %v755_v61 = vadd.f32 %v754_v59, %v1418_v44 }
 0x10b   : > { %865 = vst [vmem:[%s1436_s10 + $0x50] sm:$0xff] %v849_v60  ;;  %v818_v42 = vpack.c.bf16 %v755_v61, %v666_v58 }
 0x10d   : > { %834 = vst [vmem:[%s1430_s8 + $0x58] sm:$0xff] %v818_v42  ;;  %v705_v0 = vpop.f32.mrf.mxu2 }
 0x10e   : > { %v706_v1 = vadd.f32 %v705_v0, %v511_v62  ;;  %v794_v36 = vpop.f32.mrf.mxu3 }
 0x10f   : > { %v795_v2 = vadd.f32 %v794_v36, %v511_v62  ;;  %v668_v3 = vpop.f32.mrf.mxu0 }
 0x110   : > { %v669_v4 = vadd.f32 %v668_v3, %v1423_v49  ;;  %v757_v5 = vpop.f32.mrf.mxu1 }
 0x111   : > { %v850_v6 = vpack.c.bf16 %v795_v2, %v706_v1  ;;  %v758_v7 = vadd.f32 %v757_v5, %v1423_v49 }
 0x113   : > { %866 = vst [vmem:[%s1436_s10 + $0x58] sm:$0xff] %v850_v6  ;;  %v819_v44 = vpack.c.bf16 %v758_v7, %v669_v4 }
 0x115   : > { %835 = vst [vmem:[%s1430_s8 + $0x60] sm:$0xff] %v819_v44  ;;  %v708_v9 = vpop.f32.mrf.mxu2 }
 0x116   : > { %v709_v10 = vadd.f32 %v708_v9, %v516_v8  ;;  %v797_v11 = vpop.f32.mrf.mxu3 }
 0x117   : > { %v798_v38 = vadd.f32 %v797_v11, %v516_v8  ;;  %v670_v12 = vpop.f32.mrf.mxu0 }
 0x118   : > { %v671_v13 = vadd.f32 %v670_v12, %v1420_v45  ;;  %v759_v14 = vpop.f32.mrf.mxu1 }
 0x119   : > { %v851_v15 = vpack.c.bf16 %v798_v38, %v709_v10  ;;  %v760_v16 = vadd.f32 %v759_v14, %v1420_v45 }
 0x11b   : > { %867 = vst [vmem:[%s1436_s10 + $0x60] sm:$0xff] %v851_v15  ;;  %v820_v49 = vpack.c.bf16 %v760_v16, %v671_v13 }
 0x11d   : > { %836 = vst [vmem:[%s1430_s8 + $0x68] sm:$0xff] %v820_v49  ;;  %v710_v18 = vpop.f32.mrf.mxu2 }
 0x11e   : > { %v711_v19 = vadd.f32 %v710_v18, %v521_v17  ;;  %v799_v20 = vpop.f32.mrf.mxu3 }
 0x11f   : > { %v800_v21 = vadd.f32 %v799_v20, %v521_v17  ;;  %v673_v37 = vpop.f32.mrf.mxu0 }
 0x120   : > { %v674_v22 = vadd.f32 %v673_v37, %v1425_v51  ;;  %v762_v23 = vpop.f32.mrf.mxu1 }
 0x121   : > { %v852_v24 = vpack.c.bf16 %v800_v21, %v711_v19  ;;  %v763_v25 = vadd.f32 %v762_v23, %v1425_v51  ;;  %v531_v51 = vpop.permute.xlu1 %530 }
 0x123   : > { %868 = vst [vmem:[%s1436_s10 + $0x68] sm:$0xff] %v852_v24  ;;  %v821_v45 = vpack.c.bf16 %v763_v25, %v674_v22 }
 0x125   : > { %837 = vst [vmem:[%s1430_s8 + $0x70] sm:$0xff] %v821_v45  ;;  %v713_v27 = vpop.f32.mrf.mxu2 }
 0x126   : > { %v714_v28 = vadd.f32 %v713_v27, %v526_v26  ;;  %v802_v29 = vpop.f32.mrf.mxu3 }
 0x127   : > { %v803_v30 = vadd.f32 %v802_v29, %v526_v26  ;;  %v675_v33 = vpop.f32.mrf.mxu0 }
 0x128   : > { %v676_v39 = vadd.f32 %v675_v33, %v1438_v63  ;;  %v764_v34 = vpop.f32.mrf.mxu1 }
 0x129   : > { %v853_v32 = vpack.c.bf16 %v803_v30, %v714_v28  ;;  %v765_v35 = vadd.f32 %v764_v34, %v1438_v63 }
 0x12b   : > { %869 = vst [vmem:[%s1436_s10 + $0x70] sm:$0xff] %v853_v32  ;;  %v822_v40 = vpack.c.bf16 %v765_v35, %v676_v39 }
 0x12d   : > { %838 = vst [vmem:[%s1430_s8 + $0x78] sm:$0xff] %v822_v40  ;;  %v715_v41 = vpop.f32.mrf.mxu2 }
 0x12e   : > { %v716_v46 = vadd.f32 %v715_v41, %v531_v51  ;;  %v804_v47 = vpop.f32.mrf.mxu3 }
 0x12f   : > { %v805_v48 = vadd.f32 %v804_v47, %v531_v51 }
 0x131   : > { %v854_v50 = vpack.c.bf16 %v805_v48, %v716_v46 }
 0x133   : > { %870 = vst [vmem:[%s1436_s10 + $0x78] sm:$0xff] %v854_v50 }
 0x134 PF: > { %s15_s17 = sadd.s32 1, %s1170_s17   ;;  %s1513_s15 = smov %s1166_s16 }
 0x135   : > { %p12_p5 = scmp.ge.s32.totalorder %s15_s17, 4   ;;  %s1514_s16 = smov %s1516_s18 }
 0x137   :  { %14 = sbr.rel (!%p12_p5) target bundleno = 2 (0x2), region = 74 }

// kernel: _lambda_.5
= control target key start
LH: loop header
LB: loop body
LE: loop exit
PB: predicated region body
PF: predicated region fallthrough
CT: control target
= control target key end

     0   :  { %s1292_s18 = smov 0   ;;  %s1294_s19 = smov 0   ;;  %s1534_s0 = inlined_call_operand.vmem [shape: bf16[2,128,256], index: 0, kind: input, shape index: {}]   ;;  %s1535_s1 = inlined_call_operand.vmem [shape: f32[2,128,256], index: 1, kind: input, shape index: {}]   ;;  %s1536_s2 = inlined_call_operand.vmem [shape: bf16[128,128], index: 2, kind: input, shape index: {}]   ;;  %s1537_s3 = inlined_call_operand.vmem [shape: bf16[128,128], index: 3, kind: input, shape index: {}]   ;;  %s1538_s4 = inlined_call_operand.vmem [shape: f32[128,1], index: 4, kind: input, shape index: {}]   ;;  %s1539_s5 = inlined_call_operand.vmem [shape: f32[2,128,256], index: 5, kind: output, shape index: {}]  }
   0x1   :  { %s1296_s20 = smov 0  }
   0x2 LB: > { %s27_s21 = sadd.s32 1, %s1255_s19  ;;  %p1037_p0 = scmp.ge.s32.totalorder %s1259_s20, 1  ;;  %s1259_s20 = sphi %s1296_s20, %s15_s20   ;;  %s1255_s19 = sphi %s1294_s19, %s1541_s19   ;;  %s1251_s18 = sphi %s1292_s18, %s1540_s18  }
   0x3   : > { %p29_p1 = scmp.ge.s32.totalorder %s27_s21, 2  ;;  %p225_p2 = scmp.lt.s32.totalorder %s1259_s20, 3 }
   0x5   : > { %s1543_s21 = smov (%p29_p1, %s27_s21), 0  ;;  %p226_p3 = pnand %p1037_p0, %p225_p2 }
   0x6   : > { %p271_p4 = scmp.lt.s32.totalorder (!%p226_p3), %s1251_s18, 1 }
   0x7   : > { %229 = sbr.rel (%p226_p3) target bundleno = 309 (0x135), region = 40 }
   0xc   : > { %s1545_s18 = smov (!%p271_p4, %s1251_s18), 1 }
   0xd   : > { %s1175_s22 = sshll.u32 %s1545_s18, 8  ;;  %s1174_s23 = sshll.u32 %s1545_s18, 7 }
   0xe   : > { %s1319_s26 = scalar_lea.vmem %s1535_s1, %s1175_s22  ;;  %s1327_s29 = scalar_lea.vmem %s1534_s0, %s1174_s23 }
   0xf   : > { %v344_v0 = vld [vmem:[%s1319_s26 + $0xe0] sm:$0xff]  ;;  %v346_v1 = vld [vmem:[%s1319_s26 + $0xf0] sm:$0xff]  ;;  %v345_v2 = vld [vmem:[%s1319_s26 + $0xe8] sm:$0xff]  ;;  %s1491_s11 = scalar_lea.vmem %s1539_s5, %s1175_s22 }
  0x10   : > { %v362_v3 = vpack.c.bf16 %v346_v1, %v344_v0  ;;  %v347_v4 = vld [vmem:[%s1319_s26 + $0xf8] sm:$0xff]  ;;  %v1166_v5 = vld [vmem:[%s1327_s29 + $0x70] sm:$0xf]  ;;  %v1191_v9 = vld [vmem:[%s1327_s29 + $0x74] sm:$0xf] }
  0x11   : > { %v1192_v6 = vld [vmem:[%s1327_s29 + $0x74] sm:$0xf0]  ;;  %v363_v7 = vpack.c.bf16 %v347_v4, %v345_v2  ;;  %v1168_v10 = vld [vmem:[%s1327_s29 + $0x78] sm:$0xf0]  ;;  %v340_v11 = vld [vmem:[%s1319_s26 + $0xc0] sm:$0xff] }
  0x12   : > { %v1167_v8 = vor.u32 %v1192_v6, %v1166_v5  ;;  %444 = vmatpush.bf16.msra.mxu0 %v362_v3  ;;  %v1171_v12 = vor.u32 %v1191_v9, %v1168_v10  ;;  %v342_v13 = vld [vmem:[%s1319_s26 + $0xd0] sm:$0xff]  ;;  %v341_v14 = vld [vmem:[%s1319_s26 + $0xc8] sm:$0xff]  ;;  %v343_v15 = vld [vmem:[%s1319_s26 + $0xd8] sm:$0xff] }
  0x13   : > { %493 = vmatpush.bf16.msra.mxu1 %v363_v7  ;;  %v360_v16 = vpack.c.bf16 %v342_v13, %v340_v11  ;;  %v361_v17 = vpack.c.bf16 %v343_v15, %v341_v14  ;;  %v1158_v18 = vld [vmem:[%s1327_s29 + $0x60] sm:$0xf]  ;;  %v1190_v19 = vld [vmem:[%s1327_s29 + $0x64] sm:$0xf0]  ;;  %v1189_v20 = vld [vmem:[%s1327_s29 + $0x64] sm:$0xf] }
  0x14   : > { %670 = vmatpush.bf16.msra.mxu2 %v1167_v8  ;;  %719 = vmatpush.bf16.msra.mxu3 %v1171_v12  ;;  %v1159_v21 = vor.u32 %v1190_v19, %v1158_v18  ;;  %v1160_v22 = vld [vmem:[%s1327_s29 + $0x68] sm:$0xf0]  ;;  %v336_v23 = vld [vmem:[%s1319_s26 + $0xa0] sm:$0xff]  ;;  %v338_v24 = vld [vmem:[%s1319_s26 + $0xb0] sm:$0xff] }
  0x15   : > { %v1163_v25 = vor.u32 %v1189_v20, %v1160_v22  ;;  %v337_v26 = vld [vmem:[%s1319_s26 + $0xa8] sm:$0xff]  ;;  %v339_v27 = vld [vmem:[%s1319_s26 + $0xb8] sm:$0xff]  ;;  %v1150_v28 = vld [vmem:[%s1327_s29 + $0x50] sm:$0xf]  ;;  %v358_v29 = vpack.c.bf16 %v338_v24, %v336_v23 }
  0x16   : > { %445 = vmatpush.bf16.msra.mxu0 %v360_v16  ;;  %v1188_v30 = vld [vmem:[%s1327_s29 + $0x54] sm:$0xf0]  ;;  %v1187_v31 = vld [vmem:[%s1327_s29 + $0x54] sm:$0xf]  ;;  %v1152_v32 = vld [vmem:[%s1327_s29 + $0x58] sm:$0xf0]  ;;  %v359_v33 = vpack.c.bf16 %v339_v27, %v337_v26 }
  0x17   : > { %494 = vmatpush.bf16.msra.mxu1 %v361_v17  ;;  %v1151_v34 = vor.u32 %v1188_v30, %v1150_v28  ;;  %v332_v35 = vld [vmem:[%s1319_s26 + $0x80] sm:$0xff]  ;;  %v334_v36 = vld [vmem:[%s1319_s26 + $0x90] sm:$0xff]  ;;  %v333_v37 = vld [vmem:[%s1319_s26 + $0x88] sm:$0xff]  ;;  %v1155_v38 = vor.u32 %v1187_v31, %v1152_v32  ;;  %v1261_v16 = vmov 0  }
  0x18   : > { %671 = vmatpush.bf16.msra.mxu2 %v1159_v21  ;;  %720 = vmatpush.bf16.msra.mxu3 %v1163_v25  ;;  %v335_v39 = vld [vmem:[%s1319_s26 + $0x98] sm:$0xff]  ;;  %v1142_v40 = vld [vmem:[%s1327_s29 + $0x40] sm:$0xf]  ;;  %v1186_v41 = vld [vmem:[%s1327_s29 + $0x44] sm:$0xf0]  ;;  %v356_v44 = vpack.c.bf16 %v334_v36, %v332_v35 }
  0x19   : > { %v1185_v42 = vld [vmem:[%s1327_s29 + $0x44] sm:$0xf]  ;;  %v1144_v43 = vld [vmem:[%s1327_s29 + $0x48] sm:$0xf0]  ;;  %v357_v45 = vpack.c.bf16 %v335_v39, %v333_v37  ;;  %v1143_v46 = vor.u32 %v1186_v41, %v1142_v40  ;;  %v330_v48 = vld [vmem:[%s1319_s26 + $0x70] sm:$0xff]  ;;  %1234 = vset.pattern.permute.xlu0 %v1261_v16  ;;  %1235 = vset.pattern.permute.xlu1 %v1261_v16 }
  0x1a   : > { %446 = vmatpush.bf16.msra.mxu0 %v358_v29  ;;  %v328_v47 = vld [vmem:[%s1319_s26 + $0x60] sm:$0xff]  ;;  %v329_v49 = vld [vmem:[%s1319_s26 + $0x68] sm:$0xff]  ;;  %v1147_v50 = vor.u32 %v1185_v42, %v1144_v43  ;;  %v331_v51 = vld [vmem:[%s1319_s26 + $0x78] sm:$0xff]  ;;  %1236 = vset.pattern.permute.xlu2 %v1261_v16 }
  0x1b   : > { %495 = vmatpush.bf16.msra.mxu1 %v359_v33  ;;  %v1134_v52 = vld [vmem:[%s1327_s29 + $0x30] sm:$0xf]  ;;  %v1184_v53 = vld [vmem:[%s1327_s29 + $0x34] sm:$0xf0]  ;;  %v1183_v54 = vld [vmem:[%s1327_s29 + $0x34] sm:$0xf]  ;;  %v354_v56 = vpack.c.bf16 %v330_v48, %v328_v47  ;;  %v355_v57 = vpack.c.bf16 %v331_v51, %v329_v49 }
  0x1c   : > { %672 = vmatpush.bf16.msra.mxu2 %v1151_v34  ;;  %721 = vmatpush.bf16.msra.mxu3 %v1155_v38  ;;  %v1136_v55 = vld [vmem:[%s1327_s29 + $0x38] sm:$0xf0]  ;;  %v1135_v58 = vor.u32 %v1184_v53, %v1134_v52  ;;  %v324_v59 = vld [vmem:[%s1319_s26 + $0x40] sm:$0xff]  ;;  %v326_v60 = vld [vmem:[%s1319_s26 + $0x50] sm:$0xff] }
  0x1d   : > { %v325_v61 = vld [vmem:[%s1319_s26 + $0x48] sm:$0xff]  ;;  %v1139_v62 = vor.u32 %v1183_v54, %v1136_v55  ;;  %v327_v63 = vld [vmem:[%s1319_s26 + $0x58] sm:$0xff]  ;;  %v1126_v0 = vld [vmem:[%s1327_s29 + $0x20] sm:$0xf]  ;;  %v352_v4 = vpack.c.bf16 %v326_v60, %v324_v59 }
  0x1e   : > { %447 = vmatpush.bf16.msra.mxu0 %v356_v44  ;;  %v1182_v1 = vld [vmem:[%s1327_s29 + $0x24] sm:$0xf0]  ;;  %v1181_v2 = vld [vmem:[%s1327_s29 + $0x24] sm:$0xf]  ;;  %v1128_v3 = vld [vmem:[%s1327_s29 + $0x28] sm:$0xf0]  ;;  %v353_v5 = vpack.c.bf16 %v327_v63, %v325_v61 }
  0x1f   : > { %496 = vmatpush.bf16.msra.mxu1 %v357_v45  ;;  %v1127_v6 = vor.u32 %v1182_v1, %v1126_v0  ;;  %v320_v7 = vld [vmem:[%s1319_s26 + $0x20] sm:$0xff]  ;;  %v322_v8 = vld [vmem:[%s1319_s26 + $0x30] sm:$0xff]  ;;  %v321_v9 = vld [vmem:[%s1319_s26 + $0x28] sm:$0xff]  ;;  %v1131_v10 = vor.u32 %v1181_v2, %v1128_v3 }
  0x20   : > { %673 = vmatpush.bf16.msra.mxu2 %v1143_v46  ;;  %722 = vmatpush.bf16.msra.mxu3 %v1147_v50  ;;  %v323_v11 = vld [vmem:[%s1319_s26 + $0x38] sm:$0xff]  ;;  %v1118_v12 = vld [vmem:[%s1327_s29 + $0x10] sm:$0xf]  ;;  %v1179_v14 = vld [vmem:[%s1327_s29 + $0x14] sm:$0xf]  ;;  %v350_v18 = vpack.c.bf16 %v322_v8, %v320_v7 }
  0x21   : > { %v1180_v13 = vld [vmem:[%s1327_s29 + $0x14] sm:$0xf0]  ;;  %v1120_v15 = vld [vmem:[%s1327_s29 + $0x18] sm:$0xf0]  ;;  %v768_v17 = vld [vmem:[%s1538_s4] sm:$0xff]  ;;  %v351_v19 = vpack.c.bf16 %v323_v11, %v321_v9 }
  0x22   : > { %448 = vmatpush.bf16.msra.mxu0 %v354_v56  ;;  %786 = vperm.xlu0 %1234, %v768_v17   ;;  %v1119_v20 = vor.u32 %v1180_v13, %v1118_v12  ;;  %v316_v21 = vld [vmem:[%s1319_s26] sm:$0xff]  ;;  %v318_v22 = vld [vmem:[%s1319_s26 + $0x10] sm:$0xff]  ;;  %v317_v23 = vld [vmem:[%s1319_s26 + $0x8] sm:$0xff]  ;;  %v1123_v24 = vor.u32 %v1179_v14, %v1120_v15 }
  0x23   : > { %497 = vmatpush.bf16.msra.mxu1 %v355_v57  ;;  %v319_v25 = vld [vmem:[%s1319_s26 + $0x18] sm:$0xff]  ;;  %v1110_v26 = vld [vmem:[%s1327_s29] sm:$0xf]  ;;  %v1178_v27 = vld [vmem:[%s1327_s29 + $0x4] sm:$0xf0]  ;;  %v348_v30 = vpack.c.bf16 %v318_v22, %v316_v21 }
  0x24   : > { %674 = vmatpush.bf16.msra.mxu2 %v1135_v58  ;;  %723 = vmatpush.bf16.msra.mxu3 %v1139_v62  ;;  %v1177_v28 = vld [vmem:[%s1327_s29 + $0x4] sm:$0xf]  ;;  %v1112_v29 = vld [vmem:[%s1327_s29 + $0x8] sm:$0xf0]  ;;  %v349_v31 = vpack.c.bf16 %v319_v25, %v317_v23  ;;  %v1111_v32 = vor.u32 %v1178_v27, %v1110_v26  ;;  %v770_v37 = vld [vmem:[%s1538_s4 + $0x10] sm:$0xff] }
  0x25   : > { %v769_v33 = vld [vmem:[%s1538_s4 + $0x8] sm:$0xff]  ;;  %v1115_v34 = vor.u32 %v1177_v28, %v1112_v29  ;;  %v1201_v35 = vld [vmem:[%s1537_s3] sm:$0xff]  ;;  %796 = vperm.xlu1 %1235, %v770_v37   ;;  %v771_v38 = vld [vmem:[%s1538_s4 + $0x18] sm:$0xff] }
  0x26   : > { %449 = vmatpush.bf16.msra.mxu0 %v352_v4  ;;  %v1193_v36 = vld [vmem:[%s1536_s2] sm:$0xff]  ;;  %v1202_v39 = vld [vmem:[%s1537_s3 + $0x8] sm:$0xff]  ;;  %v1203_v41 = vld [vmem:[%s1537_s3 + $0x10] sm:$0xff] }
  0x27   : > { %498 = vmatpush.bf16.msra.mxu1 %v353_v5  ;;  %v1194_v40 = vld [vmem:[%s1536_s2 + $0x8] sm:$0xff]  ;;  %v1195_v42 = vld [vmem:[%s1536_s2 + $0x10] sm:$0xff]  ;;  %v772_v44 = vld [vmem:[%s1538_s4 + $0x20] sm:$0xff] }
  0x28   : > { %675 = vmatpush.bf16.msra.mxu2 %v1127_v6  ;;  %724 = vmatpush.bf16.msra.mxu3 %v1131_v10  ;;  %v774_v43 = vld [vmem:[%s1538_s4 + $0x30] sm:$0xff]  ;;  %v775_v45 = vld [vmem:[%s1538_s4 + $0x38] sm:$0xff]  ;;  %v773_v48 = vld [vmem:[%s1538_s4 + $0x28] sm:$0xff] }
  0x29   : > { %806 = vperm.xlu2 %1236, %v772_v44   ;;  %v1204_v46 = vld [vmem:[%s1537_s3 + $0x18] sm:$0xff]  ;;  %v777_v49 = vld [vmem:[%s1538_s4 + $0x48] sm:$0xff]  ;;  %v780_v50 = vld [vmem:[%s1538_s4 + $0x60] sm:$0xff] }
  0x2a   : > { %450 = vmatpush.bf16.msra.mxu0 %v350_v18  ;;  %791 = vperm.xlu0 %1234, %v769_v33   ;;  %v1196_v47 = vld [vmem:[%s1536_s2 + $0x18] sm:$0xff]  ;;  %v1205_v51 = vld [vmem:[%s1537_s3 + $0x20] sm:$0xff]  ;;  %v778_v53 = vld [vmem:[%s1538_s4 + $0x50] sm:$0xff] }
  0x2b   : > { %499 = vmatpush.bf16.msra.mxu1 %v351_v19  ;;  %v1197_v52 = vld [vmem:[%s1536_s2 + $0x20] sm:$0xff]  ;;  %v783_v54 = vld [vmem:[%s1538_s4 + $0x78] sm:$0xff]  ;;  %v781_v56 = vld [vmem:[%s1538_s4 + $0x68] sm:$0xff] }
  0x2c   : > { %676 = vmatpush.bf16.msra.mxu2 %v1119_v20  ;;  %725 = vmatpush.bf16.msra.mxu3 %v1123_v24  ;;  %v776_v55 = vld [vmem:[%s1538_s4 + $0x40] sm:$0xff]  ;;  %v1206_v57 = vld [vmem:[%s1537_s3 + $0x28] sm:$0xff]  ;;  %v779_v59 = vld [vmem:[%s1538_s4 + $0x58] sm:$0xff] }
  0x2d   : > { %801 = vperm.xlu1 %1235, %v771_v38   ;;  %v1198_v58 = vld [vmem:[%s1536_s2 + $0x28] sm:$0xff]  ;;  %v1207_v60 = vld [vmem:[%s1537_s3 + $0x30] sm:$0xff]  ;;  %v1208_v63 = vld [vmem:[%s1537_s3 + $0x38] sm:$0xff] }
  0x2e   : > { %451 = vmatpush.bf16.msra.mxu0 %v348_v30  ;;  %v1199_v61 = vld [vmem:[%s1536_s2 + $0x30] sm:$0xff]  ;;  %v1200_v0 = vld [vmem:[%s1536_s2 + $0x38] sm:$0xff] }
  0x2f   : > { %500 = vmatpush.bf16.msra.mxu1 %v349_v31  ;;  %v782_v62 = vld [vmem:[%s1538_s4 + $0x70] sm:$0xff] }
  0x30   : > { %677 = vmatpush.bf16.msra.mxu2 %v1111_v32  ;;  %726 = vmatpush.bf16.msra.mxu3 %v1115_v34 }
  0x31   : > { %452 = vmatmul.bf16.vlgmr.msra.gmra.mxu0 %v1201_v35  ;;  %811 = vperm.xlu2 %1236, %v773_v48  }
  0x32   : > { %501 = vmatmul.bf16.vlgmr.msra.gmra.mxu1 %v1201_v35  ;;  %816 = vperm.xlu0 %1234, %v774_v43  }
  0x33   : > { %678 = vmatmul.bf16.vlgmr.msra.gmra.mxu2 %v1193_v36  ;;  %727 = vmatmul.bf16.vlgmr.msra.gmra.mxu3 %v1193_v36 }
  0x35   : > { %821 = vperm.xlu1 %1235, %v775_v45  }
  0x39   : > { %826 = vperm.xlu2 %1236, %v776_v55  }
  0x3a   : > { %831 = vperm.xlu0 %1234, %v777_v49  }
  0x3d   : > { %836 = vperm.xlu1 %1235, %v778_v53  }
  0x41   : > { %457 = vmatmul.bf16.gmra.mxu0 %v1202_v39  ;;  %841 = vperm.xlu2 %1236, %v779_v59  }
  0x42   : > { %506 = vmatmul.bf16.gmra.mxu1 %v1202_v39  ;;  %846 = vperm.xlu0 %1234, %v780_v50  }
  0x43   : > { %683 = vmatmul.bf16.gmra.mxu2 %v1194_v40  ;;  %732 = vmatmul.bf16.gmra.mxu3 %v1194_v40 }
  0x45   : > { %851 = vperm.xlu1 %1235, %v781_v56  }
  0x49   : > { %856 = vperm.xlu2 %1236, %v782_v62  }
  0x4a   : > { %861 = vperm.xlu0 %1234, %v783_v54  }
  0x51   : > { %462 = vmatmul.bf16.gmra.mxu0 %v1203_v41 }
  0x52   : > { %511 = vmatmul.bf16.gmra.mxu1 %v1203_v41 }
  0x53   : > { %688 = vmatmul.bf16.gmra.mxu2 %v1195_v42  ;;  %737 = vmatmul.bf16.gmra.mxu3 %v1195_v42 }
  0x61   : > { %467 = vmatmul.bf16.gmra.mxu0 %v1204_v46 }
  0x62   : > { %516 = vmatmul.bf16.gmra.mxu1 %v1204_v46 }
  0x63   : > { %693 = vmatmul.bf16.gmra.mxu2 %v1196_v47  ;;  %742 = vmatmul.bf16.gmra.mxu3 %v1196_v47 }
  0x71   : > { %472 = vmatmul.bf16.gmra.mxu0 %v1205_v51 }
  0x72   : > { %521 = vmatmul.bf16.gmra.mxu1 %v1205_v51 }
  0x73   : > { %698 = vmatmul.bf16.gmra.mxu2 %v1197_v52  ;;  %747 = vmatmul.bf16.gmra.mxu3 %v1197_v52 }
  0x81   : > { %477 = vmatmul.bf16.gmra.mxu0 %v1206_v57 }
  0x82   : > { %526 = vmatmul.bf16.gmra.mxu1 %v1206_v57 }
  0x83   : > { %703 = vmatmul.bf16.gmra.mxu2 %v1198_v58  ;;  %752 = vmatmul.bf16.gmra.mxu3 %v1198_v58  ;;  %v807_v39 = vpop.permute.xlu2 %806 }
  0x8b   : > { %v812_v49 = vpop.permute.xlu2 %811 }
  0x91   : > { %482 = vmatmul.bf16.gmra.mxu0 %v1207_v60 }
  0x92   : > { %531 = vmatmul.bf16.gmra.mxu1 %v1207_v60 }
  0x93   : > { %708 = vmatmul.bf16.gmra.mxu2 %v1199_v61  ;;  %757 = vmatmul.bf16.gmra.mxu3 %v1199_v61 }
  0x94   : > { %v787_v3 = vpop.permute.xlu0 %786 }
  0x97   : > { %v797_v21 = vpop.permute.xlu1 %796 }
  0x9c   : > { %v792_v13 = vpop.permute.xlu0 %791 }
  0x9f   : > { %v802_v31 = vpop.permute.xlu1 %801 }
  0xa1   : > { %487 = vmatmul.bf16.gmra.mxu0 %v1208_v63 }
  0xa2   : > { %536 = vmatmul.bf16.gmra.mxu1 %v1208_v63 }
  0xa3   : > { %713 = vmatmul.bf16.gmra.mxu2 %v1200_v0  ;;  %762 = vmatmul.bf16.gmra.mxu3 %v1200_v0 }
  0xa4   : > { %v817_v58 = vpop.permute.xlu0 %816 }
  0xae   : > { %v453_v1 = vpop.f32.mrf.mxu0 }
  0xaf   : > { %v502_v2 = vpop.f32.mrf.mxu1 }
  0xb6   : > { %v679_v4 = vpop.f32.mrf.mxu2  ;;  %v728_v6 = vpop.f32.mrf.mxu3 }
  0xb7   : > { %v680_v5 = vadd.f32 %v679_v4, %v453_v1  ;;  %v455_v7 = vpop.f32.mrf.mxu0  ;;  %v729_v8 = vadd.f32 %v728_v6, %v502_v2  ;;  %v504_v9 = vpop.f32.mrf.mxu1 }
  0xb9   : > { %v864_v10 = vadd.f32 %v787_v3, %v680_v5  ;;  %v865_v11 = vadd.f32 %v787_v3, %v729_v8  ;;  %v822_v3 = vpop.permute.xlu1 %821 }
  0xbb   : > { %896 = vst [vmem:[%s1491_s11] sm:$0xff] %v864_v10 }
  0xbc   : > { %897 = vst [vmem:[%s1491_s11 + $0x8] sm:$0xff] %v865_v11 }
  0xbe   : > { %v681_v12 = vpop.f32.mrf.mxu2  ;;  %v730_v15 = vpop.f32.mrf.mxu3 }
  0xbf   : > { %v682_v14 = vadd.f32 %v681_v12, %v455_v7  ;;  %v458_v16 = vpop.f32.mrf.mxu0  ;;  %v731_v17 = vadd.f32 %v730_v15, %v504_v9  ;;  %v507_v18 = vpop.f32.mrf.mxu1 }
  0xc0   : > { %v827_v12 = vpop.permute.xlu2 %826 }
  0xc1   : > { %v866_v19 = vadd.f32 %v792_v13, %v682_v14  ;;  %v867_v20 = vadd.f32 %v792_v13, %v731_v17 }
  0xc3   : > { %898 = vst [vmem:[%s1491_s11 + $0x10] sm:$0xff] %v866_v19 }
  0xc4   : > { %899 = vst [vmem:[%s1491_s11 + $0x18] sm:$0xff] %v867_v20 }
  0xc6   : > { %v684_v22 = vpop.f32.mrf.mxu2  ;;  %v733_v24 = vpop.f32.mrf.mxu3 }
  0xc7   : > { %v685_v23 = vadd.f32 %v684_v22, %v458_v16  ;;  %v460_v25 = vpop.f32.mrf.mxu0  ;;  %v734_v26 = vadd.f32 %v733_v24, %v507_v18  ;;  %v509_v27 = vpop.f32.mrf.mxu1 }
  0xc8   : > { %v832_v24 = vpop.permute.xlu0 %831 }
  0xc9   : > { %v868_v28 = vadd.f32 %v797_v21, %v685_v23  ;;  %v869_v29 = vadd.f32 %v797_v21, %v734_v26 }
  0xcb   : > { %900 = vst [vmem:[%s1491_s11 + $0x20] sm:$0xff] %v868_v28 }
  0xcc   : > { %901 = vst [vmem:[%s1491_s11 + $0x28] sm:$0xff] %v869_v29 }
  0xce   : > { %v686_v30 = vpop.f32.mrf.mxu2  ;;  %v735_v33 = vpop.f32.mrf.mxu3 }
  0xcf   : > { %v687_v32 = vadd.f32 %v686_v30, %v460_v25  ;;  %v463_v34 = vpop.f32.mrf.mxu0  ;;  %v736_v35 = vadd.f32 %v735_v33, %v509_v27  ;;  %v512_v36 = vpop.f32.mrf.mxu1 }
  0xd0   : > { %v837_v30 = vpop.permute.xlu1 %836 }
  0xd1   : > { %v870_v37 = vadd.f32 %v802_v31, %v687_v32  ;;  %v871_v38 = vadd.f32 %v802_v31, %v736_v35 }
  0xd3   : > { %902 = vst [vmem:[%s1491_s11 + $0x30] sm:$0xff] %v870_v37 }
  0xd4   : > { %903 = vst [vmem:[%s1491_s11 + $0x38] sm:$0xff] %v871_v38 }
  0xd6   : > { %v689_v40 = vpop.f32.mrf.mxu2  ;;  %v738_v42 = vpop.f32.mrf.mxu3 }
  0xd7   : > { %v690_v41 = vadd.f32 %v689_v40, %v463_v34  ;;  %v465_v43 = vpop.f32.mrf.mxu0  ;;  %v739_v44 = vadd.f32 %v738_v42, %v512_v36  ;;  %v514_v45 = vpop.f32.mrf.mxu1 }
  0xd9   : > { %v872_v46 = vadd.f32 %v807_v39, %v690_v41  ;;  %v873_v47 = vadd.f32 %v807_v39, %v739_v44  ;;  %v842_v41 = vpop.permute.xlu2 %841 }
  0xdb   : > { %904 = vst [vmem:[%s1491_s11 + $0x40] sm:$0xff] %v872_v46 }
  0xdc   : > { %905 = vst [vmem:[%s1491_s11 + $0x48] sm:$0xff] %v873_v47 }
  0xde   : > { %v691_v48 = vpop.f32.mrf.mxu2  ;;  %v740_v51 = vpop.f32.mrf.mxu3 }
  0xdf   : > { %v692_v50 = vadd.f32 %v691_v48, %v465_v43  ;;  %v468_v52 = vpop.f32.mrf.mxu0  ;;  %v741_v53 = vadd.f32 %v740_v51, %v514_v45  ;;  %v517_v54 = vpop.f32.mrf.mxu1 }
  0xe1   : > { %v874_v55 = vadd.f32 %v812_v49, %v692_v50  ;;  %v875_v56 = vadd.f32 %v812_v49, %v741_v53  ;;  %v847_v50 = vpop.permute.xlu0 %846 }
  0xe3   : > { %906 = vst [vmem:[%s1491_s11 + $0x50] sm:$0xff] %v874_v55 }
  0xe4   : > { %907 = vst [vmem:[%s1491_s11 + $0x58] sm:$0xff] %v875_v56 }
  0xe6   : > { %v694_v57 = vpop.f32.mrf.mxu2  ;;  %v743_v60 = vpop.f32.mrf.mxu3 }
  0xe7   : > { %v695_v59 = vadd.f32 %v694_v57, %v468_v52  ;;  %v470_v61 = vpop.f32.mrf.mxu0  ;;  %v744_v62 = vadd.f32 %v743_v60, %v517_v54  ;;  %v519_v63 = vpop.f32.mrf.mxu1 }
  0xe9   : > { %v876_v0 = vadd.f32 %v817_v58, %v695_v59  ;;  %v877_v1 = vadd.f32 %v817_v58, %v744_v62  ;;  %v852_v59 = vpop.permute.xlu1 %851 }
  0xeb   : > { %908 = vst [vmem:[%s1491_s11 + $0x60] sm:$0xff] %v876_v0 }
  0xec   : > { %909 = vst [vmem:[%s1491_s11 + $0x68] sm:$0xff] %v877_v1 }
  0xee   : > { %v696_v2 = vpop.f32.mrf.mxu2  ;;  %v745_v5 = vpop.f32.mrf.mxu3 }
  0xef   : > { %v697_v4 = vadd.f32 %v696_v2, %v470_v61  ;;  %v473_v6 = vpop.f32.mrf.mxu0  ;;  %v746_v7 = vadd.f32 %v745_v5, %v519_v63  ;;  %v522_v8 = vpop.f32.mrf.mxu1 }
  0xf1   : > { %v878_v9 = vadd.f32 %v822_v3, %v697_v4  ;;  %v879_v10 = vadd.f32 %v822_v3, %v746_v7  ;;  %v857_v4 = vpop.permute.xlu2 %856 }
  0xf3   : > { %910 = vst [vmem:[%s1491_s11 + $0x70] sm:$0xff] %v878_v9 }
  0xf4   : > { %911 = vst [vmem:[%s1491_s11 + $0x78] sm:$0xff] %v879_v10 }
  0xf6   : > { %v699_v11 = vpop.f32.mrf.mxu2  ;;  %v748_v14 = vpop.f32.mrf.mxu3 }
  0xf7   : > { %v700_v13 = vadd.f32 %v699_v11, %v473_v6  ;;  %v475_v15 = vpop.f32.mrf.mxu0  ;;  %v749_v16 = vadd.f32 %v748_v14, %v522_v8  ;;  %v524_v17 = vpop.f32.mrf.mxu1 }
  0xf9   : > { %v880_v18 = vadd.f32 %v827_v12, %v700_v13  ;;  %v881_v19 = vadd.f32 %v827_v12, %v749_v16  ;;  %v862_v13 = vpop.permute.xlu0 %861 }
  0xfb   : > { %912 = vst [vmem:[%s1491_s11 + $0x80] sm:$0xff] %v880_v18 }
  0xfc   : > { %913 = vst [vmem:[%s1491_s11 + $0x88] sm:$0xff] %v881_v19 }
  0xfe   : > { %v701_v20 = vpop.f32.mrf.mxu2  ;;  %v750_v22 = vpop.f32.mrf.mxu3 }
  0xff   : > { %v702_v21 = vadd.f32 %v701_v20, %v475_v15  ;;  %v478_v23 = vpop.f32.mrf.mxu0  ;;  %v751_v25 = vadd.f32 %v750_v22, %v524_v17  ;;  %v527_v26 = vpop.f32.mrf.mxu1 }
 0x101   : > { %v882_v27 = vadd.f32 %v832_v24, %v702_v21  ;;  %v883_v28 = vadd.f32 %v832_v24, %v751_v25 }
 0x103   : > { %914 = vst [vmem:[%s1491_s11 + $0x90] sm:$0xff] %v882_v27 }
 0x104   : > { %915 = vst [vmem:[%s1491_s11 + $0x98] sm:$0xff] %v883_v28 }
 0x106   : > { %v704_v29 = vpop.f32.mrf.mxu2  ;;  %v753_v32 = vpop.f32.mrf.mxu3 }
 0x107   : > { %v705_v31 = vadd.f32 %v704_v29, %v478_v23  ;;  %v480_v33 = vpop.f32.mrf.mxu0  ;;  %v754_v34 = vadd.f32 %v753_v32, %v527_v26  ;;  %v529_v35 = vpop.f32.mrf.mxu1 }
 0x109   : > { %v884_v36 = vadd.f32 %v837_v30, %v705_v31  ;;  %v885_v37 = vadd.f32 %v837_v30, %v754_v34 }
 0x10b   : > { %916 = vst [vmem:[%s1491_s11 + $0xa0] sm:$0xff] %v884_v36 }
 0x10c   : > { %917 = vst [vmem:[%s1491_s11 + $0xa8] sm:$0xff] %v885_v37 }
 0x10e   : > { %v706_v38 = vpop.f32.mrf.mxu2  ;;  %v755_v40 = vpop.f32.mrf.mxu3 }
 0x10f   : > { %v707_v39 = vadd.f32 %v706_v38, %v480_v33  ;;  %v756_v42 = vadd.f32 %v755_v40, %v529_v35  ;;  %v483_v43 = vpop.f32.mrf.mxu0  ;;  %v532_v45 = vpop.f32.mrf.mxu1 }
 0x111   : > { %v886_v44 = vadd.f32 %v842_v41, %v707_v39  ;;  %v887_v46 = vadd.f32 %v842_v41, %v756_v42 }
 0x113   : > { %918 = vst [vmem:[%s1491_s11 + $0xb0] sm:$0xff] %v886_v44 }
 0x114   : > { %919 = vst [vmem:[%s1491_s11 + $0xb8] sm:$0xff] %v887_v46 }
 0x116   : > { %v709_v47 = vpop.f32.mrf.mxu2  ;;  %v758_v49 = vpop.f32.mrf.mxu3 }
 0x117   : > { %v710_v48 = vadd.f32 %v709_v47, %v483_v43  ;;  %v759_v51 = vadd.f32 %v758_v49, %v532_v45  ;;  %v485_v54 = vpop.f32.mrf.mxu0  ;;  %v534_v55 = vpop.f32.mrf.mxu1 }
 0x119   : > { %v888_v52 = vadd.f32 %v847_v50, %v710_v48  ;;  %v889_v53 = vadd.f32 %v847_v50, %v759_v51 }
 0x11b   : > { %920 = vst [vmem:[%s1491_s11 + $0xc0] sm:$0xff] %v888_v52 }
 0x11c   : > { %921 = vst [vmem:[%s1491_s11 + $0xc8] sm:$0xff] %v889_v53 }
 0x11e   : > { %v711_v56 = vpop.f32.mrf.mxu2  ;;  %v760_v58 = vpop.f32.mrf.mxu3 }
 0x11f   : > { %v712_v57 = vadd.f32 %v711_v56, %v485_v54  ;;  %v761_v60 = vadd.f32 %v760_v58, %v534_v55  ;;  %v488_v63 = vpop.f32.mrf.mxu0  ;;  %v537_v0 = vpop.f32.mrf.mxu1 }
 0x121   : > { %v890_v61 = vadd.f32 %v852_v59, %v712_v57  ;;  %v891_v62 = vadd.f32 %v852_v59, %v761_v60 }
 0x123   : > { %922 = vst [vmem:[%s1491_s11 + $0xd0] sm:$0xff] %v890_v61 }
 0x124   : > { %923 = vst [vmem:[%s1491_s11 + $0xd8] sm:$0xff] %v891_v62 }
 0x126   : > { %v714_v1 = vpop.f32.mrf.mxu2  ;;  %v763_v3 = vpop.f32.mrf.mxu3 }
 0x127   : > { %v715_v2 = vadd.f32 %v714_v1, %v488_v63  ;;  %v764_v5 = vadd.f32 %v763_v3, %v537_v0  ;;  %v490_v8 = vpop.f32.mrf.mxu0  ;;  %v539_v10 = vpop.f32.mrf.mxu1 }
 0x129   : > { %v892_v6 = vadd.f32 %v857_v4, %v715_v2  ;;  %v893_v7 = vadd.f32 %v857_v4, %v764_v5 }
 0x12b   : > { %924 = vst [vmem:[%s1491_s11 + $0xe0] sm:$0xff] %v892_v6 }
 0x12c   : > { %925 = vst [vmem:[%s1491_s11 + $0xe8] sm:$0xff] %v893_v7 }
 0x12e   : > { %v716_v9 = vpop.f32.mrf.mxu2  ;;  %v765_v12 = vpop.f32.mrf.mxu3 }
 0x12f   : > { %v717_v11 = vadd.f32 %v716_v9, %v490_v8  ;;  %v766_v14 = vadd.f32 %v765_v12, %v539_v10 }
 0x131   : > { %v894_v15 = vadd.f32 %v862_v13, %v717_v11  ;;  %v895_v16 = vadd.f32 %v862_v13, %v766_v14 }
 0x133   : > { %926 = vst [vmem:[%s1491_s11 + $0xf0] sm:$0xff] %v894_v15 }
 0x134   : > { %927 = vst [vmem:[%s1491_s11 + $0xf8] sm:$0xff] %v895_v16 }
 0x135 PF: > { %s15_s20 = sadd.s32 1, %s1259_s20   ;;  %s1540_s18 = smov %s1255_s19 }
 0x136   : > { %p12_p5 = scmp.ge.s32.totalorder %s15_s20, 4   ;;  %s1541_s19 = smov %s1543_s21 }
 0x138   :  { %14 = sbr.rel (!%p12_p5) target bundleno = 2 (0x2), region = 73 }

</bundles_post_ra>
